<compile_context>
chip_gen: v7x
topology: tpu7x:2x2x1
jax: 0.10.0
libtpu: 0.0.40
codegen_flags: <defaults>
</compile_context>

<pallas_src>
import functools

import numpy as np

import jax
import jax.numpy as jnp
from jax.experimental import pallas as pl
from jax.experimental.pallas import tpu as pltpu


# ----------------------------------------------------------------------------
# Fused residual-block kernel (B batch images packed per grid step)
# ----------------------------------------------------------------------------
def _residual_block_kernel(x_ref, masks_ref, w1_ref, b1_ref, w2_ref, b2_ref,
                           o_ref, slab_ref, *, w, halo):
    """relu(bn2(conv2(relu(bn1(conv1(x))))) + x), eval-mode BN pre-folded.

    x_ref:     (M, C)          f32   M = B*H*W packed NHWC rows (C on lanes)
    masks_ref: (9, M, C)       f32   per-tap in-image masks (resident)
    w*_ref:    (9, C, C)       bf16  tap weights (cin, cout), BN scale folded
    b*_ref:    (1, C)          f32   folded conv bias + BN bias
    o_ref:     (M, C)          f32
    slab_ref:  (M + 2*halo, C) f32   VMEM scratch; activation in the middle,
                                     halo rows stay zero.
    """
    m, c = x_ref.shape
    c_out = w1_ref.shape[-1]

    # Zero the halo once. Every out-of-image tap row is also masked to zero;
    # the zeros just guarantee no stale NaN/Inf can leak through `0 * x`.
    slab_ref[0:halo, :] = jnp.zeros((halo, c), jnp.float32)
    slab_ref[halo + m:halo + m + halo, :] = jnp.zeros((halo, c), jnp.float32)

    def conv3x3_bn(a, w_ref, b_ref):
        # a: (M, C) f32 -> (M, C_out) f32.  3x3 / pad=1 conv as 9 statically
        # shifted windows of the haloed slab; each window is masked (rows that
        # would read image padding or leak into the neighbouring packed image
        # are zeroed) and contracted on the MXU in bf16 with f32 accumulation.
        slab_ref[halo:halo + m, :] = a
        acc = jnp.zeros((m, c_out), jnp.float32)
        for kh in range(3):
            for kw in range(3):
                k = kh * 3 + kw
                s = (kh - 1) * w + (kw - 1)
                tap = slab_ref[halo + s:halo + s + m, :] * masks_ref[k]
                acc = acc + jnp.dot(tap.astype(jnp.bfloat16), w_ref[k],
                                    preferred_element_type=jnp.float32)
        return acc + b_ref[...]

    hidden = jnp.maximum(conv3x3_bn(x_ref[...], w1_ref, b1_ref), 0.0)
    out = conv3x3_bn(hidden, w2_ref, b2_ref) + x_ref[...]
    o_ref[...] = jnp.maximum(out, 0.0)


# ----------------------------------------------------------------------------
# Wrapper helpers
# ----------------------------------------------------------------------------
@functools.lru_cache(maxsize=None)
def _tap_masks(h, w, block_b, c):
    """(9, block_b*h*w, c) f32 device array: 1.0 where the 3x3 tap stays
    inside its own image, 0.0 where it would read padding or a neighbouring
    packed image. Cached so a residual tower builds/uploads it once."""
    ii, jj = np.meshgrid(np.arange(h), np.arange(w), indexing="ij")
    per_image = np.zeros((9, h * w), np.float32)
    for kh in range(3):
        for kw in range(3):
            dh, dw = kh - 1, kw - 1
            ok = ((ii + dh >= 0) & (ii + dh < h) &
                  (jj + dw >= 0) & (jj + dw < w))
            per_image[kh * 3 + kw] = ok.reshape(-1).astype(np.float32)
    tiled = np.tile(per_image, (1, block_b))                      # (9, B*H*W)
    full = np.broadcast_to(tiled[:, :, None], (9, block_b * h * w, c))
    return jnp.asarray(np.ascontiguousarray(full))


def _pick_block_batch(n, hw, target_rows=256):
    """Pack B images per grid step so B*H*W >= target_rows (MXU M fill and
    step-overhead amortization), but keep >= 2 grid steps when the batch
    allows so v7x's two TensorCores both get work."""
    b = max(1, min(n, -(-target_rows // hw)))
    if n >= 2 and -(-n // b) < 2:
        b = -(-n // 2)
    return b


def residual_block_forward_rows(x_rows, params, *, h, w):
    """Forward pass on the (N, H*W, C) rows layout (channels on lanes).
    Use this inside a residual tower so NCHW<->rows conversion happens once."""
    n, hw, c = x_rows.shape
    assert hw == h * w
    b = _pick_block_batch(n, hw)
    n_blocks = -(-n // b)
    m = b * hw                                    # rows per grid step
    halo = ((w + 1 + 7) // 8) * 8                 # >= w+1, 8-aligned

    x_flat = x_rows.reshape(n * hw, c).astype(jnp.float32)
    if n_blocks * b != n:                         # pad batch to a multiple of b
        x_flat = jnp.pad(x_flat, ((0, (n_blocks * b - n) * hw), (0, 0)))

    masks = _tap_masks(h, w, b, c)
    kernel = functools.partial(_residual_block_kernel, w=w, halo=halo)

    out_flat = pl.pallas_call(
        kernel,
        out_shape=jax.ShapeDtypeStruct((n_blocks * m, c), jnp.float32),
        grid=(n_blocks,),
        in_specs=[
            pl.BlockSpec((m, c), lambda i: (i, 0)),        # packed rows
            pl.BlockSpec((9, m, c), lambda i: (0, 0, 0)),  # masks (resident)
            pl.BlockSpec((9, c, c), lambda i: (0, 0, 0)),  # w1 (resident)
            pl.BlockSpec((1, c), lambda i: (0, 0)),        # b1
            pl.BlockSpec((9, c, c), lambda i: (0, 0, 0)),  # w2 (resident)
            pl.BlockSpec((1, c), lambda i: (0, 0)),        # b2
        ],
        out_specs=pl.BlockSpec((m, c), lambda i: (i, 0)),
        scratch_shapes=[pltpu.VMEM((m + 2 * halo, c), jnp.float32)],
        compiler_params=pltpu.CompilerParams(
            dimension_semantics=("parallel",)),
    )(x_flat, masks, params["w1"], params["b1"], params["w2"], params["b2"])

    return out_flat[:n * hw].reshape(n, hw, c)


def residual_block_forward(x_nchw, params):
    """NCHW in / NCHW out shim around the rows-layout kernel."""
    n, c, h, w = x_nchw.shape
    x_rows = jnp.transpose(x_nchw, (0, 2, 3, 1)).reshape(n, h * w, c)
    out_rows = residual_block_forward_rows(x_rows, params, h=h, w=w)
    return jnp.transpose(out_rows.reshape(n, h, w, c), (0, 3, 1, 2))


# ----------------------------------------------------------------------------
# Parameters (deterministic; folds conv bias + eval-mode BN; bf16 weights)
# ----------------------------------------------------------------------------
def make_residual_block_params(key, channels, eps=1e-5):
    def conv_bn(k):
        k1, k2, k3, k4, k5, k6 = jax.random.split(k, 6)
        w_oihw = 0.05 * jax.random.normal(k1, (channels, channels, 3, 3), jnp.float32)
        b_conv = 0.05 * jax.random.normal(k2, (channels,), jnp.float32)
        gamma = 1.0 + 0.1 * jax.random.normal(k3, (channels,), jnp.float32)
        beta = 0.1 * jax.random.normal(k4, (channels,), jnp.float32)
        mean = 0.1 * jax.random.normal(k5, (channels,), jnp.float32)
        var = 1.0 + 0.1 * jax.random.uniform(k6, (channels,), jnp.float32)
        scale = gamma / jnp.sqrt(var + eps)                        # (Cout,)
        bias = beta + scale * (b_conv - mean)                      # (Cout,)
        # OIHW -> (kh, kw, cin, cout); fold BN scale into the output columns.
        w_hwio = jnp.transpose(w_oihw, (2, 3, 1, 0)) * scale[None, None, None, :]
        w_taps = w_hwio.reshape(9, channels, channels).astype(jnp.bfloat16)
        return w_taps, bias.reshape(1, channels).astype(jnp.float32), w_hwio

    k1, k2 = jax.random.split(key)
    w1, b1, w1_hwio = conv_bn(k1)
    w2, b2, w2_hwio = conv_bn(k2)
    return {"w1": w1, "b1": b1, "w2": w2, "b2": b2,
            # f32 HWIO copies used only by the XLA reference check
            "w1_hwio": w1_hwio, "w2_hwio": w2_hwio}


# ----------------------------------------------------------------------------
# Pure-XLA f32 reference (same folded eval-mode BN math) for a sanity check
# ----------------------------------------------------------------------------
def residual_block_reference(x_nchw, params):
    dn = ("NCHW", "HWIO", "NCHW")

    def conv_bn(x, w_hwio, b):
        y = jax.lax.conv_general_dilated(x, w_hwio, (1, 1), "SAME",
                                         dimension_numbers=dn)
        return y + b.reshape(1, -1, 1, 1)

    hidden = jax.nn.relu(conv_bn(x_nchw, params["w1_hwio"], params["b1"][0]))
    out = conv_bn(hidden, params["w2_hwio"], params["b2"][0]) + x_nchw
    return jax.nn.relu(out)


if __name__ == "__main__":
    key = jax.random.PRNGKey(0)
    kx, kp = jax.random.split(key)

    # ChessResNet block shape: 8x8 board, 64 channels; batch 8 exercises the
    # batch-packed grid (B=4 images per step -> M=256 rows, 2 grid steps).
    batch, channels, height, width = 8, 64, 8, 8
    x = jax.random.normal(kx, (batch, channels, height, width), jnp.float32)
    params = make_residual_block_params(kp, channels)

    out = jax.block_until_ready(residual_block_forward(x, params))
    assert out.shape == (batch, channels, height, width)
    assert bool(jnp.isfinite(out).all())

    # bf16 matmul operands vs f32 reference; per-block quantization error is
    # well under this bound (validate end-to-end accuracy for a deep tower).
    ref = residual_block_reference(x, params)
    rel_err = float(jnp.linalg.norm(out - ref) / (jnp.linalg.norm(ref) + 1e-9))
    assert rel_err < 5e-2, f"mismatch vs reference: rel_err={rel_err}"

    print("KERNEL_OK")
</pallas_src>

<mosaic_0001>
module attributes {stable_mosaic.version = 11 : i64} {
  func.func @_residual_block_kernel(%arg0: i32, %arg1: memref<256x64xf32, #tpu.memory_space<vmem>>, %arg2: memref<9x256x64xf32, #tpu.memory_space<vmem>>, %arg3: memref<9x64x64xbf16, #tpu.memory_space<vmem>>, %arg4: memref<1x64xf32, #tpu.memory_space<vmem>>, %arg5: memref<9x64x64xbf16, #tpu.memory_space<vmem>>, %arg6: memref<1x64xf32, #tpu.memory_space<vmem>>, %arg7: memref<256x64xf32, #tpu.memory_space<vmem>>, %arg8: memref<288x64xf32, #tpu.memory_space<vmem>>) attributes {dimension_semantics = [#tpu.dimension_semantics<parallel>], iteration_bounds = array<i64: 2>, scalar_prefetch = 0 : i64, scratch_operands = 1 : i64, tpu.core_type = #tpu.core_type<tc>, window_params = [{transform_indices = @transform_0, window_bounds = array<i64: 256, 64>}, {pipeline_mode = #tpu.pipeline_mode<synchronous>, transform_indices = @transform_1, window_bounds = array<i64: 9, 256, 64>}, {pipeline_mode = #tpu.pipeline_mode<synchronous>, transform_indices = @transform_2, window_bounds = array<i64: 9, 64, 64>}, {pipeline_mode = #tpu.pipeline_mode<synchronous>, transform_indices = @transform_3, window_bounds = array<i64: 1, 64>}, {pipeline_mode = #tpu.pipeline_mode<synchronous>, transform_indices = @transform_4, window_bounds = array<i64: 9, 64, 64>}, {pipeline_mode = #tpu.pipeline_mode<synchronous>, transform_indices = @transform_5, window_bounds = array<i64: 1, 64>}, {transform_indices = @transform_6, window_bounds = array<i64: 256, 64>}]} {
    %cst = arith.constant 0.000000e+00 : f32
    %0 = vector.broadcast %cst : f32 to vector<16x64xf32>
    %c0 = arith.constant 0 : index
    %c0_0 = arith.constant 0 : index
    %1 = vector.load %arg8[%c0, %c0_0] : memref<288x64xf32, #tpu.memory_space<vmem>>, vector<16x64xf32>
    tpu.vector_store %arg8[%c0, %c0_0], %0 {strides = array<i32>} : memref<288x64xf32, #tpu.memory_space<vmem>>, vector<16x64xf32>,
    %cst_1 = arith.constant 0.000000e+00 : f32
    %2 = vector.broadcast %cst_1 : f32 to vector<16x64xf32>
    %c272 = arith.constant 272 : index
    %c0_2 = arith.constant 0 : index
    %3 = vector.load %arg8[%c272, %c0_2] : memref<288x64xf32, #tpu.memory_space<vmem>>, vector<16x64xf32>
    tpu.vector_store %arg8[%c272, %c0_2], %2 {strides = array<i32>} : memref<288x64xf32, #tpu.memory_space<vmem>>, vector<16x64xf32>,
    %c0_3 = arith.constant 0 : index
    %c0_4 = arith.constant 0 : index
    %4 = vector.load %arg1[%c0_3, %c0_4] : memref<256x64xf32, #tpu.memory_space<vmem>>, vector<256x64xf32>
    %c16 = arith.constant 16 : index
    %c0_5 = arith.constant 0 : index
    %5 = vector.load %arg8[%c16, %c0_5] : memref<288x64xf32, #tpu.memory_space<vmem>>, vector<256x64xf32>
    tpu.vector_store %arg8[%c16, %c0_5], %4 {strides = array<i32>} : memref<288x64xf32, #tpu.memory_space<vmem>>, vector<256x64xf32>,
    %cst_6 = arith.constant 0.000000e+00 : f32
    %6 = vector.broadcast %cst_6 : f32 to vector<256x64xf32>
    %c7 = arith.constant 7 : index
    %c0_7 = arith.constant 0 : index
    %7 = vector.load %arg8[%c7, %c0_7] : memref<288x64xf32, #tpu.memory_space<vmem>>, vector<256x64xf32>
    %c0_8 = arith.constant 0 : index
    %c0_9 = arith.constant 0 : index
    %c0_10 = arith.constant 0 : index
    %8 = vector.load %arg2[%c0_8, %c0_9, %c0_10] : memref<9x256x64xf32, #tpu.memory_space<vmem>>, vector<1x256x64xf32>
    %9 = vector.shape_cast %8 : vector<1x256x64xf32> to vector<256x64xf32>
    %10 = arith.mulf %7, %9 : vector<256x64xf32>
    %11 = arith.truncf %10 : vector<256x64xf32> to vector<256x64xbf16>
    %c0_11 = arith.constant 0 : index
    %c0_12 = arith.constant 0 : index
    %c0_13 = arith.constant 0 : index
    %12 = vector.load %arg3[%c0_11, %c0_12, %c0_13] : memref<9x64x64xbf16, #tpu.memory_space<vmem>>, vector<1x64x64xbf16>
    %13 = vector.shape_cast %12 : vector<1x64x64xbf16> to vector<64x64xbf16>
    %cst_14 = arith.constant dense<0.000000e+00> : vector<256x64xf32>
    %14 = tpu.matmul %11, %13, %cst_14 {dimension_numbers = #tpu.dot_dimension_numbers<[1], [0], [0], [1], [0, 0, 1, 1], [], []>} : vector<256x64xbf16>, vector<64x64xbf16>, vector<256x64xf32> -> vector<256x64xf32>
    %15 = arith.addf %6, %14 : vector<256x64xf32>
    %c8 = arith.constant 8 : index
    %c0_15 = arith.constant 0 : index
    %16 = vector.load %arg8[%c8, %c0_15] : memref<288x64xf32, #tpu.memory_space<vmem>>, vector<256x64xf32>
    %c1 = arith.constant 1 : index
    %c0_16 = arith.constant 0 : index
    %c0_17 = arith.constant 0 : index
    %17 = vector.load %arg2[%c1, %c0_16, %c0_17] : memref<9x256x64xf32, #tpu.memory_space<vmem>>, vector<1x256x64xf32>
    %18 = vector.shape_cast %17 : vector<1x256x64xf32> to vector<256x64xf32>
    %19 = arith.mulf %16, %18 : vector<256x64xf32>
    %20 = arith.truncf %19 : vector<256x64xf32> to vector<256x64xbf16>
    %c1_18 = arith.constant 1 : index
    %c0_19 = arith.constant 0 : index
    %c0_20 = arith.constant 0 : index
    %21 = vector.load %arg3[%c1_18, %c0_19, %c0_20] : memref<9x64x64xbf16, #tpu.memory_space<vmem>>, vector<1x64x64xbf16>
    %22 = vector.shape_cast %21 : vector<1x64x64xbf16> to vector<64x64xbf16>
    %cst_21 = arith.constant dense<0.000000e+00> : vector<256x64xf32>
    %23 = tpu.matmul %20, %22, %cst_21 {dimension_numbers = #tpu.dot_dimension_numbers<[1], [0], [0], [1], [0, 0, 1, 1], [], []>} : vector<256x64xbf16>, vector<64x64xbf16>, vector<256x64xf32> -> vector<256x64xf32>
    %24 = arith.addf %15, %23 : vector<256x64xf32>
    %c9 = arith.constant 9 : index
    %c0_22 = arith.constant 0 : index
    %25 = vector.load %arg8[%c9, %c0_22] : memref<288x64xf32, #tpu.memory_space<vmem>>, vector<256x64xf32>
    %c2 = arith.constant 2 : index
    %c0_23 = arith.constant 0 : index
    %c0_24 = arith.constant 0 : index
    %26 = vector.load %arg2[%c2, %c0_23, %c0_24] : memref<9x256x64xf32, #tpu.memory_space<vmem>>, vector<1x256x64xf32>
    %27 = vector.shape_cast %26 : vector<1x256x64xf32> to vector<256x64xf32>
    %28 = arith.mulf %25, %27 : vector<256x64xf32>
    %29 = arith.truncf %28 : vector<256x64xf32> to vector<256x64xbf16>
    %c2_25 = arith.constant 2 : index
    %c0_26 = arith.constant 0 : index
    %c0_27 = arith.constant 0 : index
    %30 = vector.load %arg3[%c2_25, %c0_26, %c0_27] : memref<9x64x64xbf16, #tpu.memory_space<vmem>>, vector<1x64x64xbf16>
    %31 = vector.shape_cast %30 : vector<1x64x64xbf16> to vector<64x64xbf16>
    %cst_28 = arith.constant dense<0.000000e+00> : vector<256x64xf32>
    %32 = tpu.matmul %29, %31, %cst_28 {dimension_numbers = #tpu.dot_dimension_numbers<[1], [0], [0], [1], [0, 0, 1, 1], [], []>} : vector<256x64xbf16>, vector<64x64xbf16>, vector<256x64xf32> -> vector<256x64xf32>
    %33 = arith.addf %24, %32 : vector<256x64xf32>
    %c15 = arith.constant 15 : index
    %c0_29 = arith.constant 0 : index
    %34 = vector.load %arg8[%c15, %c0_29] : memref<288x64xf32, #tpu.memory_space<vmem>>, vector<256x64xf32>
    %c3 = arith.constant 3 : index
    %c0_30 = arith.constant 0 : index
    %c0_31 = arith.constant 0 : index
    %35 = vector.load %arg2[%c3, %c0_30, %c0_31] : memref<9x256x64xf32, #tpu.memory_space<vmem>>, vector<1x256x64xf32>
    %36 = vector.shape_cast %35 : vector<1x256x64xf32> to vector<256x64xf32>
    %37 = arith.mulf %34, %36 : vector<256x64xf32>
    %38 = arith.truncf %37 : vector<256x64xf32> to vector<256x64xbf16>
    %c3_32 = arith.constant 3 : index
    %c0_33 = arith.constant 0 : index
    %c0_34 = arith.constant 0 : index
    %39 = vector.load %arg3[%c3_32, %c0_33, %c0_34] : memref<9x64x64xbf16, #tpu.memory_space<vmem>>, vector<1x64x64xbf16>
    %40 = vector.shape_cast %39 : vector<1x64x64xbf16> to vector<64x64xbf16>
    %cst_35 = arith.constant dense<0.000000e+00> : vector<256x64xf32>
    %41 = tpu.matmul %38, %40, %cst_35 {dimension_numbers = #tpu.dot_dimension_numbers<[1], [0], [0], [1], [0, 0, 1, 1], [], []>} : vector<256x64xbf16>, vector<64x64xbf16>, vector<256x64xf32> -> vector<256x64xf32>
    %42 = arith.addf %33, %41 : vector<256x64xf32>
    %c16_36 = arith.constant 16 : index
    %c0_37 = arith.constant 0 : index
    %43 = vector.load %arg8[%c16_36, %c0_37] : memref<288x64xf32, #tpu.memory_space<vmem>>, vector<256x64xf32>
    %c4 = arith.constant 4 : index
    %c0_38 = arith.constant 0 : index
    %c0_39 = arith.constant 0 : index
    %44 = vector.load %arg2[%c4, %c0_38, %c0_39] : memref<9x256x64xf32, #tpu.memory_space<vmem>>, vector<1x256x64xf32>
    %45 = vector.shape_cast %44 : vector<1x256x64xf32> to vector<256x64xf32>
    %46 = arith.mulf %43, %45 : vector<256x64xf32>
    %47 = arith.truncf %46 : vector<256x64xf32> to vector<256x64xbf16>
    %c4_40 = arith.constant 4 : index
    %c0_41 = arith.constant 0 : index
    %c0_42 = arith.constant 0 : index
    %48 = vector.load %arg3[%c4_40, %c0_41, %c0_42] : memref<9x64x64xbf16, #tpu.memory_space<vmem>>, vector<1x64x64xbf16>
    %49 = vector.shape_cast %48 : vector<1x64x64xbf16> to vector<64x64xbf16>
    %cst_43 = arith.constant dense<0.000000e+00> : vector<256x64xf32>
    %50 = tpu.matmul %47, %49, %cst_43 {dimension_numbers = #tpu.dot_dimension_numbers<[1], [0], [0], [1], [0, 0, 1, 1], [], []>} : vector<256x64xbf16>, vector<64x64xbf16>, vector<256x64xf32> -> vector<256x64xf32>
    %51 = arith.addf %42, %50 : vector<256x64xf32>
    %c17 = arith.constant 17 : index
    %c0_44 = arith.constant 0 : index
    %52 = vector.load %arg8[%c17, %c0_44] : memref<288x64xf32, #tpu.memory_space<vmem>>, vector<256x64xf32>
    %c5 = arith.constant 5 : index
    %c0_45 = arith.constant 0 : index
    %c0_46 = arith.constant 0 : index
    %53 = vector.load %arg2[%c5, %c0_45, %c0_46] : memref<9x256x64xf32, #tpu.memory_space<vmem>>, vector<1x256x64xf32>
    %54 = vector.shape_cast %53 : vector<1x256x64xf32> to vector<256x64xf32>
    %55 = arith.mulf %52, %54 : vector<256x64xf32>
    %56 = arith.truncf %55 : vector<256x64xf32> to vector<256x64xbf16>
    %c5_47 = arith.constant 5 : index
    %c0_48 = arith.constant 0 : index
    %c0_49 = arith.constant 0 : index
    %57 = vector.load %arg3[%c5_47, %c0_48, %c0_49] : memref<9x64x64xbf16, #tpu.memory_space<vmem>>, vector<1x64x64xbf16>
    %58 = vector.shape_cast %57 : vector<1x64x64xbf16> to vector<64x64xbf16>
    %cst_50 = arith.constant dense<0.000000e+00> : vector<256x64xf32>
    %59 = tpu.matmul %56, %58, %cst_50 {dimension_numbers = #tpu.dot_dimension_numbers<[1], [0], [0], [1], [0, 0, 1, 1], [], []>} : vector<256x64xbf16>, vector<64x64xbf16>, vector<256x64xf32> -> vector<256x64xf32>
    %60 = arith.addf %51, %59 : vector<256x64xf32>
    %c23 = arith.constant 23 : index
    %c0_51 = arith.constant 0 : index
    %61 = vector.load %arg8[%c23, %c0_51] : memref<288x64xf32, #tpu.memory_space<vmem>>, vector<256x64xf32>
    %c6 = arith.constant 6 : index
    %c0_52 = arith.constant 0 : index
    %c0_53 = arith.constant 0 : index
    %62 = vector.load %arg2[%c6, %c0_52, %c0_53] : memref<9x256x64xf32, #tpu.memory_space<vmem>>, vector<1x256x64xf32>
    %63 = vector.shape_cast %62 : vector<1x256x64xf32> to vector<256x64xf32>
    %64 = arith.mulf %61, %63 : vector<256x64xf32>
    %65 = arith.truncf %64 : vector<256x64xf32> to vector<256x64xbf16>
    %c6_54 = arith.constant 6 : index
    %c0_55 = arith.constant 0 : index
    %c0_56 = arith.constant 0 : index
    %66 = vector.load %arg3[%c6_54, %c0_55, %c0_56] : memref<9x64x64xbf16, #tpu.memory_space<vmem>>, vector<1x64x64xbf16>
    %67 = vector.shape_cast %66 : vector<1x64x64xbf16> to vector<64x64xbf16>
    %cst_57 = arith.constant dense<0.000000e+00> : vector<256x64xf32>
    %68 = tpu.matmul %65, %67, %cst_57 {dimension_numbers = #tpu.dot_dimension_numbers<[1], [0], [0], [1], [0, 0, 1, 1], [], []>} : vector<256x64xbf16>, vector<64x64xbf16>, vector<256x64xf32> -> vector<256x64xf32>
    %69 = arith.addf %60, %68 : vector<256x64xf32>
    %c24 = arith.constant 24 : index
    %c0_58 = arith.constant 0 : index
    %70 = vector.load %arg8[%c24, %c0_58] : memref<288x64xf32, #tpu.memory_space<vmem>>, vector<256x64xf32>
    %c7_59 = arith.constant 7 : index
    %c0_60 = arith.constant 0 : index
    %c0_61 = arith.constant 0 : index
    %71 = vector.load %arg2[%c7_59, %c0_60, %c0_61] : memref<9x256x64xf32, #tpu.memory_space<vmem>>, vector<1x256x64xf32>
    %72 = vector.shape_cast %71 : vector<1x256x64xf32> to vector<256x64xf32>
    %73 = arith.mulf %70, %72 : vector<256x64xf32>
    %74 = arith.truncf %73 : vector<256x64xf32> to vector<256x64xbf16>
    %c7_62 = arith.constant 7 : index
    %c0_63 = arith.constant 0 : index
    %c0_64 = arith.constant 0 : index
    %75 = vector.load %arg3[%c7_62, %c0_63, %c0_64] : memref<9x64x64xbf16, #tpu.memory_space<vmem>>, vector<1x64x64xbf16>
    %76 = vector.shape_cast %75 : vector<1x64x64xbf16> to vector<64x64xbf16>
    %cst_65 = arith.constant dense<0.000000e+00> : vector<256x64xf32>
    %77 = tpu.matmul %74, %76, %cst_65 {dimension_numbers = #tpu.dot_dimension_numbers<[1], [0], [0], [1], [0, 0, 1, 1], [], []>} : vector<256x64xbf16>, vector<64x64xbf16>, vector<256x64xf32> -> vector<256x64xf32>
    %78 = arith.addf %69, %77 : vector<256x64xf32>
    %c25 = arith.constant 25 : index
    %c0_66 = arith.constant 0 : index
    %79 = vector.load %arg8[%c25, %c0_66] : memref<288x64xf32, #tpu.memory_space<vmem>>, vector<256x64xf32>
    %c8_67 = arith.constant 8 : index
    %c0_68 = arith.constant 0 : index
    %c0_69 = arith.constant 0 : index
    %80 = vector.load %arg2[%c8_67, %c0_68, %c0_69] : memref<9x256x64xf32, #tpu.memory_space<vmem>>, vector<1x256x64xf32>
    %81 = vector.shape_cast %80 : vector<1x256x64xf32> to vector<256x64xf32>
    %82 = arith.mulf %79, %81 : vector<256x64xf32>
    %83 = arith.truncf %82 : vector<256x64xf32> to vector<256x64xbf16>
    %c8_70 = arith.constant 8 : index
    %c0_71 = arith.constant 0 : index
    %c0_72 = arith.constant 0 : index
    %84 = vector.load %arg3[%c8_70, %c0_71, %c0_72] : memref<9x64x64xbf16, #tpu.memory_space<vmem>>, vector<1x64x64xbf16>
    %85 = vector.shape_cast %84 : vector<1x64x64xbf16> to vector<64x64xbf16>
    %cst_73 = arith.constant dense<0.000000e+00> : vector<256x64xf32>
    %86 = tpu.matmul %83, %85, %cst_73 {dimension_numbers = #tpu.dot_dimension_numbers<[1], [0], [0], [1], [0, 0, 1, 1], [], []>} : vector<256x64xbf16>, vector<64x64xbf16>, vector<256x64xf32> -> vector<256x64xf32>
    %87 = arith.addf %78, %86 : vector<256x64xf32>
    %c0_74 = arith.constant 0 : index
    %c0_75 = arith.constant 0 : index
    %88 = vector.load %arg4[%c0_74, %c0_75] : memref<1x64xf32, #tpu.memory_space<vmem>>, vector<1x64xf32>
    %89 = vector.broadcast %88 : vector<1x64xf32> to vector<256x64xf32>
    %90 = arith.addf %87, %89 : vector<256x64xf32>
    %cst_76 = arith.constant 0.000000e+00 : f32
    %91 = vector.broadcast %cst_76 : f32 to vector<256x64xf32>
    %92 = arith.maximumf %90, %91 : vector<256x64xf32>
    %c16_77 = arith.constant 16 : index
    %c0_78 = arith.constant 0 : index
    %93 = vector.load %arg8[%c16_77, %c0_78] : memref<288x64xf32, #tpu.memory_space<vmem>>, vector<256x64xf32>
    tpu.vector_store %arg8[%c16_77, %c0_78], %92 {strides = array<i32>} : memref<288x64xf32, #tpu.memory_space<vmem>>, vector<256x64xf32>,
    %cst_79 = arith.constant 0.000000e+00 : f32
    %94 = vector.broadcast %cst_79 : f32 to vector<256x64xf32>
    %c7_80 = arith.constant 7 : index
    %c0_81 = arith.constant 0 : index
    %95 = vector.load %arg8[%c7_80, %c0_81] : memref<288x64xf32, #tpu.memory_space<vmem>>, vector<256x64xf32>
    %c0_82 = arith.constant 0 : index
    %c0_83 = arith.constant 0 : index
    %c0_84 = arith.constant 0 : index
    %96 = vector.load %arg2[%c0_82, %c0_83, %c0_84] : memref<9x256x64xf32, #tpu.memory_space<vmem>>, vector<1x256x64xf32>
    %97 = vector.shape_cast %96 : vector<1x256x64xf32> to vector<256x64xf32>
    %98 = arith.mulf %95, %97 : vector<256x64xf32>
    %99 = arith.truncf %98 : vector<256x64xf32> to vector<256x64xbf16>
    %c0_85 = arith.constant 0 : index
    %c0_86 = arith.constant 0 : index
    %c0_87 = arith.constant 0 : index
    %100 = vector.load %arg5[%c0_85, %c0_86, %c0_87] : memref<9x64x64xbf16, #tpu.memory_space<vmem>>, vector<1x64x64xbf16>
    %101 = vector.shape_cast %100 : vector<1x64x64xbf16> to vector<64x64xbf16>
    %cst_88 = arith.constant dense<0.000000e+00> : vector<256x64xf32>
    %102 = tpu.matmul %99, %101, %cst_88 {dimension_numbers = #tpu.dot_dimension_numbers<[1], [0], [0], [1], [0, 0, 1, 1], [], []>} : vector<256x64xbf16>, vector<64x64xbf16>, vector<256x64xf32> -> vector<256x64xf32>
    %103 = arith.addf %94, %102 : vector<256x64xf32>
    %c8_89 = arith.constant 8 : index
    %c0_90 = arith.constant 0 : index
    %104 = vector.load %arg8[%c8_89, %c0_90] : memref<288x64xf32, #tpu.memory_space<vmem>>, vector<256x64xf32>
    %c1_91 = arith.constant 1 : index
    %c0_92 = arith.constant 0 : index
    %c0_93 = arith.constant 0 : index
    %105 = vector.load %arg2[%c1_91, %c0_92, %c0_93] : memref<9x256x64xf32, #tpu.memory_space<vmem>>, vector<1x256x64xf32>
    %106 = vector.shape_cast %105 : vector<1x256x64xf32> to vector<256x64xf32>
    %107 = arith.mulf %104, %106 : vector<256x64xf32>
    %108 = arith.truncf %107 : vector<256x64xf32> to vector<256x64xbf16>
    %c1_94 = arith.constant 1 : index
    %c0_95 = arith.constant 0 : index
    %c0_96 = arith.constant 0 : index
    %109 = vector.load %arg5[%c1_94, %c0_95, %c0_96] : memref<9x64x64xbf16, #tpu.memory_space<vmem>>, vector<1x64x64xbf16>
    %110 = vector.shape_cast %109 : vector<1x64x64xbf16> to vector<64x64xbf16>
    %cst_97 = arith.constant dense<0.000000e+00> : vector<256x64xf32>
    %111 = tpu.matmul %108, %110, %cst_97 {dimension_numbers = #tpu.dot_dimension_numbers<[1], [0], [0], [1], [0, 0, 1, 1], [], []>} : vector<256x64xbf16>, vector<64x64xbf16>, vector<256x64xf32> -> vector<256x64xf32>
    %112 = arith.addf %103, %111 : vector<256x64xf32>
    %c9_98 = arith.constant 9 : index
    %c0_99 = arith.constant 0 : index
    %113 = vector.load %arg8[%c9_98, %c0_99] : memref<288x64xf32, #tpu.memory_space<vmem>>, vector<256x64xf32>
    %c2_100 = arith.constant 2 : index
    %c0_101 = arith.constant 0 : index
    %c0_102 = arith.constant 0 : index
    %114 = vector.load %arg2[%c2_100, %c0_101, %c0_102] : memref<9x256x64xf32, #tpu.memory_space<vmem>>, vector<1x256x64xf32>
    %115 = vector.shape_cast %114 : vector<1x256x64xf32> to vector<256x64xf32>
    %116 = arith.mulf %113, %115 : vector<256x64xf32>
    %117 = arith.truncf %116 : vector<256x64xf32> to vector<256x64xbf16>
    %c2_103 = arith.constant 2 : index
    %c0_104 = arith.constant 0 : index
    %c0_105 = arith.constant 0 : index
    %118 = vector.load %arg5[%c2_103, %c0_104, %c0_105] : memref<9x64x64xbf16, #tpu.memory_space<vmem>>, vector<1x64x64xbf16>
    %119 = vector.shape_cast %118 : vector<1x64x64xbf16> to vector<64x64xbf16>
    %cst_106 = arith.constant dense<0.000000e+00> : vector<256x64xf32>
    %120 = tpu.matmul %117, %119, %cst_106 {dimension_numbers = #tpu.dot_dimension_numbers<[1], [0], [0], [1], [0, 0, 1, 1], [], []>} : vector<256x64xbf16>, vector<64x64xbf16>, vector<256x64xf32> -> vector<256x64xf32>
    %121 = arith.addf %112, %120 : vector<256x64xf32>
    %c15_107 = arith.constant 15 : index
    %c0_108 = arith.constant 0 : index
    %122 = vector.load %arg8[%c15_107, %c0_108] : memref<288x64xf32, #tpu.memory_space<vmem>>, vector<256x64xf32>
    %c3_109 = arith.constant 3 : index
    %c0_110 = arith.constant 0 : index
    %c0_111 = arith.constant 0 : index
    %123 = vector.load %arg2[%c3_109, %c0_110, %c0_111] : memref<9x256x64xf32, #tpu.memory_space<vmem>>, vector<1x256x64xf32>
    %124 = vector.shape_cast %123 : vector<1x256x64xf32> to vector<256x64xf32>
    %125 = arith.mulf %122, %124 : vector<256x64xf32>
    %126 = arith.truncf %125 : vector<256x64xf32> to vector<256x64xbf16>
    %c3_112 = arith.constant 3 : index
    %c0_113 = arith.constant 0 : index
    %c0_114 = arith.constant 0 : index
    %127 = vector.load %arg5[%c3_112, %c0_113, %c0_114] : memref<9x64x64xbf16, #tpu.memory_space<vmem>>, vector<1x64x64xbf16>
    %128 = vector.shape_cast %127 : vector<1x64x64xbf16> to vector<64x64xbf16>
    %cst_115 = arith.constant dense<0.000000e+00> : vector<256x64xf32>
    %129 = tpu.matmul %126, %128, %cst_115 {dimension_numbers = #tpu.dot_dimension_numbers<[1], [0], [0], [1], [0, 0, 1, 1], [], []>} : vector<256x64xbf16>, vector<64x64xbf16>, vector<256x64xf32> -> vector<256x64xf32>
    %130 = arith.addf %121, %129 : vector<256x64xf32>
    %c16_116 = arith.constant 16 : index
    %c0_117 = arith.constant 0 : index
    %131 = vector.load %arg8[%c16_116, %c0_117] : memref<288x64xf32, #tpu.memory_space<vmem>>, vector<256x64xf32>
    %c4_118 = arith.constant 4 : index
    %c0_119 = arith.constant 0 : index
    %c0_120 = arith.constant 0 : index
    %132 = vector.load %arg2[%c4_118, %c0_119, %c0_120] : memref<9x256x64xf32, #tpu.memory_space<vmem>>, vector<1x256x64xf32>
    %133 = vector.shape_cast %132 : vector<1x256x64xf32> to vector<256x64xf32>
    %134 = arith.mulf %131, %133 : vector<256x64xf32>
    %135 = arith.truncf %134 : vector<256x64xf32> to vector<256x64xbf16>
    %c4_121 = arith.constant 4 : index
    %c0_122 = arith.constant 0 : index
    %c0_123 = arith.constant 0 : index
    %136 = vector.load %arg5[%c4_121, %c0_122, %c0_123] : memref<9x64x64xbf16, #tpu.memory_space<vmem>>, vector<1x64x64xbf16>
    %137 = vector.shape_cast %136 : vector<1x64x64xbf16> to vector<64x64xbf16>
    %cst_124 = arith.constant dense<0.000000e+00> : vector<256x64xf32>
    %138 = tpu.matmul %135, %137, %cst_124 {dimension_numbers = #tpu.dot_dimension_numbers<[1], [0], [0], [1], [0, 0, 1, 1], [], []>} : vector<256x64xbf16>, vector<64x64xbf16>, vector<256x64xf32> -> vector<256x64xf32>
    %139 = arith.addf %130, %138 : vector<256x64xf32>
    %c17_125 = arith.constant 17 : index
    %c0_126 = arith.constant 0 : index
    %140 = vector.load %arg8[%c17_125, %c0_126] : memref<288x64xf32, #tpu.memory_space<vmem>>, vector<256x64xf32>
    %c5_127 = arith.constant 5 : index
    %c0_128 = arith.constant 0 : index
    %c0_129 = arith.constant 0 : index
    %141 = vector.load %arg2[%c5_127, %c0_128, %c0_129] : memref<9x256x64xf32, #tpu.memory_space<vmem>>, vector<1x256x64xf32>
    %142 = vector.shape_cast %141 : vector<1x256x64xf32> to vector<256x64xf32>
    %143 = arith.mulf %140, %142 : vector<256x64xf32>
    %144 = arith.truncf %143 : vector<256x64xf32> to vector<256x64xbf16>
    %c5_130 = arith.constant 5 : index
    %c0_131 = arith.constant 0 : index
    %c0_132 = arith.constant 0 : index
    %145 = vector.load %arg5[%c5_130, %c0_131, %c0_132] : memref<9x64x64xbf16, #tpu.memory_space<vmem>>, vector<1x64x64xbf16>
    %146 = vector.shape_cast %145 : vector<1x64x64xbf16> to vector<64x64xbf16>
    %cst_133 = arith.constant dense<0.000000e+00> : vector<256x64xf32>
    %147 = tpu.matmul %144, %146, %cst_133 {dimension_numbers = #tpu.dot_dimension_numbers<[1], [0], [0], [1], [0, 0, 1, 1], [], []>} : vector<256x64xbf16>, vector<64x64xbf16>, vector<256x64xf32> -> vector<256x64xf32>
    %148 = arith.addf %139, %147 : vector<256x64xf32>
    %c23_134 = arith.constant 23 : index
    %c0_135 = arith.constant 0 : index
    %149 = vector.load %arg8[%c23_134, %c0_135] : memref<288x64xf32, #tpu.memory_space<vmem>>, vector<256x64xf32>
    %c6_136 = arith.constant 6 : index
    %c0_137 = arith.constant 0 : index
    %c0_138 = arith.constant 0 : index
    %150 = vector.load %arg2[%c6_136, %c0_137, %c0_138] : memref<9x256x64xf32, #tpu.memory_space<vmem>>, vector<1x256x64xf32>
    %151 = vector.shape_cast %150 : vector<1x256x64xf32> to vector<256x64xf32>
    %152 = arith.mulf %149, %151 : vector<256x64xf32>
    %153 = arith.truncf %152 : vector<256x64xf32> to vector<256x64xbf16>
    %c6_139 = arith.constant 6 : index
    %c0_140 = arith.constant 0 : index
    %c0_141 = arith.constant 0 : index
    %154 = vector.load %arg5[%c6_139, %c0_140, %c0_141] : memref<9x64x64xbf16, #tpu.memory_space<vmem>>, vector<1x64x64xbf16>
    %155 = vector.shape_cast %154 : vector<1x64x64xbf16> to vector<64x64xbf16>
    %cst_142 = arith.constant dense<0.000000e+00> : vector<256x64xf32>
    %156 = tpu.matmul %153, %155, %cst_142 {dimension_numbers = #tpu.dot_dimension_numbers<[1], [0], [0], [1], [0, 0, 1, 1], [], []>} : vector<256x64xbf16>, vector<64x64xbf16>, vector<256x64xf32> -> vector<256x64xf32>
    %157 = arith.addf %148, %156 : vector<256x64xf32>
    %c24_143 = arith.constant 24 : index
    %c0_144 = arith.constant 0 : index
    %158 = vector.load %arg8[%c24_143, %c0_144] : memref<288x64xf32, #tpu.memory_space<vmem>>, vector<256x64xf32>
    %c7_145 = arith.constant 7 : index
    %c0_146 = arith.constant 0 : index
    %c0_147 = arith.constant 0 : index
    %159 = vector.load %arg2[%c7_145, %c0_146, %c0_147] : memref<9x256x64xf32, #tpu.memory_space<vmem>>, vector<1x256x64xf32>
    %160 = vector.shape_cast %159 : vector<1x256x64xf32> to vector<256x64xf32>
    %161 = arith.mulf %158, %160 : vector<256x64xf32>
    %162 = arith.truncf %161 : vector<256x64xf32> to vector<256x64xbf16>
    %c7_148 = arith.constant 7 : index
    %c0_149 = arith.constant 0 : index
    %c0_150 = arith.constant 0 : index
    %163 = vector.load %arg5[%c7_148, %c0_149, %c0_150] : memref<9x64x64xbf16, #tpu.memory_space<vmem>>, vector<1x64x64xbf16>
    %164 = vector.shape_cast %163 : vector<1x64x64xbf16> to vector<64x64xbf16>
    %cst_151 = arith.constant dense<0.000000e+00> : vector<256x64xf32>
    %165 = tpu.matmul %162, %164, %cst_151 {dimension_numbers = #tpu.dot_dimension_numbers<[1], [0], [0], [1], [0, 0, 1, 1], [], []>} : vector<256x64xbf16>, vector<64x64xbf16>, vector<256x64xf32> -> vector<256x64xf32>
    %166 = arith.addf %157, %165 : vector<256x64xf32>
    %c25_152 = arith.constant 25 : index
    %c0_153 = arith.constant 0 : index
    %167 = vector.load %arg8[%c25_152, %c0_153] : memref<288x64xf32, #tpu.memory_space<vmem>>, vector<256x64xf32>
    %c8_154 = arith.constant 8 : index
    %c0_155 = arith.constant 0 : index
    %c0_156 = arith.constant 0 : index
    %168 = vector.load %arg2[%c8_154, %c0_155, %c0_156] : memref<9x256x64xf32, #tpu.memory_space<vmem>>, vector<1x256x64xf32>
    %169 = vector.shape_cast %168 : vector<1x256x64xf32> to vector<256x64xf32>
    %170 = arith.mulf %167, %169 : vector<256x64xf32>
    %171 = arith.truncf %170 : vector<256x64xf32> to vector<256x64xbf16>
    %c8_157 = arith.constant 8 : index
    %c0_158 = arith.constant 0 : index
    %c0_159 = arith.constant 0 : index
    %172 = vector.load %arg5[%c8_157, %c0_158, %c0_159] : memref<9x64x64xbf16, #tpu.memory_space<vmem>>, vector<1x64x64xbf16>
    %173 = vector.shape_cast %172 : vector<1x64x64xbf16> to vector<64x64xbf16>
    %cst_160 = arith.constant dense<0.000000e+00> : vector<256x64xf32>
    %174 = tpu.matmul %171, %173, %cst_160 {dimension_numbers = #tpu.dot_dimension_numbers<[1], [0], [0], [1], [0, 0, 1, 1], [], []>} : vector<256x64xbf16>, vector<64x64xbf16>, vector<256x64xf32> -> vector<256x64xf32>
    %175 = arith.addf %166, %174 : vector<256x64xf32>
    %c0_161 = arith.constant 0 : index
    %c0_162 = arith.constant 0 : index
    %176 = vector.load %arg6[%c0_161, %c0_162] : memref<1x64xf32, #tpu.memory_space<vmem>>, vector<1x64xf32>
    %177 = vector.broadcast %176 : vector<1x64xf32> to vector<256x64xf32>
    %178 = arith.addf %175, %177 : vector<256x64xf32>
    %c0_163 = arith.constant 0 : index
    %c0_164 = arith.constant 0 : index
    %179 = vector.load %arg1[%c0_163, %c0_164] : memref<256x64xf32, #tpu.memory_space<vmem>>, vector<256x64xf32>
    %180 = arith.addf %178, %179 : vector<256x64xf32>
    %cst_165 = arith.constant 0.000000e+00 : f32
    %181 = vector.broadcast %cst_165 : f32 to vector<256x64xf32>
    %182 = arith.maximumf %180, %181 : vector<256x64xf32>
    %c0_166 = arith.constant 0 : index
    %c0_167 = arith.constant 0 : index
    %183 = vector.load %arg7[%c0_166, %c0_167] : memref<256x64xf32, #tpu.memory_space<vmem>>, vector<256x64xf32>
    tpu.vector_store %arg7[%c0_166, %c0_167], %182 {strides = array<i32>} : memref<256x64xf32, #tpu.memory_space<vmem>>, vector<256x64xf32>,
    return
  }
  func.func @transform_0(%arg0: i32) -> (i32, i32) {
    %c0_i32 = arith.constant 0 : i32
    %c0_i32_0 = arith.constant 0 : i32
    return %arg0, %c0_i32 : i32, i32
  }
  func.func @transform_1(%arg0: i32) -> (i32, i32, i32) {
    %c0_i32 = arith.constant 0 : i32
    %c0_i32_0 = arith.constant 0 : i32
    %c0_i32_1 = arith.constant 0 : i32
    %c0_i32_2 = arith.constant 0 : i32
    return %c0_i32, %c0_i32_0, %c0_i32_1 : i32, i32, i32
  }
  func.func @transform_2(%arg0: i32) -> (i32, i32, i32) {
    %c0_i32 = arith.constant 0 : i32
    %c0_i32_0 = arith.constant 0 : i32
    %c0_i32_1 = arith.constant 0 : i32
    %c0_i32_2 = arith.constant 0 : i32
    return %c0_i32, %c0_i32_0, %c0_i32_1 : i32, i32, i32
  }
  func.func @transform_3(%arg0: i32) -> (i32, i32) {
    %c0_i32 = arith.constant 0 : i32
    %c0_i32_0 = arith.constant 0 : i32
    %c0_i32_1 = arith.constant 0 : i32
    return %c0_i32, %c0_i32_0 : i32, i32
  }
  func.func @transform_4(%arg0: i32) -> (i32, i32, i32) {
    %c0_i32 = arith.constant 0 : i32
    %c0_i32_0 = arith.constant 0 : i32
    %c0_i32_1 = arith.constant 0 : i32
    %c0_i32_2 = arith.constant 0 : i32
    return %c0_i32, %c0_i32_0, %c0_i32_1 : i32, i32, i32
  }
  func.func @transform_5(%arg0: i32) -> (i32, i32) {
    %c0_i32 = arith.constant 0 : i32
    %c0_i32_0 = arith.constant 0 : i32
    %c0_i32_1 = arith.constant 0 : i32
    return %c0_i32, %c0_i32_0 : i32, i32
  }
  func.func @transform_6(%arg0: i32) -> (i32, i32) {
    %c0_i32 = arith.constant 0 : i32
    %c0_i32_0 = arith.constant 0 : i32
    return %arg0, %c0_i32 : i32, i32
  }
}

</mosaic_0001>

<bundles_post_ra>
// kernel: tpu_custom_call.1
= control target key start
LH: loop header
LB: loop body
LE: loop exit
PB: predicated region body
PF: predicated region fallthrough
CT: control target
= control target key end

     0   :  { %s10207_s21 = smov 0   ;;  %s13992_s0 = inlined_call_operand.vmem [shape: f32[512,64], index: 0, kind: input, shape index: {}]   ;;  %s13993_s1 = inlined_call_operand.vmem [shape: f32[9,256,64], index: 1, kind: input, shape index: {}]   ;;  %s13994_s2 = inlined_call_operand.vmem [shape: bf16[9,64,64], index: 2, kind: input, shape index: {}]   ;;  %s13995_s3 = inlined_call_operand.vmem [shape: f32[1,64], index: 3, kind: input, shape index: {}]   ;;  %s13996_s4 = inlined_call_operand.vmem [shape: bf16[9,64,64], index: 4, kind: input, shape index: {}]   ;;  %s13997_s5 = inlined_call_operand.vmem [shape: f32[1,64], index: 5, kind: input, shape index: {}]   ;;  %s13998_s6 = inlined_call_operand.vmem [shape: f32[512,64], index: 6, kind: output, shape index: {}]  }
   0x1 LB: > { %s7477_s22 = sadd.s32 4294967295, %s10169_s21   ;;  %p7481_p0 = scmp.ge.s32.totalorder %s10169_s21, 1  ;;  %s10169_s21 = sphi %s10207_s21, %s16_s21  }
   0x2   : > { %p213_p1 = scmp.lt.s32.totalorder %s10169_s21, 3 }
   0x4   : > { %p214_p2 = pnand %p7481_p0, %p213_p1 }
   0x6   : > { %217 = sbr.rel (%p214_p2) target bundleno = 1566 (0x61e), region = 44 }
   0xd   : > { %v10091_v0 = vld [vmem:[%s13994_s2 + $0x20] sm:$0xff]   ;;  %s7482_s25 = sshll.u32 %s7477_s22, 5  ;;  %v10092_v1 = vld [vmem:[%s13994_s2 + $0x28] sm:$0xff]   ;;  %vm256_vm0 = vcmask 523264   ;;  %v10093_v2 = vld [vmem:[%s13994_s2 + $0x30] sm:$0xff]   ;;  %v10171_v3 = vmov 0.0  }
   0xe   : > { %p244_p3 = scmp.lt.s32.totalorder %s7482_s25, 63  ;;  %8850 = vmatprep.subr.bf16.mxu0 %v10091_v0  ;;  %258 = vst.msk [vmem:[#allocation2 + $0x8] sm:$0xff] %vm256_vm0, %v10171_v3  ;;  %257 = vst.msk [vmem:[#allocation2] sm:$0xff] %vm256_vm0, %v10171_v3  ;;  %v10094_v4 = vld [vmem:[%s13994_s2 + $0x38] sm:$0xff]   ;;  %v7486_v12 = vld [vmem:[%s13993_s1 + $0x100] sm:$0xff] }
   0xf   : > { %8851 = vmatpush3.bf16.msra.mxu0 %v10091_v0  ;;  %259 = vst.msk [vmem:[#allocation2 + $0x110] sm:$0xff] %vm256_vm0, %v10171_v3  ;;  %260 = vst.msk [vmem:[#allocation2 + $0x118] sm:$0xff] %vm256_vm0, %v10171_v3  ;;  %v7487_v15 = vld [vmem:[%s13993_s1 + $0x108] sm:$0xff]  ;;  %v10095_v16 = vld [vmem:[%s13994_s2] sm:$0xff]  }
  0x10   : > { %s14374_s25 = smov (!%p244_p3, %s7482_s25), 63  ;;  %8852 = vmatprep.subr.bf16.mxu0 %v10092_v1  ;;  %v7488_v18 = vld [vmem:[%s13993_s1 + $0x110] sm:$0xff]  ;;  %v7489_v20 = vld [vmem:[%s13993_s1 + $0x118] sm:$0xff]  ;;  %v7490_v21 = vld [vmem:[%s13993_s1 + $0x120] sm:$0xff] }
  0x11   : > { %s7483_s30 = sshll.u32 %s14374_s25, 3  ;;  %v7491_v24 = vld [vmem:[%s13993_s1 + $0x128] sm:$0xff]  ;;  %v7492_v35 = vld [vmem:[%s13993_s1 + $0x130] sm:$0xff]  ;;  %v7493_v36 = vld [vmem:[%s13993_s1 + $0x138] sm:$0xff] }
  0x12   : > { %s10239_s11 = scalar_lea.vmem %s13992_s0, %s7483_s30  ;;  %v7494_v39 = vld [vmem:[%s13993_s1 + $0x140] sm:$0xff]  ;;  %v7495_v40 = vld [vmem:[%s13993_s1 + $0x148] sm:$0xff]  ;;  %v10097_v57 = vld [vmem:[%s13994_s2 + $0x10] sm:$0xff]   ;;  %s13866_s28 = scalar_lea.vmem %s13998_s6, %s7483_s30 }
  0x13   : > { %8853 = vmatpush3.bf16.msra.mxu0 %v10092_v1  ;;  %v261_v5 = vld [vmem:[%s10239_s11] sm:$0xff]  ;;  %v262_v6 = vld [vmem:[%s10239_s11 + $0x8] sm:$0xff]  ;;  %v263_v7 = vld [vmem:[%s10239_s11 + $0x10] sm:$0xff] }
  0x14   : > { %8854 = vmatprep.subr.bf16.mxu0 %v10093_v2  ;;  %293 = vst.msk [vmem:[#allocation2 + $0x10] sm:$0xff] %vm256_vm0, %v261_v5  ;;  %294 = vst.msk [vmem:[#allocation2 + $0x18] sm:$0xff] %vm256_vm0, %v262_v6  ;;  %v264_v8 = vld [vmem:[%s10239_s11 + $0x18] sm:$0xff]  ;;  %v265_v9 = vld [vmem:[%s10239_s11 + $0x20] sm:$0xff] }
  0x15   : > { %295 = vst.msk [vmem:[#allocation2 + $0x20] sm:$0xff] %vm256_vm0, %v263_v7  ;;  %v266_v10 = vld [vmem:[%s10239_s11 + $0x28] sm:$0xff]  ;;  %296 = vst.msk [vmem:[#allocation2 + $0x28] sm:$0xff] %vm256_vm0, %v264_v8  ;;  %v267_v11 = vld [vmem:[%s10239_s11 + $0x30] sm:$0xff] }
  0x16   : > { %297 = vst.msk [vmem:[#allocation2 + $0x30] sm:$0xff] %vm256_vm0, %v265_v9  ;;  %298 = vst.msk [vmem:[#allocation2 + $0x38] sm:$0xff] %vm256_vm0, %v266_v10  ;;  %v268_v13 = vld [vmem:[%s10239_s11 + $0x38] sm:$0xff]  ;;  %v269_v14 = vld [vmem:[%s10239_s11 + $0x40] sm:$0xff] }
  0x17   : > { %299 = vst.msk [vmem:[#allocation2 + $0x40] sm:$0xff] %vm256_vm0, %v267_v11  ;;  %8855 = vmatpush3.bf16.msra.mxu0 %v10093_v2  ;;  %300 = vst.msk [vmem:[#allocation2 + $0x48] sm:$0xff] %vm256_vm0, %v268_v13  ;;  %v445_v17 = vld [vmem:[#allocation2 + $0x8] sm:$0xff]  ;;  %v271_v22 = vld [vmem:[%s10239_s11 + $0x50] sm:$0xff] }
  0x18   : > { %301 = vst.msk [vmem:[#allocation2 + $0x50] sm:$0xff] %vm256_vm0, %v269_v14  ;;  %8856 = vmatprep.subr.bf16.mxu0 %v10094_v4  ;;  %v270_v19 = vld [vmem:[%s10239_s11 + $0x48] sm:$0xff]  ;;  %v510_v23 = vmul.f32 %v7486_v12, %v445_v17  ;;  %303 = vst.msk [vmem:[#allocation2 + $0x60] sm:$0xff] %vm256_vm0, %v271_v22  ;;  %v272_v25 = vld [vmem:[%s10239_s11 + $0x58] sm:$0xff] }
  0x19   : > { %302 = vst.msk [vmem:[#allocation2 + $0x58] sm:$0xff] %vm256_vm0, %v270_v19  ;;  %v273_v26 = vld [vmem:[%s10239_s11 + $0x60] sm:$0xff]  ;;  %304 = vst.msk [vmem:[#allocation2 + $0x68] sm:$0xff] %vm256_vm0, %v272_v25  ;;  %v10096_v41 = vld [vmem:[%s13994_s2 + $0x8] sm:$0xff]  }
  0x1a   : > { %305 = vst.msk [vmem:[#allocation2 + $0x70] sm:$0xff] %vm256_vm0, %v273_v26  ;;  %v274_v42 = vld [vmem:[%s10239_s11 + $0x68] sm:$0xff]  ;;  %v275_v47 = vld [vmem:[%s10239_s11 + $0x70] sm:$0xff]  ;;  %v276_v51 = vld [vmem:[%s10239_s11 + $0x78] sm:$0xff] }
  0x1b   : > { %8857 = vmatpush3.bf16.msra.mxu0 %v10094_v4  ;;  %v446_v27 = vld [vmem:[#allocation2 + $0x10] sm:$0xff]  ;;  %v447_v28 = vld [vmem:[#allocation2 + $0x18] sm:$0xff]  ;;  %306 = vst.msk [vmem:[#allocation2 + $0x78] sm:$0xff] %vm256_vm0, %v274_v42  ;;  %307 = vst.msk [vmem:[#allocation2 + $0x80] sm:$0xff] %vm256_vm0, %v275_v47 }
  0x1c   : > { %v448_v29 = vld [vmem:[#allocation2 + $0x20] sm:$0xff]  ;;  %v511_v30 = vmul.f32 %v7487_v15, %v446_v27  ;;  %8890 = vmatprep.subr.bf16.mxu0 %v10095_v16  ;;  %v512_v31 = vmul.f32 %v7488_v18, %v447_v28  ;;  %v449_v33 = vld [vmem:[#allocation2 + $0x28] sm:$0xff]  ;;  %308 = vst.msk [vmem:[#allocation2 + $0x88] sm:$0xff] %vm256_vm0, %v276_v51  ;;  %v279_v59 = vld [vmem:[%s10239_s11 + $0x90] sm:$0xff] }
  0x1d   : > { %v513_v32 = vmul.f32 %v7489_v20, %v448_v29  ;;  %v450_v34 = vld [vmem:[#allocation2 + $0x30] sm:$0xff]  ;;  %v514_v37 = vmul.f32 %v7490_v21, %v449_v33  ;;  %v451_v45 = vld [vmem:[#allocation2 + $0x38] sm:$0xff]  ;;  %v277_v52 = vld [vmem:[%s10239_s11 + $0x80] sm:$0xff]  ;;  %311 = vst.msk [vmem:[#allocation2 + $0xa0] sm:$0xff] %vm256_vm0, %v279_v59 }
  0x1e   : > { %v515_v38 = vmul.f32 %v7491_v24, %v450_v34  ;;  %v542_v43 = vpack.c.bf16 %v511_v30, %v510_v23  ;;  %v452_v46 = vld [vmem:[#allocation2 + $0x40] sm:$0xff]  ;;  %v453_v49 = vld [vmem:[#allocation2 + $0x48] sm:$0xff]  ;;  %v516_v53 = vmul.f32 %v7492_v35, %v451_v45  ;;  %309 = vst.msk [vmem:[#allocation2 + $0x90] sm:$0xff] %vm256_vm0, %v277_v52  ;;  %v7496_v60 = vld [vmem:[%s13993_s1 + $0x150] sm:$0xff] }
  0x1f   : > { %v543_v44 = vpack.c.bf16 %v513_v32, %v512_v31  ;;  %v454_v50 = vld [vmem:[#allocation2 + $0x50] sm:$0xff]  ;;  %v517_v54 = vmul.f32 %v7493_v36, %v452_v46  ;;  %v518_v55 = vmul.f32 %v7494_v39, %v453_v49  ;;  %v278_v58 = vld [vmem:[%s10239_s11 + $0x88] sm:$0xff]  ;;  %v7497_v61 = vld [vmem:[%s13993_s1 + $0x158] sm:$0xff] }
  0x20   : > { %v544_v48 = vpack.c.bf16 %v515_v38, %v514_v37  ;;  %8858 = vmatprep.mubr.msk.bf16.mxu0 %vm256_vm0, %v542_v43  ;;  %v519_v56 = vmul.f32 %v7495_v40, %v454_v50  ;;  %310 = vst.msk [vmem:[#allocation2 + $0x98] sm:$0xff] %vm256_vm0, %v278_v58  ;;  %v280_v62 = vld [vmem:[%s10239_s11 + $0x98] sm:$0xff]  ;;  %v7498_v0 = vld [vmem:[%s13993_s1 + $0x160] sm:$0xff]  ;;  %v7499_v1 = vld [vmem:[%s13993_s1 + $0x168] sm:$0xff] }
  0x21   : > { %8859 = vmatmul.mubr.msk.bf16.vlgmr.msra.gmra.mrb[0].mxu0 %vm256_vm0, %v543_v44  ;;  %v545_v63 = vpack.c.bf16 %v517_v54, %v516_v53  ;;  %v281_v2 = vld [vmem:[%s10239_s11 + $0xa0] sm:$0xff]  ;;  %312 = vst.msk [vmem:[#allocation2 + $0xa8] sm:$0xff] %vm256_vm0, %v280_v62  ;;  %v455_v4 = vld [vmem:[#allocation2 + $0x58] sm:$0xff]  ;;  %v282_v6 = vld [vmem:[%s10239_s11 + $0xa8] sm:$0xff] }
  0x22   : > { %8891 = vmatpush3.bf16.msra.mxu0 %v10095_v16  ;;  %8862 = vmatprep.mubr.msk.bf16.mxu0 %vm256_vm0, %v544_v48  ;;  %v546_v3 = vpack.c.bf16 %v519_v56, %v518_v55  ;;  %v456_v5 = vld [vmem:[#allocation2 + $0x60] sm:$0xff]  ;;  %313 = vst.msk [vmem:[#allocation2 + $0xb0] sm:$0xff] %vm256_vm0, %v281_v2  ;;  %v457_v7 = vld [vmem:[#allocation2 + $0x68] sm:$0xff]  ;;  %v458_v8 = vld [vmem:[#allocation2 + $0x70] sm:$0xff]  ;;  %v520_v11 = vmul.f32 %v7496_v60, %v455_v4 }
  0x23   : > { %8892 = vmatprep.subr.bf16.mxu0 %v10096_v41  ;;  %v283_v9 = vld [vmem:[%s10239_s11 + $0xb0] sm:$0xff]  ;;  %314 = vst.msk [vmem:[#allocation2 + $0xb8] sm:$0xff] %vm256_vm0, %v282_v6  ;;  %v284_v10 = vld [vmem:[%s10239_s11 + $0xb8] sm:$0xff]  ;;  %v521_v12 = vmul.f32 %v7497_v61, %v456_v5  ;;  %v285_v13 = vld [vmem:[%s10239_s11 + $0xc0] sm:$0xff]  ;;  %v522_v14 = vmul.f32 %v7498_v0, %v457_v7  ;;  %v523_v15 = vmul.f32 %v7499_v1, %v458_v8 }
  0x24   : > { %315 = vst.msk [vmem:[#allocation2 + $0xc0] sm:$0xff] %vm256_vm0, %v283_v9  ;;  %316 = vst.msk [vmem:[#allocation2 + $0xc8] sm:$0xff] %vm256_vm0, %v284_v10  ;;  %v10098_v16 = vld [vmem:[%s13994_s2 + $0x18] sm:$0xff]   ;;  %v286_v17 = vld [vmem:[%s10239_s11 + $0xc8] sm:$0xff] }
  0x25   : > { %317 = vst.msk [vmem:[#allocation2 + $0xd0] sm:$0xff] %vm256_vm0, %v285_v13  ;;  %v7500_v18 = vld [vmem:[%s13993_s1 + $0x170] sm:$0xff]  ;;  %v7501_v19 = vld [vmem:[%s13993_s1 + $0x178] sm:$0xff]  ;;  %318 = vst.msk [vmem:[#allocation2 + $0xd8] sm:$0xff] %vm256_vm0, %v286_v17  ;;  %v547_v21 = vpack.c.bf16 %v521_v12, %v520_v11  ;;  %v548_v25 = vpack.c.bf16 %v523_v15, %v522_v14 }
  0x26   : > { %8893 = vmatpush3.bf16.msra.mxu0 %v10096_v41  ;;  %v287_v20 = vld [vmem:[%s10239_s11 + $0xd0] sm:$0xff]  ;;  %v7502_v22 = vld [vmem:[%s13993_s1 + $0x180] sm:$0xff]  ;;  %v7503_v23 = vld [vmem:[%s13993_s1 + $0x188] sm:$0xff] }
  0x27   : > { %8894 = vmatprep.subr.bf16.mxu0 %v10097_v57  ;;  %319 = vst.msk [vmem:[#allocation2 + $0xe0] sm:$0xff] %vm256_vm0, %v287_v20  ;;  %v288_v24 = vld [vmem:[%s10239_s11 + $0xd8] sm:$0xff]  ;;  %v460_v27 = vld [vmem:[#allocation2 + $0x80] sm:$0xff]  ;;  %v461_v29 = vld [vmem:[#allocation2 + $0x88] sm:$0xff] }
  0x28   : > { %v459_v26 = vld [vmem:[#allocation2 + $0x78] sm:$0xff]  ;;  %v289_v28 = vld [vmem:[%s10239_s11 + $0xe0] sm:$0xff]  ;;  %320 = vst.msk [vmem:[#allocation2 + $0xe8] sm:$0xff] %vm256_vm0, %v288_v24  ;;  %v462_v30 = vld [vmem:[#allocation2 + $0x90] sm:$0xff]  ;;  %v525_v34 = vmul.f32 %v7501_v19, %v460_v27  ;;  %v526_v35 = vmul.f32 %v7502_v22, %v461_v29 }
  0x29   : > { %8863 = vmatmul.mubr.msk.bf16.gmra.mrb[4].mxu0 %vm256_vm0, %v545_v63  ;;  %321 = vst.msk [vmem:[#allocation2 + $0xf0] sm:$0xff] %vm256_vm0, %v289_v28  ;;  %v290_v31 = vld [vmem:[%s10239_s11 + $0xe8] sm:$0xff]  ;;  %v291_v32 = vld [vmem:[%s10239_s11 + $0xf0] sm:$0xff]  ;;  %v524_v33 = vmul.f32 %v7500_v18, %v459_v26  ;;  %v527_v36 = vmul.f32 %v7503_v23, %v462_v30  ;;  %v10379_v37 = vld [vmem:[%s13994_s2 + $0x40] sm:$0xff]  }
  0x2a   : > { %8866 = vmatprep.mubr.msk.bf16.mxu0 %vm256_vm0, %v546_v3  ;;  %8895 = vmatpush3.bf16.msra.mxu0 %v10097_v57  ;;  %322 = vst.msk [vmem:[#allocation2 + $0xf8] sm:$0xff] %vm256_vm0, %v290_v31  ;;  %323 = vst.msk [vmem:[#allocation2 + $0x100] sm:$0xff] %vm256_vm0, %v291_v32  ;;  %v7504_v39 = vld [vmem:[%s13993_s1 + $0x190] sm:$0xff]  ;;  %v7505_v40 = vld [vmem:[%s13993_s1 + $0x198] sm:$0xff] }
  0x2b   : > { %8896 = vmatprep.subr.bf16.mxu0 %v10098_v16  ;;  %v549_v38 = vpack.c.bf16 %v525_v34, %v524_v33  ;;  %v550_v41 = vpack.c.bf16 %v527_v36, %v526_v35  ;;  %v463_v42 = vld [vmem:[#allocation2 + $0x98] sm:$0xff]  ;;  %v464_v43 = vld [vmem:[#allocation2 + $0xa0] sm:$0xff]  ;;  %v465_v45 = vld [vmem:[#allocation2 + $0xa8] sm:$0xff] }
  0x2c   : > { %v7506_v44 = vld [vmem:[%s13993_s1 + $0x1a0] sm:$0xff]  ;;  %v466_v46 = vld [vmem:[#allocation2 + $0xb0] sm:$0xff]  ;;  %v7507_v47 = vld [vmem:[%s13993_s1 + $0x1a8] sm:$0xff]  ;;  %v528_v48 = vmul.f32 %v7504_v39, %v463_v42  ;;  %v529_v49 = vmul.f32 %v7505_v40, %v464_v43 }
  0x2d   : > { %v530_v50 = vmul.f32 %v7506_v44, %v465_v45  ;;  %v531_v51 = vmul.f32 %v7507_v47, %v466_v46  ;;  %v7508_v53 = vld [vmem:[%s13993_s1 + $0x1b0] sm:$0xff]  ;;  %v7509_v54 = vld [vmem:[%s13993_s1 + $0x1b8] sm:$0xff]  ;;  %v468_v57 = vld [vmem:[#allocation2 + $0xc0] sm:$0xff] }
  0x2e   : > { %8897 = vmatpush3.bf16.msra.mxu0 %v10098_v16  ;;  %v551_v52 = vpack.c.bf16 %v529_v49, %v528_v48  ;;  %v467_v56 = vld [vmem:[#allocation2 + $0xb8] sm:$0xff]  ;;  %v7510_v58 = vld [vmem:[%s13993_s1 + $0x1c0] sm:$0xff]  ;;  %v469_v59 = vld [vmem:[#allocation2 + $0xc8] sm:$0xff]  ;;  %v533_v63 = vmul.f32 %v7509_v54, %v468_v57 }
  0x2f   : > { %8930 = vmatprep.subr.bf16.mxu0 %v10379_v37  ;;  %v552_v55 = vpack.c.bf16 %v531_v51, %v530_v50  ;;  %v470_v60 = vld [vmem:[#allocation2 + $0xd0] sm:$0xff]  ;;  %v7511_v61 = vld [vmem:[%s13993_s1 + $0x1c8] sm:$0xff]  ;;  %v532_v62 = vmul.f32 %v7508_v53, %v467_v56  ;;  %v534_v0 = vmul.f32 %v7510_v58, %v469_v59  ;;  %v7513_v4 = vld [vmem:[%s13993_s1 + $0x1d8] sm:$0xff] }
  0x30   : > { %v535_v1 = vmul.f32 %v7511_v61, %v470_v60  ;;  %v7512_v3 = vld [vmem:[%s13993_s1 + $0x1d0] sm:$0xff]  ;;  %v471_v6 = vld [vmem:[#allocation2 + $0xd8] sm:$0xff]  ;;  %v472_v7 = vld [vmem:[#allocation2 + $0xe0] sm:$0xff] }
  0x31   : > { %8867 = vmatmul.mubr.msk.bf16.gmra.mrb[8].mxu0 %vm256_vm0, %v547_v21  ;;  %v553_v2 = vpack.c.bf16 %v533_v63, %v532_v62  ;;  %v7514_v8 = vld [vmem:[%s13993_s1 + $0x1e0] sm:$0xff]  ;;  %v473_v9 = vld [vmem:[#allocation2 + $0xe8] sm:$0xff]  ;;  %v474_v10 = vld [vmem:[#allocation2 + $0xf0] sm:$0xff]  ;;  %v536_v12 = vmul.f32 %v7512_v3, %v471_v6  ;;  %v537_v13 = vmul.f32 %v7513_v4, %v472_v7 }
  0x32   : > { %8870 = vmatprep.mubr.msk.bf16.mxu0 %vm256_vm0, %v548_v25  ;;  %v554_v5 = vpack.c.bf16 %v535_v1, %v534_v0  ;;  %v7515_v11 = vld [vmem:[%s13993_s1 + $0x1e8] sm:$0xff]  ;;  %v538_v14 = vmul.f32 %v7514_v8, %v473_v9  ;;  %v7516_v16 = vld [vmem:[%s13993_s1 + $0x1f0] sm:$0xff]  ;;  %v475_v18 = vld [vmem:[#allocation2 + $0xf8] sm:$0xff] }
  0x33   : > { %v539_v15 = vmul.f32 %v7515_v11, %v474_v10  ;;  %v555_v17 = vpack.c.bf16 %v537_v13, %v536_v12  ;;  %v7517_v19 = vld [vmem:[%s13993_s1 + $0x1f8] sm:$0xff]  ;;  %v325_v20 = vld [vmem:[#allocation2 + $0x7] sm:$0xff]  ;;  %v10430_v23 = vld [vmem:[#allocation2 + $0xf] sm:$0xff]  ;;  %v540_v26 = vmul.f32 %v7516_v16, %v475_v18 }
  0x34   : > { %v476_v22 = vld [vmem:[#allocation2 + $0x100] sm:$0xff]  ;;  %v358_v25 = vld [vmem:[%s13993_s1 + $0x8] sm:$0xff]  ;;  %v10441_v31 = vld [vmem:[#allocation2 + $0x17] sm:$0xff] }
  0x35   : > { %v556_v21 = vpack.c.bf16 %v539_v15, %v538_v14  ;;  %v357_v24 = vld [vmem:[%s13993_s1] sm:$0xff]  ;;  %v541_v27 = vmul.f32 %v7517_v19, %v476_v22  ;;  %v390_v29 = vmul.f32 %v358_v25, %v10430_v23  ;;  %v359_v34 = vld [vmem:[%s13993_s1 + $0x10] sm:$0xff]  ;;  %v360_v35 = vld [vmem:[%s13993_s1 + $0x18] sm:$0xff] }
  0x36   : > { %v389_v28 = vmul.f32 %v357_v24, %v325_v20  ;;  %v10443_v32 = vld [vmem:[#allocation2 + $0x1f] sm:$0xff]  ;;  %v10451_v36 = vld [vmem:[#allocation2 + $0x27] sm:$0xff]  ;;  %v10467_v46 = vld [vmem:[#allocation2 + $0x37] sm:$0xff] }
  0x37   : > { %v557_v30 = vpack.c.bf16 %v541_v27, %v540_v26  ;;  %v361_v39 = vld [vmem:[%s13993_s1 + $0x20] sm:$0xff]  ;;  %v362_v40 = vld [vmem:[%s13993_s1 + $0x28] sm:$0xff]  ;;  %v392_v42 = vmul.f32 %v360_v35, %v10443_v32  ;;  %v363_v48 = vld [vmem:[%s13993_s1 + $0x30] sm:$0xff] }
  0x38   : > { %v421_v33 = vpack.c.bf16 %v390_v29, %v389_v28  ;;  %v393_v43 = vmul.f32 %v361_v39, %v10451_v36  ;;  %v10469_v47 = vld [vmem:[#allocation2 + $0x3f] sm:$0xff]  ;;  %v10477_v51 = vld [vmem:[#allocation2 + $0x47] sm:$0xff]  ;;  %v395_v56 = vmul.f32 %v363_v48, %v10467_v46  ;;  %v10101_v60 = vld [vmem:[%s13994_s2 + $0x50] sm:$0xff]  }
  0x39   : > { %8871 = vmatmul.mubr.msk.bf16.gmra.mrb[12].mxu0 %vm256_vm0, %v549_v38  ;;  %v10453_v38 = vld [vmem:[#allocation2 + $0x2f] sm:$0xff]  ;;  %v364_v50 = vld [vmem:[%s13993_s1 + $0x38] sm:$0xff]  ;;  %v365_v53 = vld [vmem:[%s13993_s1 + $0x40] sm:$0xff] }
  0x3a   : > { %8874 = vmatprep.mubr.msk.bf16.mxu0 %vm256_vm0, %v550_v41  ;;  %v391_v41 = vmul.f32 %v359_v34, %v10441_v31  ;;  %v394_v44 = vmul.f32 %v362_v40, %v10453_v38  ;;  %v366_v54 = vld [vmem:[%s13993_s1 + $0x48] sm:$0xff]  ;;  %v396_v57 = vmul.f32 %v364_v50, %v10469_v47  ;;  %v397_v58 = vmul.f32 %v365_v53, %v10477_v51  ;;  %v10500_v61 = vld [vmem:[#allocation2 + $0x57] sm:$0xff]  ;;  %v10502_v62 = vld [vmem:[#allocation2 + $0x5f] sm:$0xff] }
  0x3b   : > { %v367_v63 = vld [vmem:[%s13993_s1 + $0x50] sm:$0xff]  ;;  %v368_v0 = vld [vmem:[%s13993_s1 + $0x58] sm:$0xff]  ;;  %v10510_v1 = vld [vmem:[#allocation2 + $0x67] sm:$0xff] }
  0x3c   : > { %v422_v45 = vpack.c.bf16 %v392_v42, %v391_v41  ;;  %v423_v49 = vpack.c.bf16 %v394_v44, %v393_v43  ;;  %v10513_v4 = vld [vmem:[#allocation2 + $0x6f] sm:$0xff]  ;;  %v10102_v7 = vld [vmem:[%s13994_s2 + $0x58] sm:$0xff]   ;;  %v399_v8 = vmul.f32 %v367_v63, %v10500_v61  ;;  %v400_v9 = vmul.f32 %v368_v0, %v10502_v62  ;;  %v10534_v12 = vld [vmem:[%s13994_s2 + $0x60] sm:$0xff]  }
  0x3d   : > { %v370_v6 = vld [vmem:[%s13993_s1 + $0x68] sm:$0xff]  ;;  %v10536_v13 = vld [vmem:[#allocation2 + $0x77] sm:$0xff]  ;;  %v10538_v14 = vld [vmem:[#allocation2 + $0x7f] sm:$0xff] }
  0x3e   : > { %v402_v11 = vmul.f32 %v370_v6, %v10513_v4  ;;  %v371_v15 = vld [vmem:[%s13993_s1 + $0x70] sm:$0xff]  ;;  %v372_v16 = vld [vmem:[%s13993_s1 + $0x78] sm:$0xff]  ;;  %v10546_v18 = vld [vmem:[#allocation2 + $0x87] sm:$0xff] }
  0x3f   : > { %v10548_v19 = vld [vmem:[#allocation2 + $0x8f] sm:$0xff]  ;;  %v373_v20 = vld [vmem:[%s13993_s1 + $0x80] sm:$0xff]  ;;  %v403_v24 = vmul.f32 %v371_v15, %v10536_v13  ;;  %v404_v25 = vmul.f32 %v372_v16, %v10538_v14  ;;  %v10563_v28 = vld [vmem:[#allocation2 + $0x97] sm:$0xff] }
  0x40   : > { %v405_v26 = vmul.f32 %v373_v20, %v10546_v18  ;;  %v10565_v29 = vld [vmem:[#allocation2 + $0x9f] sm:$0xff]  ;;  %v10573_v35 = vld [vmem:[#allocation2 + $0xa7] sm:$0xff]  ;;  %v10575_v39 = vld [vmem:[#allocation2 + $0xaf] sm:$0xff] }
  0x41   : > { %8875 = vmatmul.mubr.msk.bf16.gmra.mrb[16].mxu0 %vm256_vm0, %v551_v52  ;;  %v10479_v52 = vld [vmem:[#allocation2 + $0x4f] sm:$0xff]  ;;  %v428_v34 = vpack.c.bf16 %v404_v25, %v403_v24  ;;  %v377_v40 = vld [vmem:[%s13993_s1 + $0xa0] sm:$0xff]  ;;  %v10641_v24 = vld [vmem:[#allocation2 + $0xf7] sm:$0xff] }
  0x42   : > { %8878 = vmatprep.mubr.msk.bf16.mxu0 %vm256_vm0, %v552_v55  ;;  %v10100_v55 = vld [vmem:[%s13994_s2 + $0x48] sm:$0xff]   ;;  %v398_v59 = vmul.f32 %v366_v54, %v10479_v52  ;;  %v10591_v50 = vld [vmem:[#allocation2 + $0xbf] sm:$0xff]  ;;  %v379_v53 = vld [vmem:[%s13993_s1 + $0xb0] sm:$0xff] }
  0x43   : > { %v378_v41 = vld [vmem:[%s13993_s1 + $0xa8] sm:$0xff]  ;;  %v380_v54 = vld [vmem:[%s13993_s1 + $0xb8] sm:$0xff]  ;;  %v383_v6 = vld [vmem:[%s13993_s1 + $0xd0] sm:$0xff] }
  0x44   : > { %v425_v3 = vpack.c.bf16 %v398_v59, %v397_v58  ;;  %v410_v48 = vmul.f32 %v378_v41, %v10575_v39  ;;  %v381_v58 = vld [vmem:[%s13993_s1 + $0xc0] sm:$0xff]  ;;  %v382_v59 = vld [vmem:[%s13993_s1 + $0xc8] sm:$0xff] }
  0x45   : > { %v386_v15 = vld [vmem:[%s13993_s1 + $0xe8] sm:$0xff]  ;;  %v10643_v25 = vld [vmem:[#allocation2 + $0xff] sm:$0xff] }
  0x46   : > { %v7567_v41 = vld [vmem:[%s13993_s1 + $0x208] sm:$0xff] }
  0x49   : > { %8879 = vmatmul.mubr.msk.bf16.gmra.mrb[20].mxu0 %vm256_vm0, %v553_v2  ;;  %v292_v2 = vld [vmem:[%s10239_s11 + $0xf8] sm:$0xff] }
  0x4a   : > { %8882 = vmatprep.mubr.msk.bf16.mxu0 %vm256_vm0, %v554_v5  ;;  %v369_v5 = vld [vmem:[%s13993_s1 + $0x60] sm:$0xff]  ;;  %324 = vst.msk [vmem:[#allocation2 + $0x108] sm:$0xff] %vm256_vm0, %v292_v2 }
  0x4b   : > { %v401_v10 = vmul.f32 %v369_v5, %v10510_v1  ;;  %v10617_v5 = vld [vmem:[#allocation2 + $0xdf] sm:$0xff] }
  0x4d   : > { %v427_v22 = vpack.c.bf16 %v402_v11, %v401_v10  ;;  %v10627_v10 = vld [vmem:[#allocation2 + $0xef] sm:$0xff]  ;;  %v385_v11 = vld [vmem:[%s13993_s1 + $0xe0] sm:$0xff] }
  0x51   : > { %8883 = vmatmul.mubr.msk.bf16.gmra.mrb[24].mxu0 %vm256_vm0, %v555_v17  ;;  %v426_v17 = vpack.c.bf16 %v400_v9, %v399_v8  ;;  %v10625_v9 = vld [vmem:[#allocation2 + $0xe7] sm:$0xff] }
  0x52   : > { %8886 = vmatprep.mubr.msk.bf16.mxu0 %vm256_vm0, %v556_v21  ;;  %v374_v21 = vld [vmem:[%s13993_s1 + $0x88] sm:$0xff] }
  0x53   : > { %v406_v27 = vmul.f32 %v374_v21, %v10548_v19  ;;  %v417_v21 = vmul.f32 %v385_v11, %v10625_v9 }
  0x55   : > { %v429_v42 = vpack.c.bf16 %v406_v27, %v405_v26  ;;  %v387_v26 = vld [vmem:[%s13993_s1 + $0xf0] sm:$0xff]  ;;  %v388_v27 = vld [vmem:[%s13993_s1 + $0xf8] sm:$0xff] }
  0x59   : > { %8887 = vmatmul.mubr.msk.bf16.gmra.mrb[28].mxu0 %vm256_vm0, %v557_v30  ;;  %v375_v30 = vld [vmem:[%s13993_s1 + $0x90] sm:$0xff] }
  0x5a   : > { %8898 = vmatprep.mubr.msk.bf16.mxu0 %vm256_vm0, %v421_v33  ;;  %v376_v33 = vld [vmem:[%s13993_s1 + $0x98] sm:$0xff]  ;;  %v407_v43 = vmul.f32 %v375_v30, %v10563_v28 }
  0x5b   : > { %v408_v44 = vmul.f32 %v376_v33, %v10565_v29  ;;  %v1033_v33 = vld [vmem:[#allocation2 + $0x9] sm:$0xff] }
  0x61   : > { %8899 = vmatmul.mubr.msk.bf16.vlgmr.msra.gmra.mrb[0].mxu0 %vm256_vm0, %v422_v45  ;;  %v409_v45 = vmul.f32 %v377_v40, %v10573_v35  ;;  %v7566_v40 = vld [vmem:[%s13993_s1 + $0x200] sm:$0xff] }
  0x62   : > { %8931 = vmatpush3.bf16.msra.mxu0 %v10379_v37  ;;  %8902 = vmatprep.mubr.msk.bf16.mxu0 %vm256_vm0, %v423_v49  ;;  %v424_v37 = vpack.c.bf16 %v396_v57, %v395_v56  ;;  %v10589_v49 = vld [vmem:[#allocation2 + $0xb7] sm:$0xff]  ;;  %v10599_v56 = vld [vmem:[#allocation2 + $0xc7] sm:$0xff]  ;;  %v10601_v57 = vld [vmem:[#allocation2 + $0xcf] sm:$0xff] }
  0x63   : > { %8932 = vmatprep.subr.bf16.mxu0 %v10100_v55  ;;  %v411_v63 = vmul.f32 %v379_v53, %v10589_v49  ;;  %v413_v0 = vmul.f32 %v381_v58, %v10599_v56  ;;  %v414_v2 = vmul.f32 %v382_v59, %v10601_v57  ;;  %v10664_v53 = vld [vmem:[#allocation2 + $0x19] sm:$0xff] }
  0x64   : > { %v7569_v58 = vld [vmem:[%s13993_s1 + $0x218] sm:$0xff] }
  0x65   : > { %v433_v16 = vpack.c.bf16 %v414_v2, %v413_v0  ;;  %v7571_v0 = vld [vmem:[%s13993_s1 + $0x228] sm:$0xff] }
  0x66   : > { %8933 = vmatpush3.bf16.msra.mxu0 %v10100_v55  ;;  %v430_v55 = vpack.c.bf16 %v408_v44, %v407_v43  ;;  %v419_v43 = vmul.f32 %v387_v26, %v10641_v24  ;;  %v420_v44 = vmul.f32 %v388_v27, %v10643_v25  ;;  %v10700_v26 = vld [vmem:[#allocation2 + $0x49] sm:$0xff]  ;;  %v10702_v27 = vld [vmem:[#allocation2 + $0x51] sm:$0xff] }
  0x67   : > { %8934 = vmatprep.subr.bf16.mxu0 %v10101_v60 }
  0x68   : > { %v436_v59 = vpack.c.bf16 %v420_v44, %v419_v43 }
  0x69   : > { %8903 = vmatmul.mubr.msk.bf16.gmra.mrb[4].mxu0 %vm256_vm0, %v424_v37  ;;  %v412_v37 = vmul.f32 %v380_v54, %v10591_v50  ;;  %v10666_v54 = vld [vmem:[#allocation2 + $0x21] sm:$0xff] }
  0x6a   : > { %8906 = vmatprep.mubr.msk.bf16.mxu0 %vm256_vm0, %v425_v3  ;;  %8935 = vmatpush3.bf16.msra.mxu0 %v10101_v60  ;;  %v431_v60 = vpack.c.bf16 %v410_v48, %v409_v45  ;;  %v10615_v3 = vld [vmem:[#allocation2 + $0xd7] sm:$0xff]  ;;  %v1098_v45 = vmul.f32 %v7566_v40, %v1033_v33  ;;  %v7575_v33 = vld [vmem:[%s13993_s1 + $0x248] sm:$0xff] }
  0x6b   : > { %8936 = vmatprep.subr.bf16.mxu0 %v10102_v7  ;;  %v432_v8 = vpack.c.bf16 %v412_v37, %v411_v63  ;;  %v10676_v63 = vld [vmem:[#allocation2 + $0x31] sm:$0xff]  ;;  %v7570_v37 = vld [vmem:[%s13993_s1 + $0x220] sm:$0xff]  ;;  %v10104_v40 = vld [vmem:[%s13994_s2 + $0x68] sm:$0xff]   ;;  %v1107_v44 = vmul.f32 %v7575_v33, %v10702_v27 }
  0x6c   : > { %v1103_v11 = vmul.f32 %v7571_v0, %v10676_v63  ;;  %v10733_v0 = vld [vmem:[#allocation2 + $0x69] sm:$0xff]  ;;  %v10757_v33 = vld [vmem:[#allocation2 + $0x79] sm:$0xff] }
  0x6e   : > { %8937 = vmatpush3.bf16.msra.mxu0 %v10102_v7  ;;  %v384_v7 = vld [vmem:[%s13993_s1 + $0xd8] sm:$0xff] }
  0x6f   : > { %8970 = vmatprep.subr.bf16.mxu0 %v10534_v12  ;;  %v416_v20 = vmul.f32 %v384_v7, %v10617_v5  ;;  %v1101_v7 = vmul.f32 %v7569_v58, %v10666_v54  ;;  %v10725_v58 = vld [vmem:[#allocation2 + $0x61] sm:$0xff] }
  0x71   : > { %8907 = vmatmul.mubr.msk.bf16.gmra.mrb[8].mxu0 %vm256_vm0, %v426_v17  ;;  %v415_v17 = vmul.f32 %v383_v6, %v10615_v3 }
  0x72   : > { %8910 = vmatprep.mubr.msk.bf16.mxu0 %vm256_vm0, %v427_v22  ;;  %v418_v22 = vmul.f32 %v386_v15, %v10627_v10 }
  0x73   : > { %v434_v30 = vpack.c.bf16 %v416_v20, %v415_v17  ;;  %v10692_v17 = vld [vmem:[#allocation2 + $0x41] sm:$0xff]  ;;  %v7572_v20 = vld [vmem:[%s13993_s1 + $0x230] sm:$0xff] }
  0x79   : > { %8911 = vmatmul.mubr.msk.bf16.gmra.mrb[12].mxu0 %vm256_vm0, %v428_v34  ;;  %v10651_v34 = vld [vmem:[#allocation2 + $0x11] sm:$0xff] }
  0x7a   : > { %8914 = vmatprep.mubr.msk.bf16.mxu0 %vm256_vm0, %v429_v42  ;;  %v435_v42 = vpack.c.bf16 %v418_v22, %v417_v21  ;;  %v1099_v48 = vmul.f32 %v7567_v41, %v10651_v34  ;;  %v7573_v22 = vld [vmem:[%s13993_s1 + $0x238] sm:$0xff] }
  0x7c   : > { %v1130_v2 = vpack.c.bf16 %v1099_v48, %v1098_v45  ;;  %v10105_v45 = vld [vmem:[%s13994_s2 + $0x70] sm:$0xff]  }
  0x81   : > { %8915 = vmatmul.mubr.msk.bf16.gmra.mrb[16].mxu0 %vm256_vm0, %v430_v55  ;;  %v7568_v55 = vld [vmem:[%s13993_s1 + $0x210] sm:$0xff] }
  0x82   : > { %8918 = vmatprep.mubr.msk.bf16.mxu0 %vm256_vm0, %v431_v60  ;;  %v10674_v60 = vld [vmem:[#allocation2 + $0x29] sm:$0xff]  ;;  %v1100_v6 = vmul.f32 %v7568_v55, %v10664_v53  ;;  %v10723_v55 = vld [vmem:[#allocation2 + $0x59] sm:$0xff] }
  0x84   : > { %v1131_v15 = vpack.c.bf16 %v1101_v7, %v1100_v6  ;;  %v7578_v6 = vld [vmem:[%s13993_s1 + $0x260] sm:$0xff]  ;;  %v7579_v7 = vld [vmem:[%s13993_s1 + $0x268] sm:$0xff] }
  0x89   : > { %8919 = vmatmul.mubr.msk.bf16.gmra.mrb[20].mxu0 %vm256_vm0, %v432_v8  ;;  %v1102_v8 = vmul.f32 %v7570_v37, %v10674_v60  ;;  %v7577_v37 = vld [vmem:[%s13993_s1 + $0x258] sm:$0xff] }
  0x8a   : > { %8922 = vmatprep.mubr.msk.bf16.mxu0 %vm256_vm0, %v433_v16  ;;  %v10690_v16 = vld [vmem:[#allocation2 + $0x39] sm:$0xff] }
  0x8b   : > { %v1132_v21 = vpack.c.bf16 %v1103_v11, %v1102_v8  ;;  %v1104_v41 = vmul.f32 %v7572_v20, %v10690_v16  ;;  %v10106_v8 = vld [vmem:[%s13994_s2 + $0x78] sm:$0xff]   ;;  %v1110_v20 = vmul.f32 %v7578_v6, %v10733_v0 }
  0x91   : > { %8923 = vmatmul.mubr.msk.bf16.gmra.mrb[24].mxu0 %vm256_vm0, %v434_v30  ;;  %v7574_v30 = vld [vmem:[%s13993_s1 + $0x240] sm:$0xff] }
  0x92   : > { %8926 = vmatprep.mubr.msk.bf16.mxu0 %vm256_vm0, %v435_v42  ;;  %v1105_v42 = vmul.f32 %v7573_v22, %v10692_v17  ;;  %v1106_v43 = vmul.f32 %v7574_v30, %v10700_v26  ;;  %v10755_v22 = vld [vmem:[%s13994_s2 + $0x80] sm:$0xff]  }
  0x94   : > { %v1133_v48 = vpack.c.bf16 %v1105_v42, %v1104_v41  ;;  %v7580_v42 = vld [vmem:[%s13993_s1 + $0x270] sm:$0xff] }
  0x99   : > { %8927 = vmatmul.mubr.msk.bf16.gmra.mrb[28].mxu0 %vm256_vm0, %v436_v59  ;;  %v1134_v59 = vpack.c.bf16 %v1107_v44, %v1106_v43  ;;  %v7581_v43 = vld [vmem:[%s13993_s1 + $0x278] sm:$0xff]  ;;  %v10767_v44 = vld [vmem:[#allocation2 + $0x89] sm:$0xff] }
  0x9a   : > { %8938 = vmatprep.mubr.msk.bf16.mxu0 %vm256_vm0, %v1130_v2  ;;  %v10735_v2 = vld [vmem:[#allocation2 + $0x71] sm:$0xff]  ;;  %14110 = vst [vmem:[#allocation4_spill] sm:$0xff] %v10767_v44 }
  0xa1   : > { %8939 = vmatmul.mubr.msk.bf16.vlgmr.msra.gmra.mrb[0].mxu0 %vm256_vm0, %v1131_v15  ;;  %v1109_v15 = vmul.f32 %v7577_v37, %v10725_v58 }
  0xa2   : > { %8971 = vmatpush3.bf16.msra.mxu0 %v10534_v12  ;;  %8942 = vmatprep.mubr.msk.bf16.mxu0 %vm256_vm0, %v1132_v21  ;;  %v7576_v12 = vld [vmem:[%s13993_s1 + $0x250] sm:$0xff]  ;;  %v1111_v21 = vmul.f32 %v7579_v7, %v10735_v2 }
  0xa3   : > { %8972 = vmatprep.subr.bf16.mxu0 %v10104_v40  ;;  %v1108_v11 = vmul.f32 %v7576_v12, %v10723_v55  ;;  %v7583_v12 = vld [vmem:[%s13993_s1 + $0x288] sm:$0xff] }
  0xa4   : > { %v1136_v41 = vpack.c.bf16 %v1111_v21, %v1110_v20  ;;  %v7584_v21 = vld [vmem:[%s13993_s1 + $0x290] sm:$0xff] }
  0xa5   : > { %v1135_v30 = vpack.c.bf16 %v1109_v15, %v1108_v11  ;;  %v10784_v11 = vld [vmem:[#allocation2 + $0x99] sm:$0xff]  ;;  %v10786_v15 = vld [vmem:[#allocation2 + $0xa1] sm:$0xff] }
  0xa6   : > { %8973 = vmatpush3.bf16.msra.mxu0 %v10104_v40  ;;  %v10759_v40 = vld [vmem:[#allocation2 + $0x81] sm:$0xff]  ;;  %14112 = vst [vmem:[#allocation6_spill] sm:$0xff] %v10784_v11  ;;  %14113 = vst [vmem:[#allocation7_spill] sm:$0xff] %v10786_v15 }
  0xa7   : > { %8974 = vmatprep.subr.bf16.mxu0 %v10105_v45  ;;  %14109 = vst [vmem:[#allocation3_spill] sm:$0xff] %v10759_v40  ;;  %v1113_v37 = vmul.f32 %v7581_v43, %v10759_v40  ;;  %v7586_v43 = vld [vmem:[%s13993_s1 + $0x2a0] sm:$0xff] }
  0xa9   : > { %8943 = vmatmul.mubr.msk.bf16.gmra.mrb[4].mxu0 %vm256_vm0, %v1133_v48  ;;  %v7582_v48 = vld [vmem:[%s13993_s1 + $0x280] sm:$0xff] }
  0xaa   : > { %8946 = vmatprep.mubr.msk.bf16.mxu0 %vm256_vm0, %v1134_v59  ;;  %8975 = vmatpush3.bf16.msra.mxu0 %v10105_v45  ;;  %v10769_v45 = vld [vmem:[#allocation2 + $0x91] sm:$0xff]  ;;  %v1112_v59 = vmul.f32 %v7580_v42, %v10757_v33  ;;  %v1114_v6 = vmul.f32 %v7582_v48, %v10767_v44  ;;  %v10794_v42 = vld [vmem:[#allocation2 + $0xa9] sm:$0xff]  ;;  %v10812_v44 = vld [vmem:[#allocation2 + $0xc1] sm:$0xff] }
  0xab   : > { %8976 = vmatprep.subr.bf16.mxu0 %v10106_v8  ;;  %14111 = vst [vmem:[#allocation5_spill] sm:$0xff] %v10769_v45  ;;  %v1115_v7 = vmul.f32 %v7583_v12, %v10769_v45  ;;  %14114 = vst [vmem:[#allocation8_spill] sm:$0xff] %v10794_v42  ;;  %v7587_v48 = vld [vmem:[%s13993_s1 + $0x2a8] sm:$0xff]  ;;  %v1116_v12 = vmul.f32 %v7584_v21, %v10784_v11  ;;  %v10810_v45 = vld [vmem:[#allocation2 + $0xb9] sm:$0xff] }
  0xac   : > { %14116 = vst [vmem:[#allocation10_spill] sm:$0xff] %v10810_v45  ;;  %14117 = vst [vmem:[#allocation11_spill] sm:$0xff] %v10812_v44  ;;  %v7589_v21 = vld [vmem:[%s13993_s1 + $0x2b8] sm:$0xff] }
  0xad   : > { %v1138_v20 = vpack.c.bf16 %v1115_v7, %v1114_v6 }
  0xae   : > { %8977 = vmatpush3.bf16.msra.mxu0 %v10106_v8  ;;  %v1137_v8 = vpack.c.bf16 %v1113_v37, %v1112_v59  ;;  %v1118_v37 = vmul.f32 %v7586_v43, %v10794_v42  ;;  %v7590_v43 = vld [vmem:[%s13993_s1 + $0x2c0] sm:$0xff] }
  0xaf   : > { %9010 = vmatprep.subr.bf16.mxu0 %v10755_v22  ;;  %v10836_v42 = vld [vmem:[#allocation2 + $0xd9] sm:$0xff] }
  0xb1   : > { %8947 = vmatmul.mubr.msk.bf16.gmra.mrb[8].mxu0 %vm256_vm0, %v1135_v30  ;;  %v7585_v30 = vld [vmem:[%s13993_s1 + $0x298] sm:$0xff] }
  0xb2   : > { %8950 = vmatprep.mubr.msk.bf16.mxu0 %vm256_vm0, %v1136_v41  ;;  %v10796_v41 = vld [vmem:[#allocation2 + $0xb1] sm:$0xff]  ;;  %v1117_v59 = vmul.f32 %v7585_v30, %v10786_v15  ;;  %v10820_v30 = vld [vmem:[#allocation2 + $0xc9] sm:$0xff]  ;;  %v10838_v15 = vld [vmem:[#allocation2 + $0xe1] sm:$0xff] }
  0xb3   : > { %14115 = vst [vmem:[#allocation9_spill] sm:$0xff] %v10796_v41  ;;  %v1119_v6 = vmul.f32 %v7587_v48, %v10796_v41  ;;  %14118 = vst [vmem:[#allocation12_spill] sm:$0xff] %v10820_v30  ;;  %v7591_v48 = vld [vmem:[%s13993_s1 + $0x2c8] sm:$0xff] }
  0xb4   : > { %v1139_v7 = vpack.c.bf16 %v1117_v59, %v1116_v12  ;;  %v1121_v59 = vmul.f32 %v7589_v21, %v10812_v44  ;;  %v10846_v21 = vld [vmem:[#allocation2 + $0xe9] sm:$0xff] }
  0xb5   : > { %v1140_v40 = vpack.c.bf16 %v1119_v6, %v1118_v37  ;;  %v1122_v37 = vmul.f32 %v7590_v43, %v10820_v30  ;;  %v7594_v43 = vld [vmem:[%s13993_s1 + $0x2e0] sm:$0xff] }
  0xb6   : > { %v10862_v30 = vld [vmem:[#allocation2 + $0xf9] sm:$0xff] }
  0xb9   : > { %8951 = vmatmul.mubr.msk.bf16.gmra.mrb[12].mxu0 %vm256_vm0, %v1137_v8  ;;  %v7588_v8 = vld [vmem:[%s13993_s1 + $0x2b0] sm:$0xff] }
  0xba   : > { %8954 = vmatprep.mubr.msk.bf16.mxu0 %vm256_vm0, %v1138_v20  ;;  %v10822_v20 = vld [vmem:[#allocation2 + $0xd1] sm:$0xff]  ;;  %v1120_v12 = vmul.f32 %v7588_v8, %v10810_v45  ;;  %v10864_v45 = vld [vmem:[#allocation2 + $0x101] sm:$0xff] }
  0xbb   : > { %14119 = vst [vmem:[#allocation13_spill] sm:$0xff] %v10822_v20  ;;  %v1123_v6 = vmul.f32 %v7591_v48, %v10822_v20  ;;  %v7593_v8 = vld [vmem:[%s13993_s1 + $0x2d8] sm:$0xff]  ;;  %v7595_v48 = vld [vmem:[%s13993_s1 + $0x2e8] sm:$0xff] }
  0xbc   : > { %v1141_v41 = vpack.c.bf16 %v1121_v59, %v1120_v12  ;;  %v1125_v59 = vmul.f32 %v7593_v8, %v10838_v15  ;;  %v7627_v8 = vld [vmem:[%s13993_s1 + $0x308] sm:$0xff] }
  0xbd   : > { %v1142_v11 = vpack.c.bf16 %v1123_v6, %v1122_v37  ;;  %v1126_v37 = vmul.f32 %v7594_v43, %v10846_v21 }
  0xc1   : > { %8955 = vmatmul.mubr.msk.bf16.gmra.mrb[16].mxu0 %vm256_vm0, %v1139_v7  ;;  %v7592_v7 = vld [vmem:[%s13993_s1 + $0x2d0] sm:$0xff] }
  0xc2   : > { %8958 = vmatprep.mubr.msk.bf16.mxu0 %vm256_vm0, %v1140_v40  ;;  %v10848_v40 = vld [vmem:[#allocation2 + $0xf1] sm:$0xff]  ;;  %v1124_v12 = vmul.f32 %v7592_v7, %v10836_v42 }
  0xc3   : > { %14120 = vst [vmem:[#allocation14_spill] sm:$0xff] %v10848_v40  ;;  %v1127_v6 = vmul.f32 %v7595_v48, %v10848_v40  ;;  %v7597_v7 = vld [vmem:[%s13993_s1 + $0x2f8] sm:$0xff]  ;;  %v7628_v40 = vld [vmem:[%s13993_s1 + $0x310] sm:$0xff] }
  0xc4   : > { %v1143_v20 = vpack.c.bf16 %v1125_v59, %v1124_v12  ;;  %v1129_v48 = vmul.f32 %v7597_v7, %v10864_v45  ;;  %v1486_v59 = vmul.f32 %v7627_v8, %v10441_v31  ;;  %v1487_v31 = vmul.f32 %v7628_v40, %v10443_v32  ;;  %v7634_v32 = vld [vmem:[%s13993_s1 + $0x340] sm:$0xff] }
  0xc5   : > { %v1144_v44 = vpack.c.bf16 %v1127_v6, %v1126_v37 }
  0xc9   : > { %8959 = vmatmul.mubr.msk.bf16.gmra.mrb[20].mxu0 %vm256_vm0, %v1141_v41  ;;  %v7596_v41 = vld [vmem:[%s13993_s1 + $0x2f0] sm:$0xff] }
  0xca   : > { %8962 = vmatprep.mubr.msk.bf16.mxu0 %vm256_vm0, %v1142_v11  ;;  %v7626_v11 = vld [vmem:[%s13993_s1 + $0x300] sm:$0xff]  ;;  %v1128_v43 = vmul.f32 %v7596_v41, %v10862_v30 }
  0xcb   : > { %v1485_v12 = vmul.f32 %v7626_v11, %v10430_v23  ;;  %v7630_v41 = vld [vmem:[%s13993_s1 + $0x320] sm:$0xff]  ;;  %v7631_v23 = vld [vmem:[%s13993_s1 + $0x328] sm:$0xff] }
  0xcc   : > { %v1145_v37 = vpack.c.bf16 %v1129_v48, %v1128_v43  ;;  %v1489_v7 = vmul.f32 %v7630_v41, %v10453_v38  ;;  %v1490_v11 = vmul.f32 %v7631_v23, %v10467_v46  ;;  %v7632_v48 = vld [vmem:[%s13993_s1 + $0x330] sm:$0xff]  ;;  %v10108_v38 = vld [vmem:[%s13994_s2 + $0x88] sm:$0xff]  }
  0xcd   : > { %v1517_v6 = vpack.c.bf16 %v1486_v59, %v1485_v12  ;;  %v7633_v12 = vld [vmem:[%s13993_s1 + $0x338] sm:$0xff]  ;;  %v1491_v46 = vmul.f32 %v7632_v48, %v10469_v47  ;;  %v1493_v59 = vmul.f32 %v7634_v32, %v10479_v52  ;;  %v7636_v47 = vld [vmem:[%s13993_s1 + $0x350] sm:$0xff]  ;;  %v7638_v52 = vld [vmem:[%s13993_s1 + $0x360] sm:$0xff] }
  0xce   : > { %v1519_v43 = vpack.c.bf16 %v1490_v11, %v1489_v7  ;;  %v1492_v40 = vmul.f32 %v7633_v12, %v10477_v51  ;;  %v7637_v51 = vld [vmem:[%s13993_s1 + $0x358] sm:$0xff]  ;;  %v1495_v23 = vmul.f32 %v7636_v47, %v10502_v62  ;;  %v10951_v11 = vld [vmem:[%s13994_s2 + $0xa0] sm:$0xff]   ;;  %v7640_v62 = vld [vmem:[%s13993_s1 + $0x370] sm:$0xff] }
  0xcf   : > { %v1499_v48 = vmul.f32 %v7640_v62, %v10538_v14  ;;  %v7646_v14 = vld [vmem:[%s13993_s1 + $0x3a0] sm:$0xff]  ;;  %v7648_v47 = vld [vmem:[%s13993_s1 + $0x3b0] sm:$0xff] }
  0xd0   : > { %v11026_v62 = vld [vmem:[#allocation2 + $0x107] sm:$0xff] }
  0xd1   : > { %8963 = vmatmul.mubr.msk.bf16.gmra.mrb[24].mxu0 %vm256_vm0, %v1143_v20  ;;  %v7629_v20 = vld [vmem:[%s13993_s1 + $0x318] sm:$0xff] }
  0xd2   : > { %8966 = vmatprep.mubr.msk.bf16.mxu0 %vm256_vm0, %v1144_v44  ;;  %v1488_v44 = vmul.f32 %v7629_v20, %v10451_v36  ;;  %v7635_v36 = vld [vmem:[%s13993_s1 + $0x348] sm:$0xff]  ;;  %v1520_v20 = vpack.c.bf16 %v1492_v40, %v1491_v46  ;;  %v7644_v40 = vld [vmem:[%s13993_s1 + $0x390] sm:$0xff] }
  0xd4   : > { %v1518_v8 = vpack.c.bf16 %v1488_v44, %v1487_v31  ;;  %v1496_v31 = vmul.f32 %v7637_v51, %v10510_v1  ;;  %v1497_v44 = vmul.f32 %v7638_v52, %v10513_v4  ;;  %v7641_v1 = vld [vmem:[%s13993_s1 + $0x378] sm:$0xff]  ;;  %v7642_v4 = vld [vmem:[%s13993_s1 + $0x380] sm:$0xff] }
  0xd5   : > { %v1500_v12 = vmul.f32 %v7641_v1, %v10546_v18  ;;  %v1501_v32 = vmul.f32 %v7642_v4, %v10548_v19  ;;  %v7647_v18 = vld [vmem:[%s13993_s1 + $0x3a8] sm:$0xff]  ;;  %v1503_v19 = vmul.f32 %v7644_v40, %v10565_v29  ;;  %v7649_v51 = vld [vmem:[%s13993_s1 + $0x3b8] sm:$0xff]  ;;  %v7650_v29 = vld [vmem:[%s13993_s1 + $0x3c0] sm:$0xff] }
  0xd6   : > { %v1509_v52 = vmul.f32 %v7650_v29, %v10601_v57  ;;  %v7656_v4 = vld [vmem:[%s13993_s1 + $0x3f0] sm:$0xff]  ;;  %v11049_v40 = vld [vmem:[#allocation2 + $0x28] sm:$0xff]  ;;  %v11073_v29 = vld [vmem:[#allocation2 + $0x40] sm:$0xff] }
  0xd9   : > { %8967 = vmatmul.mubr.msk.bf16.gmra.mrb[28].mxu0 %vm256_vm0, %v1145_v37  ;;  %v1494_v37 = vmul.f32 %v7635_v36, %v10500_v61  ;;  %v7639_v61 = vld [vmem:[%s13993_s1 + $0x368] sm:$0xff] }
  0xda   : > { %8978 = vmatprep.mubr.msk.bf16.mxu0 %vm256_vm0, %v1517_v6  ;;  %v10109_v6 = vld [vmem:[%s13994_s2 + $0x90] sm:$0xff]   ;;  %v1498_v7 = vmul.f32 %v7639_v61, %v10536_v13  ;;  %v7643_v13 = vld [vmem:[%s13993_s1 + $0x388] sm:$0xff] }
  0xdb   : > { %v1521_v41 = vpack.c.bf16 %v1494_v37, %v1493_v59  ;;  %v1502_v36 = vmul.f32 %v7643_v13, %v10563_v28  ;;  %v7645_v59 = vld [vmem:[%s13993_s1 + $0x398] sm:$0xff]  ;;  %v1505_v37 = vmul.f32 %v7646_v14, %v10575_v39  ;;  %v1507_v39 = vmul.f32 %v7648_v47, %v10591_v50  ;;  %v7654_v50 = vld [vmem:[%s13993_s1 + $0x3e0] sm:$0xff]  ;;  %v1807_v13 = vld [vmem:[#allocation2 + $0x10] sm:$0xff] }
  0xdc   : > { %v1504_v28 = vmul.f32 %v7645_v59, %v10573_v35  ;;  %v7651_v35 = vld [vmem:[%s13993_s1 + $0x3c8] sm:$0xff]  ;;  %v7688_v14 = vld [vmem:[%s13993_s1 + $0x410] sm:$0xff] }
  0xdd   : > { %v1525_v46 = vpack.c.bf16 %v1502_v36, %v1501_v32  ;;  %v1510_v61 = vmul.f32 %v7651_v35, %v10615_v3  ;;  %v11075_v35 = vld [vmem:[#allocation2 + $0x48] sm:$0xff] }
  0xe1   : > { %8979 = vmatmul.mubr.msk.bf16.vlgmr.msra.gmra.mrb[0].mxu0 %vm256_vm0, %v1518_v8  ;;  %v1522_v8 = vpack.c.bf16 %v1496_v31, %v1495_v23  ;;  %v1529_v23 = vpack.c.bf16 %v1510_v61, %v1509_v52  ;;  %v7652_v31 = vld [vmem:[%s13993_s1 + $0x3d0] sm:$0xff]  ;;  %v7693_v52 = vld [vmem:[%s13993_s1 + $0x438] sm:$0xff] }
  0xe2   : > { %9011 = vmatpush3.bf16.msra.mxu0 %v10755_v22  ;;  %8982 = vmatprep.mubr.msk.bf16.mxu0 %vm256_vm0, %v1519_v43  ;;  %v10110_v22 = vld [vmem:[%s13994_s2 + $0x98] sm:$0xff]   ;;  %v1523_v43 = vpack.c.bf16 %v1498_v7, %v1497_v44  ;;  %v1511_v57 = vmul.f32 %v7652_v31, %v10617_v5  ;;  %v1513_v7 = vmul.f32 %v7654_v50, %v10627_v10  ;;  %v7686_v10 = vld [vmem:[%s13993_s1 + $0x400] sm:$0xff]  ;;  %v11083_v61 = vld [vmem:[#allocation2 + $0x50] sm:$0xff] }
  0xe3   : > { %9012 = vmatprep.subr.bf16.mxu0 %v10108_v38  ;;  %v7653_v44 = vld [vmem:[%s13993_s1 + $0x3d8] sm:$0xff]  ;;  %v1872_v32 = vmul.f32 %v7686_v10, %v1807_v13  ;;  %v7695_v31 = vld [vmem:[%s13993_s1 + $0x448] sm:$0xff]  ;;  %v11116_v13 = vld [vmem:[#allocation2 + $0x70] sm:$0xff] }
  0xe4   : > { %v1512_v3 = vmul.f32 %v7653_v44, %v10625_v9  ;;  %v7657_v5 = vld [vmem:[%s13993_s1 + $0x3f8] sm:$0xff]  ;;  %v10112_v44 = vld [vmem:[%s13994_s2 + $0xa8] sm:$0xff]  }
  0xe5   : > { %v11034_v9 = vld [vmem:[#allocation2 + $0x18] sm:$0xff] }
  0xe6   : > { %9013 = vmatpush3.bf16.msra.mxu0 %v10108_v38  ;;  %v1524_v38 = vpack.c.bf16 %v1500_v12, %v1499_v48  ;;  %v1515_v48 = vmul.f32 %v7656_v4, %v10643_v25  ;;  %v1516_v12 = vmul.f32 %v7657_v5, %v11026_v62  ;;  %v7689_v25 = vld [vmem:[%s13993_s1 + $0x418] sm:$0xff] }
  0xe7   : > { %9014 = vmatprep.subr.bf16.mxu0 %v10109_v6  ;;  %v7697_v5 = vld [vmem:[%s13993_s1 + $0x458] sm:$0xff] }
  0xe8   : > { %v11118_v10 = vld [vmem:[#allocation2 + $0x78] sm:$0xff] }
  0xe9   : > { %8983 = vmatmul.mubr.msk.bf16.gmra.mrb[4].mxu0 %vm256_vm0, %v1520_v20  ;;  %v1526_v20 = vpack.c.bf16 %v1504_v28, %v1503_v19  ;;  %v11059_v19 = vld [vmem:[#allocation2 + $0x38] sm:$0xff]  ;;  %v7690_v28 = vld [vmem:[%s13993_s1 + $0x420] sm:$0xff] }
  0xea   : > { %8986 = vmatprep.mubr.msk.bf16.mxu0 %vm256_vm0, %v1521_v41  ;;  %9015 = vmatpush3.bf16.msra.mxu0 %v10109_v6  ;;  %v1506_v6 = vmul.f32 %v7647_v18, %v10589_v49  ;;  %v1508_v49 = vmul.f32 %v7649_v51, %v10599_v56  ;;  %v7655_v56 = vld [vmem:[%s13993_s1 + $0x3e8] sm:$0xff]  ;;  %v11057_v18 = vld [vmem:[#allocation2 + $0x30] sm:$0xff] }
  0xeb   : > { %9016 = vmatprep.subr.bf16.mxu0 %v10110_v22 }
  0xec   : > { %v1527_v41 = vpack.c.bf16 %v1506_v6, %v1505_v37  ;;  %v7691_v37 = vld [vmem:[%s13993_s1 + $0x428] sm:$0xff] }
  0xed   : > { %v1877_v47 = vmul.f32 %v7691_v37, %v11059_v19  ;;  %v11142_v37 = vld [vmem:[#allocation2 + $0x88] sm:$0xff] }
  0xee   : > { %9017 = vmatpush3.bf16.msra.mxu0 %v10110_v22  ;;  %v1528_v22 = vpack.c.bf16 %v1508_v49, %v1507_v39  ;;  %v7692_v39 = vld [vmem:[%s13993_s1 + $0x430] sm:$0xff] }
  0xef   : > { %9050 = vmatprep.subr.bf16.mxu0 %v10951_v11  ;;  %v1878_v50 = vmul.f32 %v7692_v39, %v11073_v29  ;;  %v7702_v39 = vld [vmem:[%s13993_s1 + $0x480] sm:$0xff] }
  0xf1   : > { %8987 = vmatmul.mubr.msk.bf16.gmra.mrb[8].mxu0 %vm256_vm0, %v1522_v8  ;;  %v1514_v8 = vmul.f32 %v7655_v56, %v10641_v24  ;;  %v7687_v24 = vld [vmem:[%s13993_s1 + $0x408] sm:$0xff]  ;;  %v1879_v56 = vmul.f32 %v7693_v52, %v11075_v35 }
  0xf2   : > { %8990 = vmatprep.mubr.msk.bf16.mxu0 %vm256_vm0, %v1523_v43  ;;  %v1530_v43 = vpack.c.bf16 %v1512_v3, %v1511_v57  ;;  %v1873_v36 = vmul.f32 %v7687_v24, %v11034_v9  ;;  %v7698_v24 = vld [vmem:[%s13993_s1 + $0x460] sm:$0xff] }
  0xf3   : > { %v1531_v1 = vpack.c.bf16 %v1514_v8, %v1513_v7  ;;  %v10113_v7 = vld [vmem:[%s13994_s2 + $0xb0] sm:$0xff]   ;;  %v1907_v8 = vpack.c.bf16 %v1879_v56, %v1878_v50  ;;  %v11167_v56 = vld [vmem:[#allocation2 + $0xa0] sm:$0xff] }
  0xf4   : > { %v1904_v59 = vpack.c.bf16 %v1873_v36, %v1872_v32 }
  0xf9   : > { %8991 = vmatmul.mubr.msk.bf16.gmra.mrb[12].mxu0 %vm256_vm0, %v1524_v38  ;;  %v1532_v38 = vpack.c.bf16 %v1516_v12, %v1515_v48  ;;  %v7699_v48 = vld [vmem:[%s13993_s1 + $0x468] sm:$0xff]  ;;  %v10114_v12 = vld [vmem:[%s13994_s2 + $0xb8] sm:$0xff]  }
  0xfa   : > { %8994 = vmatprep.mubr.msk.bf16.mxu0 %vm256_vm0, %v1525_v46  ;;  %v11047_v46 = vld [vmem:[#allocation2 + $0x20] sm:$0xff] }
  0xfb   : > { %v1874_v6 = vmul.f32 %v7688_v14, %v11047_v46  ;;  %v11138_v14 = vld [vmem:[%s13994_s2 + $0xc0] sm:$0xff]  }
 0x101   : > { %8995 = vmatmul.mubr.msk.bf16.gmra.mrb[16].mxu0 %vm256_vm0, %v1526_v20  ;;  %v1875_v20 = vmul.f32 %v7689_v25, %v11049_v40 }
 0x102   : > { %8998 = vmatprep.mubr.msk.bf16.mxu0 %vm256_vm0, %v1527_v41  ;;  %v1876_v41 = vmul.f32 %v7690_v28, %v11057_v18  ;;  %v11140_v28 = vld [vmem:[#allocation2 + $0x80] sm:$0xff] }
 0x103   : > { %v1905_v51 = vpack.c.bf16 %v1875_v20, %v1874_v6  ;;  %v7700_v20 = vld [vmem:[%s13993_s1 + $0x470] sm:$0xff] }
 0x104   : > { %v1906_v49 = vpack.c.bf16 %v1877_v47, %v1876_v41  ;;  %v7701_v41 = vld [vmem:[%s13993_s1 + $0x478] sm:$0xff]  ;;  %v11150_v47 = vld [vmem:[#allocation2 + $0x90] sm:$0xff]  ;;  %v1886_v52 = vmul.f32 %v7700_v20, %v11140_v28 }
 0x105   : > { %v7708_v20 = vld [vmem:[%s13993_s1 + $0x4b0] sm:$0xff] }
 0x109   : > { %8999 = vmatmul.mubr.msk.bf16.gmra.mrb[20].mxu0 %vm256_vm0, %v1528_v22  ;;  %v11085_v22 = vld [vmem:[#allocation2 + $0x58] sm:$0xff] }
 0x10a   : > { %9002 = vmatprep.mubr.msk.bf16.mxu0 %vm256_vm0, %v1529_v23  ;;  %v7694_v23 = vld [vmem:[%s13993_s1 + $0x440] sm:$0xff]  ;;  %v1881_v3 = vmul.f32 %v7695_v31, %v11085_v22  ;;  %v1888_v31 = vmul.f32 %v7702_v39, %v11150_v47  ;;  %v11203_v39 = vld [vmem:[#allocation2 + $0xd0] sm:$0xff] }
 0x10b   : > { %v1880_v57 = vmul.f32 %v7694_v23, %v11083_v61  ;;  %v1887_v23 = vmul.f32 %v7701_v41, %v11142_v37  ;;  %v7709_v41 = vld [vmem:[%s13993_s1 + $0x4b8] sm:$0xff] }
 0x10d   : > { %v1908_v4 = vpack.c.bf16 %v1881_v3, %v1880_v57  ;;  %v1911_v50 = vpack.c.bf16 %v1887_v23, %v1886_v52  ;;  %v11169_v57 = vld [vmem:[#allocation2 + $0xa8] sm:$0xff]  ;;  %v7710_v52 = vld [vmem:[%s13993_s1 + $0x4c0] sm:$0xff] }
 0x10e   : > { %v7711_v23 = vld [vmem:[%s13993_s1 + $0x4c8] sm:$0xff] }
 0x111   : > { %9003 = vmatmul.mubr.msk.bf16.gmra.mrb[24].mxu0 %vm256_vm0, %v1530_v43  ;;  %v11106_v43 = vld [vmem:[#allocation2 + $0x60] sm:$0xff] }
 0x112   : > { %9006 = vmatprep.mubr.msk.bf16.mxu0 %vm256_vm0, %v1531_v1  ;;  %v11108_v1 = vld [vmem:[#allocation2 + $0x68] sm:$0xff] }
 0x113   : > { %v1883_v36 = vmul.f32 %v7697_v5, %v11108_v1  ;;  %v7706_v5 = vld [vmem:[%s13993_s1 + $0x4a0] sm:$0xff] }
 0x119   : > { %9007 = vmatmul.mubr.msk.bf16.gmra.mrb[28].mxu0 %vm256_vm0, %v1532_v38  ;;  %v1884_v38 = vmul.f32 %v7698_v24, %v11116_v13  ;;  %v7707_v24 = vld [vmem:[%s13993_s1 + $0x4a8] sm:$0xff] }
 0x11a   : > { %9018 = vmatprep.mubr.msk.bf16.mxu0 %vm256_vm0, %v1904_v59  ;;  %v1885_v59 = vmul.f32 %v7699_v48, %v11118_v10 }
 0x11c   : > { %v1910_v6 = vpack.c.bf16 %v1885_v59, %v1884_v38  ;;  %v11193_v59 = vld [vmem:[#allocation2 + $0xc0] sm:$0xff] }
 0x121   : > { %9019 = vmatmul.mubr.msk.bf16.vlgmr.msra.gmra.mrb[0].mxu0 %vm256_vm0, %v1905_v51  ;;  %v11152_v51 = vld [vmem:[#allocation2 + $0x98] sm:$0xff] }
 0x122   : > { %9051 = vmatpush3.bf16.msra.mxu0 %v10951_v11  ;;  %9022 = vmatprep.mubr.msk.bf16.mxu0 %vm256_vm0, %v1906_v49  ;;  %v7696_v11 = vld [vmem:[%s13993_s1 + $0x450] sm:$0xff]  ;;  %v7703_v49 = vld [vmem:[%s13993_s1 + $0x488] sm:$0xff] }
 0x123   : > { %9052 = vmatprep.subr.bf16.mxu0 %v10112_v44  ;;  %v1882_v32 = vmul.f32 %v7696_v11, %v11106_v43  ;;  %v11177_v11 = vld [vmem:[#allocation2 + $0xb0] sm:$0xff] }
 0x125   : > { %v1909_v25 = vpack.c.bf16 %v1883_v36, %v1882_v32  ;;  %v1892_v32 = vmul.f32 %v7706_v5, %v11177_v11  ;;  %v11221_v5 = vld [vmem:[#allocation2 + $0xe8] sm:$0xff] }
 0x126   : > { %9053 = vmatpush3.bf16.msra.mxu0 %v10112_v44  ;;  %v1889_v44 = vmul.f32 %v7703_v49, %v11152_v51  ;;  %v11205_v49 = vld [vmem:[#allocation2 + $0xd8] sm:$0xff] }
 0x127   : > { %9054 = vmatprep.subr.bf16.mxu0 %v10113_v7 }
 0x128   : > { %v1912_v3 = vpack.c.bf16 %v1889_v44, %v1888_v31  ;;  %v1894_v31 = vmul.f32 %v7708_v20, %v11193_v59 }
 0x129   : > { %9023 = vmatmul.mubr.msk.bf16.gmra.mrb[4].mxu0 %vm256_vm0, %v1907_v8  ;;  %v7705_v8 = vld [vmem:[%s13993_s1 + $0x498] sm:$0xff] }
 0x12a   : > { %9026 = vmatprep.mubr.msk.bf16.mxu0 %vm256_vm0, %v1908_v4  ;;  %9055 = vmatpush3.bf16.msra.mxu0 %v10113_v7  ;;  %v7704_v7 = vld [vmem:[%s13993_s1 + $0x490] sm:$0xff]  ;;  %v11179_v4 = vld [vmem:[#allocation2 + $0xb8] sm:$0xff] }
 0x12b   : > { %9056 = vmatprep.subr.bf16.mxu0 %v10114_v12  ;;  %v1890_v48 = vmul.f32 %v7704_v7, %v11167_v56  ;;  %v1893_v36 = vmul.f32 %v7707_v24, %v11179_v4 }
 0x12e   : > { %9057 = vmatpush3.bf16.msra.mxu0 %v10114_v12  ;;  %v1891_v12 = vmul.f32 %v7705_v8, %v11169_v57  ;;  %v11219_v8 = vld [vmem:[#allocation2 + $0xe0] sm:$0xff] }
 0x12f   : > { %9090 = vmatprep.subr.bf16.mxu0 %v11138_v14 }
 0x130   : > { %v1913_v38 = vpack.c.bf16 %v1891_v12, %v1890_v48  ;;  %v7712_v48 = vld [vmem:[%s13993_s1 + $0x4d0] sm:$0xff]  ;;  %v7713_v12 = vld [vmem:[%s13993_s1 + $0x4d8] sm:$0xff] }
 0x131   : > { %9027 = vmatmul.mubr.msk.bf16.gmra.mrb[8].mxu0 %vm256_vm0, %v1909_v25  ;;  %v11195_v25 = vld [vmem:[#allocation2 + $0xc8] sm:$0xff]  ;;  %v1898_v20 = vmul.f32 %v7712_v48, %v11219_v8  ;;  %v7717_v48 = vld [vmem:[%s13993_s1 + $0x4f8] sm:$0xff] }
 0x132   : > { %9030 = vmatprep.mubr.msk.bf16.mxu0 %vm256_vm0, %v1910_v6  ;;  %v1914_v6 = vpack.c.bf16 %v1893_v36, %v1892_v32  ;;  %v1895_v44 = vmul.f32 %v7709_v41, %v11195_v25  ;;  %v11229_v32 = vld [vmem:[#allocation2 + $0xf0] sm:$0xff]  ;;  %v11231_v36 = vld [vmem:[#allocation2 + $0xf8] sm:$0xff]  ;;  %v1899_v41 = vmul.f32 %v7713_v12, %v11221_v5  ;;  %v7747_v12 = vld [vmem:[%s13993_s1 + $0x508] sm:$0xff] }
 0x133   : > { %14121 = vst [vmem:[#allocation15_spill] sm:$0xff] %v11231_v36 }
 0x134   : > { %v1915_v7 = vpack.c.bf16 %v1895_v44, %v1894_v31  ;;  %v1917_v31 = vpack.c.bf16 %v1899_v41, %v1898_v20  ;;  %v11245_v44 = vld [vmem:[#allocation2 + $0x100] sm:$0xff]  ;;  %v2260_v41 = vmul.f32 %v7747_v12, %v10664_v53 }
 0x139   : > { %9031 = vmatmul.mubr.msk.bf16.gmra.mrb[12].mxu0 %vm256_vm0, %v1911_v50  ;;  %v1896_v50 = vmul.f32 %v7710_v52, %v11203_v39 }
 0x13a   : > { %9034 = vmatprep.mubr.msk.bf16.mxu0 %vm256_vm0, %v1912_v3  ;;  %v1897_v3 = vmul.f32 %v7711_v23, %v11205_v49 }
 0x13c   : > { %v1916_v24 = vpack.c.bf16 %v1897_v3, %v1896_v50  ;;  %v11247_v3 = vld [vmem:[#allocation2 + $0x108] sm:$0xff] }
 0x141   : > { %9035 = vmatmul.mubr.msk.bf16.gmra.mrb[16].mxu0 %vm256_vm0, %v1913_v38  ;;  %v7714_v38 = vld [vmem:[%s13993_s1 + $0x4e0] sm:$0xff] }
 0x142   : > { %9038 = vmatprep.mubr.msk.bf16.mxu0 %vm256_vm0, %v1914_v6  ;;  %v7715_v6 = vld [vmem:[%s13993_s1 + $0x4e8] sm:$0xff]  ;;  %v1900_v52 = vmul.f32 %v7714_v38, %v11229_v32 }
 0x143   : > { %v1901_v23 = vmul.f32 %v7715_v6, %v11231_v36  ;;  %v1903_v6 = vmul.f32 %v7717_v48, %v11247_v3  ;;  %v7748_v36 = vld [vmem:[%s13993_s1 + $0x510] sm:$0xff] }
 0x144   : > { %v2261_v53 = vmul.f32 %v7748_v36, %v10666_v54  ;;  %v7754_v54 = vld [vmem:[%s13993_s1 + $0x540] sm:$0xff] }
 0x145   : > { %v1918_v50 = vpack.c.bf16 %v1901_v23, %v1900_v52 }
 0x149   : > { %9039 = vmatmul.mubr.msk.bf16.gmra.mrb[20].mxu0 %vm256_vm0, %v1915_v7  ;;  %v7716_v7 = vld [vmem:[%s13993_s1 + $0x4f0] sm:$0xff] }
 0x14a   : > { %9042 = vmatprep.mubr.msk.bf16.mxu0 %vm256_vm0, %v1916_v24  ;;  %v7746_v24 = vld [vmem:[%s13993_s1 + $0x500] sm:$0xff]  ;;  %v1902_v38 = vmul.f32 %v7716_v7, %v11245_v44 }
 0x14b   : > { %v2259_v20 = vmul.f32 %v7746_v24, %v10651_v34  ;;  %v7750_v7 = vld [vmem:[%s13993_s1 + $0x520] sm:$0xff]  ;;  %v7751_v34 = vld [vmem:[%s13993_s1 + $0x528] sm:$0xff] }
 0x14c   : > { %v1919_v52 = vpack.c.bf16 %v1903_v6, %v1902_v38  ;;  %v2263_v48 = vmul.f32 %v7750_v7, %v10676_v63  ;;  %v2264_v24 = vmul.f32 %v7751_v34, %v10690_v16  ;;  %v7752_v6 = vld [vmem:[%s13993_s1 + $0x530] sm:$0xff]  ;;  %v10116_v63 = vld [vmem:[%s13994_s2 + $0xc8] sm:$0xff]  }
 0x14d   : > { %v2291_v23 = vpack.c.bf16 %v2260_v41, %v2259_v20  ;;  %v7753_v20 = vld [vmem:[%s13993_s1 + $0x538] sm:$0xff]  ;;  %v2265_v16 = vmul.f32 %v7752_v6, %v10692_v17  ;;  %v2267_v41 = vmul.f32 %v7754_v54, %v10702_v27  ;;  %v7756_v17 = vld [vmem:[%s13993_s1 + $0x550] sm:$0xff]  ;;  %v7758_v27 = vld [vmem:[%s13993_s1 + $0x560] sm:$0xff] }
 0x14e   : > { %v2293_v38 = vpack.c.bf16 %v2264_v24, %v2263_v48  ;;  %v2266_v36 = vmul.f32 %v7753_v20, %v10700_v26  ;;  %v7757_v26 = vld [vmem:[%s13993_s1 + $0x558] sm:$0xff]  ;;  %v2269_v34 = vmul.f32 %v7756_v17, %v10725_v58  ;;  %v11334_v24 = vld [vmem:[%s13994_s2 + $0xe0] sm:$0xff]   ;;  %v7760_v58 = vld [vmem:[%s13993_s1 + $0x570] sm:$0xff] }
 0x14f   : > { %v14122_v6 = vld [vmem:[#allocation3_spill] sm:$0xff]  ;;  %v14123_v54 = vld [vmem:[#allocation4_spill] sm:$0xff] }
 0x150   : > { %v2273_v20 = vmul.f32 %v7760_v58, %v14122_v6  ;;  %v7766_v17 = vld [vmem:[%s13993_s1 + $0x5a0] sm:$0xff]  ;;  %v7771_v6 = vld [vmem:[%s13993_s1 + $0x5c8] sm:$0xff] }
 0x151   : > { %9043 = vmatmul.mubr.msk.bf16.gmra.mrb[24].mxu0 %vm256_vm0, %v1917_v31  ;;  %v7749_v31 = vld [vmem:[%s13993_s1 + $0x518] sm:$0xff] }
 0x152   : > { %9046 = vmatprep.mubr.msk.bf16.mxu0 %vm256_vm0, %v1918_v50  ;;  %v2262_v50 = vmul.f32 %v7749_v31, %v10674_v60  ;;  %v7755_v60 = vld [vmem:[%s13993_s1 + $0x548] sm:$0xff]  ;;  %v2294_v31 = vpack.c.bf16 %v2266_v36, %v2265_v16  ;;  %v14125_v36 = vld [vmem:[#allocation6_spill] sm:$0xff] }
 0x154   : > { %v2292_v12 = vpack.c.bf16 %v2262_v50, %v2261_v53  ;;  %v2270_v53 = vmul.f32 %v7757_v26, %v10733_v0  ;;  %v2271_v50 = vmul.f32 %v7758_v27, %v10735_v2  ;;  %v7761_v0 = vld [vmem:[%s13993_s1 + $0x578] sm:$0xff]  ;;  %v7762_v2 = vld [vmem:[%s13993_s1 + $0x580] sm:$0xff]  ;;  %v7767_v26 = vld [vmem:[%s13993_s1 + $0x5a8] sm:$0xff] }
 0x155   : > { %v14126_v27 = vld [vmem:[#allocation7_spill] sm:$0xff] }
 0x159   : > { %9047 = vmatmul.mubr.msk.bf16.gmra.mrb[28].mxu0 %vm256_vm0, %v1919_v52  ;;  %v2268_v52 = vmul.f32 %v7755_v60, %v10723_v55  ;;  %v7759_v55 = vld [vmem:[%s13993_s1 + $0x568] sm:$0xff]  ;;  %v2274_v60 = vmul.f32 %v7761_v0, %v14123_v54  ;;  %v7768_v0 = vld [vmem:[%s13993_s1 + $0x5b0] sm:$0xff] }
 0x15a   : > { %9058 = vmatprep.mubr.msk.bf16.mxu0 %vm256_vm0, %v2291_v23  ;;  %v10117_v23 = vld [vmem:[%s13994_s2 + $0xd0] sm:$0xff]   ;;  %v2272_v48 = vmul.f32 %v7759_v55, %v10757_v33  ;;  %v7763_v33 = vld [vmem:[%s13993_s1 + $0x588] sm:$0xff] }
 0x15b   : > { %v2295_v7 = vpack.c.bf16 %v2268_v52, %v2267_v41  ;;  %v2276_v41 = vmul.f32 %v7763_v33, %v14125_v36  ;;  %v2298_v52 = vpack.c.bf16 %v2274_v60, %v2273_v20  ;;  %v7770_v33 = vld [vmem:[%s13993_s1 + $0x5c0] sm:$0xff]  ;;  %v14131_v60 = vld [vmem:[#allocation12_spill] sm:$0xff] }
 0x15c   : > { %v14130_v20 = vld [vmem:[#allocation11_spill] sm:$0xff] }
 0x15d   : > { %v2281_v54 = vmul.f32 %v7768_v0, %v14130_v20 }
 0x161   : > { %9059 = vmatmul.mubr.msk.bf16.vlgmr.msra.gmra.mrb[0].mxu0 %vm256_vm0, %v2292_v12  ;;  %v2296_v12 = vpack.c.bf16 %v2270_v53, %v2269_v34  ;;  %v14128_v53 = vld [vmem:[#allocation9_spill] sm:$0xff] }
 0x162   : > { %9091 = vmatpush3.bf16.msra.mxu0 %v11138_v14  ;;  %9062 = vmatprep.mubr.msk.bf16.mxu0 %vm256_vm0, %v2293_v38  ;;  %v10118_v14 = vld [vmem:[%s13994_s2 + $0xd8] sm:$0xff]   ;;  %v2297_v38 = vpack.c.bf16 %v2272_v48, %v2271_v50  ;;  %v2279_v50 = vmul.f32 %v7766_v17, %v14128_v53  ;;  %v7774_v17 = vld [vmem:[%s13993_s1 + $0x5e0] sm:$0xff] }
 0x163   : > { %9092 = vmatprep.subr.bf16.mxu0 %v10116_v63  ;;  %v14129_v48 = vld [vmem:[#allocation10_spill] sm:$0xff] }
 0x166   : > { %9093 = vmatpush3.bf16.msra.mxu0 %v10116_v63  ;;  %v14124_v63 = vld [vmem:[#allocation5_spill] sm:$0xff] }
 0x167   : > { %9094 = vmatprep.subr.bf16.mxu0 %v10117_v23  ;;  %v2275_v16 = vmul.f32 %v7762_v2, %v14124_v63  ;;  %v7769_v2 = vld [vmem:[%s13993_s1 + $0x5b8] sm:$0xff] }
 0x168   : > { %v2282_v63 = vmul.f32 %v7769_v2, %v14131_v60  ;;  %v2584_v60 = vld [vmem:[#allocation2 + $0x2f] sm:$0xff] }
 0x169   : > { %9063 = vmatmul.mubr.msk.bf16.gmra.mrb[4].mxu0 %vm256_vm0, %v2294_v31  ;;  %v7764_v31 = vld [vmem:[%s13993_s1 + $0x590] sm:$0xff] }
 0x16a   : > { %9066 = vmatprep.mubr.msk.bf16.mxu0 %vm256_vm0, %v2295_v7  ;;  %9095 = vmatpush3.bf16.msra.mxu0 %v10117_v23  ;;  %v2299_v23 = vpack.c.bf16 %v2276_v41, %v2275_v16  ;;  %v7765_v7 = vld [vmem:[%s13993_s1 + $0x598] sm:$0xff]  ;;  %v2277_v55 = vmul.f32 %v7764_v31, %v14126_v27  ;;  %v14132_v16 = vld [vmem:[#allocation13_spill] sm:$0xff]  ;;  %v2284_v41 = vmul.f32 %v7771_v6, %v10836_v42 }
 0x16b   : > { %9096 = vmatprep.subr.bf16.mxu0 %v10118_v14  ;;  %v2283_v36 = vmul.f32 %v7770_v33, %v14132_v16  ;;  %v7772_v31 = vld [vmem:[%s13993_s1 + $0x5d0] sm:$0xff] }
 0x16c   : > { %v2285_v42 = vmul.f32 %v7772_v31, %v10838_v15  ;;  %v7777_v15 = vld [vmem:[%s13993_s1 + $0x5f8] sm:$0xff]  ;;  %v7808_v16 = vld [vmem:[%s13993_s1 + $0x610] sm:$0xff] }
 0x16e   : > { %9097 = vmatpush3.bf16.msra.mxu0 %v10118_v14  ;;  %v14127_v14 = vld [vmem:[#allocation8_spill] sm:$0xff] }
 0x16f   : > { %9130 = vmatprep.subr.bf16.mxu0 %v11334_v24  ;;  %v2278_v34 = vmul.f32 %v7765_v7, %v14127_v14  ;;  %v7773_v7 = vld [vmem:[%s13993_s1 + $0x5d8] sm:$0xff] }
 0x170   : > { %v2286_v27 = vmul.f32 %v7773_v7, %v10846_v21  ;;  %v2582_v21 = vld [vmem:[#allocation2 + $0x1f] sm:$0xff] }
 0x171   : > { %9067 = vmatmul.mubr.msk.bf16.gmra.mrb[8].mxu0 %vm256_vm0, %v2296_v12  ;;  %v2280_v12 = vmul.f32 %v7767_v26, %v14129_v48  ;;  %v7775_v26 = vld [vmem:[%s13993_s1 + $0x5e8] sm:$0xff] }
 0x172   : > { %9070 = vmatprep.mubr.msk.bf16.mxu0 %vm256_vm0, %v2297_v38  ;;  %v2300_v38 = vpack.c.bf16 %v2278_v34, %v2277_v55  ;;  %v14133_v55 = vld [vmem:[#allocation14_spill] sm:$0xff]  ;;  %v2288_v34 = vmul.f32 %v7775_v26, %v10862_v30  ;;  %v2304_v53 = vpack.c.bf16 %v2286_v27, %v2285_v42  ;;  %v7807_v30 = vld [vmem:[%s13993_s1 + $0x608] sm:$0xff] }
 0x173   : > { %v2301_v58 = vpack.c.bf16 %v2280_v12, %v2279_v50  ;;  %v2287_v14 = vmul.f32 %v7774_v17, %v14133_v55  ;;  %v11409_v50 = vld [vmem:[#allocation2 + $0x109] sm:$0xff]  ;;  %v2647_v6 = vmul.f32 %v7807_v30, %v2582_v21 }
 0x174   : > { %v7776_v12 = vld [vmem:[%s13993_s1 + $0x5f0] sm:$0xff]  ;;  %v2290_v2 = vmul.f32 %v7777_v15, %v11409_v50  ;;  %v2587_v27 = vld [vmem:[#allocation2 + $0x47] sm:$0xff] }
 0x175   : > { %v2305_v48 = vpack.c.bf16 %v2288_v34, %v2287_v14  ;;  %v2289_v0 = vmul.f32 %v7776_v12, %v10864_v45  ;;  %v2586_v45 = vld [vmem:[#allocation2 + $0x3f] sm:$0xff]  ;;  %v2588_v55 = vld [vmem:[#allocation2 + $0x4f] sm:$0xff] }
 0x176   : > { %v7812_v14 = vld [vmem:[%s13993_s1 + $0x630] sm:$0xff]  ;;  %v2590_v12 = vld [vmem:[#allocation2 + $0x5f] sm:$0xff]  ;;  %v10120_v21 = vld [vmem:[%s13994_s2 + $0xe8] sm:$0xff]  }
 0x177   : > { %v2306_v20 = vpack.c.bf16 %v2290_v2, %v2289_v0  ;;  %v7814_v15 = vld [vmem:[%s13993_s1 + $0x640] sm:$0xff] }
 0x179   : > { %9071 = vmatmul.mubr.msk.bf16.gmra.mrb[12].mxu0 %vm256_vm0, %v2298_v52  ;;  %v2302_v52 = vpack.c.bf16 %v2282_v63, %v2281_v54  ;;  %v2583_v54 = vld [vmem:[#allocation2 + $0x27] sm:$0xff] }
 0x17a   : > { %9074 = vmatprep.mubr.msk.bf16.mxu0 %vm256_vm0, %v2299_v23  ;;  %v2303_v23 = vpack.c.bf16 %v2284_v41, %v2283_v36  ;;  %v7809_v36 = vld [vmem:[%s13993_s1 + $0x618] sm:$0xff]  ;;  %v2648_v31 = vmul.f32 %v7808_v16, %v2583_v54  ;;  %v2592_v54 = vld [vmem:[#allocation2 + $0x6f] sm:$0xff] }
 0x17b   : > { %v2585_v41 = vld [vmem:[#allocation2 + $0x37] sm:$0xff]  ;;  %v2649_v7 = vmul.f32 %v7809_v36, %v2584_v60  ;;  %v2594_v36 = vld [vmem:[#allocation2 + $0x7f] sm:$0xff] }
 0x17c   : > { %v7816_v60 = vld [vmem:[%s13993_s1 + $0x650] sm:$0xff] }
 0x17d   : > { %v2679_v42 = vpack.c.bf16 %v2649_v7, %v2648_v31  ;;  %v2593_v16 = vld [vmem:[#allocation2 + $0x77] sm:$0xff] }
 0x181   : > { %9075 = vmatmul.mubr.msk.bf16.gmra.mrb[16].mxu0 %vm256_vm0, %v2300_v38  ;;  %v2581_v38 = vld [vmem:[#allocation2 + $0x17] sm:$0xff] }
 0x182   : > { %9078 = vmatprep.mubr.msk.bf16.mxu0 %vm256_vm0, %v2301_v58  ;;  %v7806_v58 = vld [vmem:[%s13993_s1 + $0x600] sm:$0xff] }
 0x183   : > { %v2646_v33 = vmul.f32 %v7806_v58, %v2581_v38  ;;  %v7815_v38 = vld [vmem:[%s13993_s1 + $0x648] sm:$0xff]  ;;  %v2652_v58 = vmul.f32 %v7812_v14, %v2587_v27 }
 0x184   : > { %v2655_v2 = vmul.f32 %v7815_v38, %v2590_v12  ;;  %v2595_v27 = vld [vmem:[#allocation2 + $0x87] sm:$0xff]  ;;  %v2598_v12 = vld [vmem:[#allocation2 + $0x9f] sm:$0xff] }
 0x185   : > { %v2678_v63 = vpack.c.bf16 %v2647_v6, %v2646_v33  ;;  %v10121_v33 = vld [vmem:[%s13994_s2 + $0xf0] sm:$0xff]   ;;  %v7823_v38 = vld [vmem:[%s13993_s1 + $0x688] sm:$0xff] }
 0x189   : > { %9079 = vmatmul.mubr.msk.bf16.gmra.mrb[20].mxu0 %vm256_vm0, %v2302_v52  ;;  %v7810_v52 = vld [vmem:[%s13993_s1 + $0x620] sm:$0xff] }
 0x18a   : > { %9082 = vmatprep.mubr.msk.bf16.mxu0 %vm256_vm0, %v2303_v23  ;;  %v7811_v23 = vld [vmem:[%s13993_s1 + $0x628] sm:$0xff]  ;;  %v2650_v17 = vmul.f32 %v7810_v52, %v2585_v41  ;;  %v7818_v41 = vld [vmem:[%s13993_s1 + $0x660] sm:$0xff]  ;;  %v10122_v52 = vld [vmem:[%s13994_s2 + $0xf8] sm:$0xff]  }
 0x18b   : > { %v2651_v26 = vmul.f32 %v7811_v23, %v2586_v45  ;;  %v7819_v45 = vld [vmem:[%s13993_s1 + $0x668] sm:$0xff]  ;;  %v2658_v7 = vmul.f32 %v7818_v41, %v2593_v16  ;;  %v7826_v16 = vld [vmem:[%s13993_s1 + $0x6a0] sm:$0xff] }
 0x18d   : > { %v2680_v34 = vpack.c.bf16 %v2651_v26, %v2650_v17  ;;  %v2659_v17 = vmul.f32 %v7819_v45, %v2594_v36  ;;  %v11482_v26 = vld [vmem:[%s13994_s2 + $0x100] sm:$0xff]   ;;  %v7827_v36 = vld [vmem:[%s13993_s1 + $0x6a8] sm:$0xff] }
 0x18f   : > { %v2684_v14 = vpack.c.bf16 %v2659_v17, %v2658_v7  ;;  %v2603_v7 = vld [vmem:[#allocation2 + $0xc7] sm:$0xff]  ;;  %v2604_v17 = vld [vmem:[#allocation2 + $0xcf] sm:$0xff] }
 0x191   : > { %9083 = vmatmul.mubr.msk.bf16.gmra.mrb[24].mxu0 %vm256_vm0, %v2304_v53  ;;  %v7813_v53 = vld [vmem:[%s13993_s1 + $0x638] sm:$0xff] }
 0x192   : > { %9086 = vmatprep.mubr.msk.bf16.mxu0 %vm256_vm0, %v2305_v48  ;;  %v2589_v48 = vld [vmem:[#allocation2 + $0x57] sm:$0xff]  ;;  %v2653_v30 = vmul.f32 %v7813_v53, %v2588_v55  ;;  %v2596_v55 = vld [vmem:[#allocation2 + $0x8f] sm:$0xff] }
 0x193   : > { %v2654_v0 = vmul.f32 %v7814_v15, %v2589_v48  ;;  %v7821_v53 = vld [vmem:[%s13993_s1 + $0x678] sm:$0xff]  ;;  %v7822_v15 = vld [vmem:[%s13993_s1 + $0x680] sm:$0xff] }
 0x194   : > { %v2681_v6 = vpack.c.bf16 %v2653_v30, %v2652_v58  ;;  %v2597_v48 = vld [vmem:[#allocation2 + $0x97] sm:$0xff]  ;;  %v2661_v58 = vmul.f32 %v7821_v53, %v2596_v55  ;;  %v7830_v53 = vld [vmem:[%s13993_s1 + $0x6c0] sm:$0xff] }
 0x195   : > { %v2662_v30 = vmul.f32 %v7822_v15, %v2597_v48  ;;  %v7829_v55 = vld [vmem:[%s13993_s1 + $0x6b8] sm:$0xff]  ;;  %v7831_v48 = vld [vmem:[%s13993_s1 + $0x6c8] sm:$0xff] }
 0x196   : > { %v2669_v15 = vmul.f32 %v7829_v55, %v2604_v17  ;;  %v7866_v17 = vld [vmem:[%s13993_s1 + $0x700] sm:$0xff] }
 0x199   : > { %9087 = vmatmul.mubr.msk.bf16.gmra.mrb[28].mxu0 %vm256_vm0, %v2306_v20  ;;  %v2591_v20 = vld [vmem:[#allocation2 + $0x67] sm:$0xff] }
 0x19a   : > { %9098 = vmatprep.mubr.msk.bf16.mxu0 %vm256_vm0, %v2678_v63  ;;  %v2682_v63 = vpack.c.bf16 %v2655_v2, %v2654_v0  ;;  %v2656_v23 = vmul.f32 %v7816_v60, %v2591_v20  ;;  %v2663_v0 = vmul.f32 %v7823_v38, %v2598_v12  ;;  %v7825_v60 = vld [vmem:[%s13993_s1 + $0x698] sm:$0xff] }
 0x19c   : > { %v2686_v20 = vpack.c.bf16 %v2663_v0, %v2662_v30  ;;  %v2607_v30 = vld [vmem:[#allocation2 + $0xe7] sm:$0xff]  ;;  %v2608_v0 = vld [vmem:[#allocation2 + $0xef] sm:$0xff] }
 0x1a1   : > { %9099 = vmatmul.mubr.msk.bf16.vlgmr.msra.gmra.mrb[0].mxu0 %vm256_vm0, %v2679_v42 }
 0x1a2   : > { %9131 = vmatpush3.bf16.msra.mxu0 %v11334_v24  ;;  %9102 = vmatprep.mubr.msk.bf16.mxu0 %vm256_vm0, %v2680_v34  ;;  %v7817_v24 = vld [vmem:[%s13993_s1 + $0x658] sm:$0xff]  ;;  %v7820_v34 = vld [vmem:[%s13993_s1 + $0x670] sm:$0xff] }
 0x1a3   : > { %9132 = vmatprep.subr.bf16.mxu0 %v10120_v21  ;;  %v2657_v31 = vmul.f32 %v7817_v24, %v2592_v54  ;;  %v7824_v54 = vld [vmem:[%s13993_s1 + $0x690] sm:$0xff]  ;;  %v2602_v24 = vld [vmem:[#allocation2 + $0xbf] sm:$0xff] }
 0x1a5   : > { %v2683_v42 = vpack.c.bf16 %v2657_v31, %v2656_v23  ;;  %v2667_v23 = vmul.f32 %v7827_v36, %v2602_v24 }
 0x1a6   : > { %9133 = vmatpush3.bf16.msra.mxu0 %v10120_v21  ;;  %v2660_v21 = vmul.f32 %v7820_v34, %v2595_v27  ;;  %v7828_v27 = vld [vmem:[%s13993_s1 + $0x6b0] sm:$0xff]  ;;  %v2606_v34 = vld [vmem:[#allocation2 + $0xdf] sm:$0xff] }
 0x1a7   : > { %9134 = vmatprep.subr.bf16.mxu0 %v10121_v33  ;;  %v2668_v12 = vmul.f32 %v7828_v27, %v2603_v7  ;;  %v7837_v7 = vld [vmem:[%s13993_s1 + $0x6f8] sm:$0xff] }
 0x1a8   : > { %v2685_v2 = vpack.c.bf16 %v2661_v58, %v2660_v21  ;;  %v2671_v21 = vmul.f32 %v7831_v48, %v2606_v34 }
 0x1a9   : > { %9103 = vmatmul.mubr.msk.bf16.gmra.mrb[4].mxu0 %vm256_vm0, %v2681_v6  ;;  %v2600_v6 = vld [vmem:[#allocation2 + $0xaf] sm:$0xff]  ;;  %v2689_v58 = vpack.c.bf16 %v2669_v15, %v2668_v12  ;;  %v7869_v15 = vld [vmem:[%s13993_s1 + $0x718] sm:$0xff] }
 0x1aa   : > { %9106 = vmatprep.mubr.msk.bf16.mxu0 %vm256_vm0, %v2682_v63  ;;  %9135 = vmatpush3.bf16.msra.mxu0 %v10121_v33  ;;  %v2599_v33 = vld [vmem:[#allocation2 + $0xa7] sm:$0xff]  ;;  %v2601_v63 = vld [vmem:[#allocation2 + $0xb7] sm:$0xff]  ;;  %v2665_v45 = vmul.f32 %v7825_v60, %v2600_v6 }
 0x1ab   : > { %9136 = vmatprep.subr.bf16.mxu0 %v10122_v52  ;;  %v2664_v41 = vmul.f32 %v7824_v54, %v2599_v33  ;;  %v7832_v33 = vld [vmem:[%s13993_s1 + $0x6d0] sm:$0xff]  ;;  %v7833_v6 = vld [vmem:[%s13993_s1 + $0x6d8] sm:$0xff]  ;;  %v7834_v60 = vld [vmem:[%s13993_s1 + $0x6e0] sm:$0xff] }
 0x1ac   : > { %v2610_v54 = vld [vmem:[#allocation2 + $0xff] sm:$0xff]  ;;  %v2672_v24 = vmul.f32 %v7832_v33, %v2607_v30  ;;  %v7868_v12 = vld [vmem:[%s13993_s1 + $0x710] sm:$0xff] }
 0x1ad   : > { %v2687_v31 = vpack.c.bf16 %v2665_v45, %v2664_v41  ;;  %v7873_v33 = vld [vmem:[%s13993_s1 + $0x738] sm:$0xff] }
 0x1ae   : > { %9137 = vmatpush3.bf16.msra.mxu0 %v10122_v52  ;;  %v2666_v52 = vmul.f32 %v7826_v16, %v2601_v63  ;;  %v7835_v63 = vld [vmem:[%s13993_s1 + $0x6e8] sm:$0xff]  ;;  %v2673_v16 = vmul.f32 %v7833_v6, %v2608_v0  ;;  %v3040_v6 = vmul.f32 %v7873_v33, %v11083_v61  ;;  %v7877_v61 = vld [vmem:[%s13993_s1 + $0x758] sm:$0xff] }
 0x1af   : > { %9170 = vmatprep.subr.bf16.mxu0 %v11482_v26  ;;  %v2675_v41 = vmul.f32 %v7835_v63, %v2610_v54 }
 0x1b0   : > { %v2691_v45 = vpack.c.bf16 %v2673_v16, %v2672_v24 }
 0x1b1   : > { %9107 = vmatmul.mubr.msk.bf16.gmra.mrb[8].mxu0 %vm256_vm0, %v2683_v42  ;;  %v2688_v42 = vpack.c.bf16 %v2667_v23, %v2666_v52  ;;  %v2612_v23 = vld [vmem:[#allocation2 + $0x10f] sm:$0xff] }
 0x1b2   : > { %9110 = vmatprep.mubr.msk.bf16.mxu0 %vm256_vm0, %v2684_v14  ;;  %v2605_v14 = vld [vmem:[#allocation2 + $0xd7] sm:$0xff]  ;;  %v2677_v55 = vmul.f32 %v7837_v7, %v2612_v23 }
 0x1b3   : > { %v2670_v38 = vmul.f32 %v7830_v53, %v2605_v14  ;;  %v3033_v14 = vmul.f32 %v7866_v17, %v11034_v9  ;;  %v7871_v9 = vld [vmem:[%s13993_s1 + $0x728] sm:$0xff] }
 0x1b9   : > { %9111 = vmatmul.mubr.msk.bf16.gmra.mrb[12].mxu0 %vm256_vm0, %v2685_v2  ;;  %v2690_v2 = vpack.c.bf16 %v2671_v21, %v2670_v38  ;;  %v3036_v38 = vmul.f32 %v7869_v15, %v11057_v18  ;;  %v7875_v18 = vld [vmem:[%s13993_s1 + $0x748] sm:$0xff] }
 0x1ba   : > { %9114 = vmatprep.mubr.msk.bf16.mxu0 %vm256_vm0, %v2686_v20  ;;  %v2609_v20 = vld [vmem:[#allocation2 + $0xf7] sm:$0xff]  ;;  %v3042_v54 = vmul.f32 %v7875_v18, %v11106_v43  ;;  %v7879_v43 = vld [vmem:[%s13993_s1 + $0x768] sm:$0xff] }
 0x1bb   : > { %v2674_v36 = vmul.f32 %v7834_v60, %v2609_v20  ;;  %v10125_v60 = vld [vmem:[%s13994_s2 + $0x110] sm:$0xff]  }
 0x1bd   : > { %v2692_v52 = vpack.c.bf16 %v2675_v41, %v2674_v36  ;;  %v3044_v36 = vmul.f32 %v7877_v61, %v11116_v13  ;;  %v7882_v13 = vld [vmem:[%s13993_s1 + $0x780] sm:$0xff] }
 0x1be   : > { %v3049_v17 = vmul.f32 %v7882_v13, %v11152_v51 }
 0x1c1   : > { %9115 = vmatmul.mubr.msk.bf16.gmra.mrb[16].mxu0 %vm256_vm0, %v2687_v31  ;;  %v7836_v31 = vld [vmem:[%s13993_s1 + $0x6f0] sm:$0xff] }
 0x1c2   : > { %9118 = vmatprep.mubr.msk.bf16.mxu0 %vm256_vm0, %v2688_v42  ;;  %v7867_v42 = vld [vmem:[%s13993_s1 + $0x708] sm:$0xff]  ;;  %v2676_v27 = vmul.f32 %v7836_v31, %v11026_v62  ;;  %v7870_v62 = vld [vmem:[%s13993_s1 + $0x720] sm:$0xff]  ;;  %v7880_v31 = vld [vmem:[%s13993_s1 + $0x770] sm:$0xff] }
 0x1c3   : > { %v3034_v34 = vmul.f32 %v7867_v42, %v11047_v46  ;;  %v3035_v46 = vmul.f32 %v7868_v12, %v11049_v40  ;;  %v3037_v21 = vmul.f32 %v7870_v62, %v11059_v19  ;;  %v7874_v40 = vld [vmem:[%s13993_s1 + $0x740] sm:$0xff]  ;;  %v10124_v19 = vld [vmem:[%s13994_s2 + $0x108] sm:$0xff]   ;;  %v7888_v62 = vld [vmem:[%s13993_s1 + $0x7b0] sm:$0xff] }
 0x1c4   : > { %v2693_v53 = vpack.c.bf16 %v2677_v55, %v2676_v27  ;;  %v3041_v20 = vmul.f32 %v7874_v40, %v11085_v22  ;;  %v7878_v22 = vld [vmem:[%s13993_s1 + $0x760] sm:$0xff] }
 0x1c5   : > { %v3065_v48 = vpack.c.bf16 %v3034_v34, %v3033_v14  ;;  %v3066_v30 = vpack.c.bf16 %v3036_v38, %v3035_v46  ;;  %v3045_v41 = vmul.f32 %v7878_v22, %v11118_v10  ;;  %v7883_v10 = vld [vmem:[%s13993_s1 + $0x788] sm:$0xff]  ;;  %v7884_v14 = vld [vmem:[%s13993_s1 + $0x790] sm:$0xff]  ;;  %v7885_v34 = vld [vmem:[%s13993_s1 + $0x798] sm:$0xff] }
 0x1c6   : > { %v3069_v24 = vpack.c.bf16 %v3042_v54, %v3041_v20  ;;  %v3050_v42 = vmul.f32 %v7883_v10, %v11167_v56  ;;  %v3051_v51 = vmul.f32 %v7884_v14, %v11169_v57  ;;  %v3052_v56 = vmul.f32 %v7885_v34, %v11177_v11  ;;  %v7890_v57 = vld [vmem:[%s13993_s1 + $0x7c0] sm:$0xff]  ;;  %v7891_v11 = vld [vmem:[%s13993_s1 + $0x7c8] sm:$0xff]  ;;  %v7897_v20 = vld [vmem:[%s13993_s1 + $0x7f8] sm:$0xff] }
 0x1c7   : > { %v3057_v46 = vmul.f32 %v7890_v57, %v11205_v49  ;;  %v3058_v38 = vmul.f32 %v7891_v11, %v11219_v8  ;;  %v3356_v54 = vld [vmem:[#allocation2 + $0x21] sm:$0xff]  ;;  %v3357_v22 = vld [vmem:[#allocation2 + $0x29] sm:$0xff]  ;;  %v7937_v57 = vld [vmem:[%s13993_s1 + $0x858] sm:$0xff] }
 0x1c8   : > { %v3073_v55 = vpack.c.bf16 %v3050_v42, %v3049_v17  ;;  %v3074_v12 = vpack.c.bf16 %v3052_v56, %v3051_v51  ;;  %v7932_v42 = vld [vmem:[%s13993_s1 + $0x830] sm:$0xff]  ;;  %v3364_v14 = vld [vmem:[#allocation2 + $0x61] sm:$0xff]  ;;  %v3367_v11 = vld [vmem:[#allocation2 + $0x79] sm:$0xff] }
 0x1c9   : > { %9119 = vmatmul.mubr.msk.bf16.gmra.mrb[20].mxu0 %vm256_vm0, %v2689_v58  ;;  %v3038_v58 = vmul.f32 %v7871_v9, %v11073_v29  ;;  %v7889_v9 = vld [vmem:[%s13993_s1 + $0x7b8] sm:$0xff]  ;;  %v7934_v34 = vld [vmem:[%s13993_s1 + $0x840] sm:$0xff] }
 0x1ca   : > { %9122 = vmatprep.mubr.msk.bf16.mxu0 %vm256_vm0, %v2690_v2  ;;  %v7872_v2 = vld [vmem:[%s13993_s1 + $0x730] sm:$0xff] }
 0x1cb   : > { %v3067_v0 = vpack.c.bf16 %v3038_v58, %v3037_v21  ;;  %v3039_v29 = vmul.f32 %v7872_v2, %v11075_v35  ;;  %v7876_v35 = vld [vmem:[%s13993_s1 + $0x750] sm:$0xff]  ;;  %v3077_v58 = vpack.c.bf16 %v3058_v38, %v3057_v46  ;;  %v14134_v2 = vld [vmem:[#allocation15_spill] sm:$0xff]  ;;  %v7939_v46 = vld [vmem:[%s13993_s1 + $0x868] sm:$0xff] }
 0x1cc   : > { %v3043_v16 = vmul.f32 %v7876_v35, %v11108_v1  ;;  %v7881_v1 = vld [vmem:[%s13993_s1 + $0x778] sm:$0xff] }
 0x1cd   : > { %v3068_v63 = vpack.c.bf16 %v3040_v6, %v3039_v29  ;;  %v3048_v7 = vmul.f32 %v7881_v1, %v11150_v47  ;;  %v7887_v47 = vld [vmem:[%s13993_s1 + $0x7a8] sm:$0xff]  ;;  %v7896_v6 = vld [vmem:[%s13993_s1 + $0x7f0] sm:$0xff] }
 0x1d1   : > { %9123 = vmatmul.mubr.msk.bf16.gmra.mrb[24].mxu0 %vm256_vm0, %v2691_v45  ;;  %v3046_v45 = vmul.f32 %v7879_v43, %v11140_v28  ;;  %v3047_v28 = vmul.f32 %v7880_v31, %v11142_v37  ;;  %v7886_v37 = vld [vmem:[%s13993_s1 + $0x7a0] sm:$0xff]  ;;  %v3358_v43 = vld [vmem:[#allocation2 + $0x31] sm:$0xff] }
 0x1d2   : > { %9126 = vmatprep.mubr.msk.bf16.mxu0 %vm256_vm0, %v2692_v52  ;;  %v3070_v52 = vpack.c.bf16 %v3044_v36, %v3043_v16  ;;  %v7928_v16 = vld [vmem:[%s13993_s1 + $0x810] sm:$0xff]  ;;  %v7929_v36 = vld [vmem:[%s13993_s1 + $0x818] sm:$0xff] }
 0x1d3   : > { %v3071_v23 = vpack.c.bf16 %v3046_v45, %v3045_v41  ;;  %v3072_v27 = vpack.c.bf16 %v3048_v7, %v3047_v28  ;;  %v3359_v41 = vld [vmem:[#allocation2 + $0x39] sm:$0xff]  ;;  %v3360_v45 = vld [vmem:[#allocation2 + $0x41] sm:$0xff]  ;;  %v3423_v31 = vmul.f32 %v7929_v36, %v3358_v43  ;;  %v3361_v28 = vld [vmem:[#allocation2 + $0x49] sm:$0xff] }
 0x1d4   : > { %v3362_v7 = vld [vmem:[#allocation2 + $0x51] sm:$0xff]  ;;  %v7947_v43 = vld [vmem:[%s13993_s1 + $0x8a8] sm:$0xff] }
 0x1d9   : > { %9127 = vmatmul.mubr.msk.bf16.gmra.mrb[28].mxu0 %vm256_vm0, %v2693_v53  ;;  %v3053_v53 = vmul.f32 %v7886_v37, %v11179_v4  ;;  %v3055_v4 = vmul.f32 %v7888_v62, %v11195_v25  ;;  %v7894_v25 = vld [vmem:[%s13993_s1 + $0x7e0] sm:$0xff]  ;;  %v7935_v37 = vld [vmem:[%s13993_s1 + $0x848] sm:$0xff] }
 0x1da   : > { %9138 = vmatprep.mubr.msk.bf16.mxu0 %vm256_vm0, %v3065_v48  ;;  %v3054_v48 = vmul.f32 %v7887_v47, %v11193_v59  ;;  %v3056_v59 = vmul.f32 %v7889_v9, %v11203_v39  ;;  %v7895_v39 = vld [vmem:[%s13993_s1 + $0x7e8] sm:$0xff]  ;;  %v3061_v33 = vmul.f32 %v7894_v25, %v14134_v2  ;;  %v3426_v47 = vmul.f32 %v7932_v42, %v3361_v28  ;;  %v7936_v9 = vld [vmem:[%s13993_s1 + $0x850] sm:$0xff]  ;;  %v7941_v2 = vld [vmem:[%s13993_s1 + $0x878] sm:$0xff] }
 0x1db   : > { %v3062_v40 = vmul.f32 %v7895_v39, %v11245_v44  ;;  %v7927_v44 = vld [vmem:[%s13993_s1 + $0x808] sm:$0xff]  ;;  %v3370_v39 = vld [vmem:[#allocation2 + $0x91] sm:$0xff]  ;;  %v7950_v28 = vld [vmem:[%s13993_s1 + $0x8c0] sm:$0xff] }
 0x1dc   : > { %v3075_v15 = vpack.c.bf16 %v3054_v48, %v3053_v53  ;;  %v3076_v21 = vpack.c.bf16 %v3056_v59, %v3055_v4  ;;  %v3421_v35 = vmul.f32 %v7927_v44, %v3356_v54  ;;  %v3429_v53 = vmul.f32 %v7935_v37, %v3364_v14  ;;  %v3368_v4 = vld [vmem:[#allocation2 + $0x81] sm:$0xff]  ;;  %v3369_v25 = vld [vmem:[#allocation2 + $0x89] sm:$0xff]  ;;  %v3374_v44 = vld [vmem:[#allocation2 + $0xb1] sm:$0xff] }
 0x1dd   : > { %v3079_v29 = vpack.c.bf16 %v3062_v40, %v3061_v33  ;;  %v7938_v59 = vld [vmem:[%s13993_s1 + $0x860] sm:$0xff]  ;;  %v3382_v37 = vld [vmem:[#allocation2 + $0xf1] sm:$0xff] }
 0x1de   : > { %v3371_v33 = vld [vmem:[#allocation2 + $0x99] sm:$0xff]  ;;  %v3372_v40 = vld [vmem:[#allocation2 + $0xa1] sm:$0xff] }
 0x1e1   : > { %9139 = vmatmul.mubr.msk.bf16.vlgmr.msra.gmra.mrb[0].mxu0 %vm256_vm0, %v3066_v30  ;;  %v7892_v30 = vld [vmem:[%s13993_s1 + $0x7d0] sm:$0xff] }
 0x1e2   : > { %9171 = vmatpush3.bf16.msra.mxu0 %v11482_v26  ;;  %9142 = vmatprep.mubr.msk.bf16.mxu0 %vm256_vm0, %v3067_v0  ;;  %v10126_v26 = vld [vmem:[%s13994_s2 + $0x118] sm:$0xff]   ;;  %v3059_v49 = vmul.f32 %v7892_v30, %v11221_v5  ;;  %v3433_v30 = vmul.f32 %v7939_v46, %v3368_v4 }
 0x1e3   : > { %9172 = vmatprep.subr.bf16.mxu0 %v10124_v19  ;;  %v7893_v0 = vld [vmem:[%s13993_s1 + $0x7d8] sm:$0xff] }
 0x1e4   : > { %v3060_v8 = vmul.f32 %v7893_v0, %v11229_v32  ;;  %v3355_v5 = vld [vmem:[#allocation2 + $0x19] sm:$0xff]  ;;  %v3386_v46 = vld [vmem:[#allocation2 + $0x111] sm:$0xff] }
 0x1e5   : > { %v7926_v32 = vld [vmem:[%s13993_s1 + $0x800] sm:$0xff] }
 0x1e6   : > { %9173 = vmatpush3.bf16.msra.mxu0 %v10124_v19  ;;  %v3078_v18 = vpack.c.bf16 %v3060_v8, %v3059_v49  ;;  %v2999_v19 = vld [vmem:[#allocation2 + $0x110] sm:$0xff] }
 0x1e7   : > { %9174 = vmatprep.subr.bf16.mxu0 %v10125_v60  ;;  %v7940_v8 = vld [vmem:[%s13993_s1 + $0x870] sm:$0xff] }
 0x1e9   : > { %9143 = vmatmul.mubr.msk.bf16.gmra.mrb[4].mxu0 %vm256_vm0, %v3068_v63  ;;  %v3064_v63 = vmul.f32 %v7897_v20, %v2999_v19  ;;  %v7943_v19 = vld [vmem:[%s13993_s1 + $0x888] sm:$0xff] }
 0x1ea   : > { %9146 = vmatprep.mubr.msk.bf16.mxu0 %vm256_vm0, %v3069_v24  ;;  %9175 = vmatpush3.bf16.msra.mxu0 %v10125_v60  ;;  %v3063_v60 = vmul.f32 %v7896_v6, %v11247_v3  ;;  %v3420_v24 = vmul.f32 %v7926_v32, %v3355_v5  ;;  %v7930_v3 = vld [vmem:[%s13993_s1 + $0x820] sm:$0xff]  ;;  %v3435_v6 = vmul.f32 %v7941_v2, %v3370_v39  ;;  %v3373_v32 = vld [vmem:[#allocation2 + $0xa9] sm:$0xff] }
 0x1eb   : > { %9176 = vmatprep.subr.bf16.mxu0 %v10126_v26  ;;  %v3424_v1 = vmul.f32 %v7930_v3, %v3359_v41  ;;  %v3437_v5 = vmul.f32 %v7943_v19, %v3372_v40  ;;  %v3377_v3 = vld [vmem:[#allocation2 + $0xc9] sm:$0xff]  ;;  %v11838_v2 = vld [vmem:[%s13995_s3] ss:$0 sm:$0xff] }
 0x1ec   : > { %v3080_v61 = vpack.c.bf16 %v3064_v63, %v3063_v60  ;;  %v7944_v63 = vld [vmem:[%s13993_s1 + $0x890] sm:$0xff]  ;;  %v10128_v39 = vld [vmem:[%s13996_s4 + $0x28] sm:$0xff]  }
 0x1ee   : > { %9177 = vmatpush3.bf16.msra.mxu0 %v10126_v26  ;;  %v3452_v26 = vpack.c.bf16 %v3421_v35, %v3420_v24  ;;  %v7945_v24 = vld [vmem:[%s13993_s1 + $0x898] sm:$0xff] }
 0x1ef   : > { %v3375_v35 = vld [vmem:[#allocation2 + $0xb9] sm:$0xff] }
 0x1f1   : > { %9147 = vmatmul.mubr.msk.bf16.gmra.mrb[8].mxu0 %vm256_vm0, %v3070_v52  ;;  %v7931_v52 = vld [vmem:[%s13993_s1 + $0x828] sm:$0xff] }
 0x1f2   : > { %9150 = vmatprep.mubr.msk.bf16.mxu0 %vm256_vm0, %v3071_v23  ;;  %v3422_v23 = vmul.f32 %v7928_v16, %v3357_v22  ;;  %v3425_v13 = vmul.f32 %v7931_v52, %v3360_v45  ;;  %v7946_v22 = vld [vmem:[%s13993_s1 + $0x8a0] sm:$0xff]  ;;  %v3439_v16 = vmul.f32 %v7945_v24, %v3374_v44  ;;  %v3378_v52 = vld [vmem:[#allocation2 + $0xd1] sm:$0xff] }
 0x1f3   : > { %v3440_v36 = vmul.f32 %v7946_v22, %v3375_v35  ;;  %v7987_v22 = vld [vmem:[%s13993_s1 + $0x100] sm:$0xff] }
 0x1f4   : > { %v3453_v10 = vpack.c.bf16 %v3423_v31, %v3422_v23  ;;  %v3454_v17 = vpack.c.bf16 %v3425_v13, %v3424_v1  ;;  %v7948_v31 = vld [vmem:[%s13993_s1 + $0x8b0] sm:$0xff]  ;;  %v7949_v1 = vld [vmem:[%s13993_s1 + $0x8b8] sm:$0xff] }
 0x1f5   : > { %v3379_v13 = vld [vmem:[#allocation2 + $0xd9] sm:$0xff]  ;;  %v3443_v42 = vmul.f32 %v7949_v1, %v3378_v52 }
 0x1f9   : > { %9151 = vmatmul.mubr.msk.bf16.gmra.mrb[12].mxu0 %vm256_vm0, %v3072_v27  ;;  %v7933_v27 = vld [vmem:[%s13993_s1 + $0x838] sm:$0xff] }
 0x1fa   : > { %9154 = vmatprep.mubr.msk.bf16.mxu0 %vm256_vm0, %v3073_v55  ;;  %v3363_v55 = vld [vmem:[#allocation2 + $0x59] sm:$0xff]  ;;  %v3427_v51 = vmul.f32 %v7933_v27, %v3362_v7  ;;  %v7951_v7 = vld [vmem:[%s13993_s1 + $0x8c8] sm:$0xff]  ;;  %v3444_v27 = vmul.f32 %v7950_v28, %v3379_v13  ;;  %v7989_v28 = vld [vmem:[%s13993_s1 + $0x110] sm:$0xff] }
 0x1fb   : > { %v3428_v56 = vmul.f32 %v7934_v34, %v3363_v55  ;;  %v3381_v34 = vld [vmem:[#allocation2 + $0xe9] sm:$0xff] }
 0x1fc   : > { %v3455_v48 = vpack.c.bf16 %v3427_v51, %v3426_v47  ;;  %v7952_v51 = vld [vmem:[%s13993_s1 + $0x8d0] sm:$0xff] }
 0x1fd   : > { %v3456_v62 = vpack.c.bf16 %v3429_v53, %v3428_v56  ;;  %v7953_v56 = vld [vmem:[%s13993_s1 + $0x8d8] sm:$0xff] }
 0x1fe   : > { %v3383_v53 = vld [vmem:[#allocation2 + $0xf9] sm:$0xff] }
 0x201   : > { %9155 = vmatmul.mubr.msk.bf16.gmra.mrb[16].mxu0 %vm256_vm0, %v3074_v12  ;;  %v3365_v12 = vld [vmem:[#allocation2 + $0x69] sm:$0xff] }
 0x202   : > { %9158 = vmatprep.mubr.msk.bf16.mxu0 %vm256_vm0, %v3075_v15  ;;  %v3366_v15 = vld [vmem:[#allocation2 + $0x71] sm:$0xff]  ;;  %v3430_v38 = vmul.f32 %v7936_v9, %v3365_v12  ;;  %v7954_v12 = vld [vmem:[%s13993_s1 + $0x8e0] sm:$0xff]  ;;  %v3447_v9 = vmul.f32 %v7953_v56, %v3382_v37 }
 0x209   : > { %9159 = vmatmul.mubr.msk.bf16.gmra.mrb[20].mxu0 %vm256_vm0, %v3076_v21  ;;  %v3431_v21 = vmul.f32 %v7937_v57, %v3366_v15  ;;  %v7955_v15 = vld [vmem:[%s13993_s1 + $0x8e8] sm:$0xff]  ;;  %v3448_v57 = vmul.f32 %v7954_v12, %v3383_v53 }
 0x20a   : > { %9162 = vmatprep.mubr.msk.bf16.mxu0 %vm256_vm0, %v3077_v58  ;;  %v3432_v58 = vmul.f32 %v7938_v59, %v3367_v11 }
 0x20b   : > { %v3457_v0 = vpack.c.bf16 %v3431_v21, %v3430_v38  ;;  %v7956_v38 = vld [vmem:[%s13993_s1 + $0x8f0] sm:$0xff]  ;;  %v7957_v21 = vld [vmem:[%s13993_s1 + $0x8f8] sm:$0xff] }
 0x20c   : > { %v3458_v49 = vpack.c.bf16 %v3433_v30, %v3432_v58  ;;  %v3450_v58 = vmul.f32 %v7956_v38, %v11409_v50  ;;  %v3451_v30 = vmul.f32 %v7957_v21, %v3386_v46  ;;  %v10129_v50 = vld [vmem:[%s13996_s4 + $0x30] sm:$0xff]  }
 0x20d   : > { %v8129_v38 = vld [vmem:[%s13993_s1 + $0x310] sm:$0xff] }
 0x211   : > { %9163 = vmatmul.mubr.msk.bf16.gmra.mrb[24].mxu0 %vm256_vm0, %v3078_v18  ;;  %v7942_v18 = vld [vmem:[%s13993_s1 + $0x880] sm:$0xff] }
 0x212   : > { %9166 = vmatprep.mubr.msk.bf16.mxu0 %vm256_vm0, %v3079_v29  ;;  %v3434_v29 = vmul.f32 %v7940_v8, %v3369_v25  ;;  %v3436_v20 = vmul.f32 %v7942_v18, %v3371_v33  ;;  %v10127_v25 = vld [vmem:[%s13996_s4 + $0x20] sm:$0xff]  }
 0x213   : > { %9210 = vmatprep.subr.bf16.mxu1 %v10127_v25  ;;  %v11832_v8 = vld [vmem:[%s13996_s4] sm:$0xff]  }
 0x214   : > { %v3459_v54 = vpack.c.bf16 %v3435_v6, %v3434_v29  ;;  %v3460_v60 = vpack.c.bf16 %v3437_v5, %v3436_v20  ;;  %9211 = vmatpush3.bf16.msra.mxu1 %v10127_v25  ;;  %v7991_v25 = vld [vmem:[%s13993_s1 + $0x120] sm:$0xff] }
 0x215   : > { %9212 = vmatprep.subr.bf16.mxu1 %v10128_v39 }
 0x218   : > { %9213 = vmatpush3.bf16.msra.mxu1 %v10128_v39  ;;  %v7992_v39 = vld [vmem:[%s13993_s1 + $0x128] sm:$0xff] }
 0x219   : > { %9167 = vmatmul.mubr.msk.bf16.gmra.mrb[28].mxu0 %vm256_vm0, %v3080_v61  ;;  %v3376_v61 = vld [vmem:[#allocation2 + $0xc1] sm:$0xff]  ;;  %9214 = vmatprep.subr.bf16.mxu1 %v10129_v50 }
 0x21a   : > { %9178 = vmatprep.mubr.msk.bf16.mxu0 %vm256_vm0, %v3452_v26  ;;  %v3438_v26 = vmul.f32 %v7944_v63, %v3373_v32  ;;  %v3441_v41 = vmul.f32 %v7947_v43, %v3376_v61  ;;  %v3965_v61 = vld [vmem:[#allocation2 + $0x8] sm:$0xff] }
 0x21c   : > { %v3461_v45 = vpack.c.bf16 %v3439_v16, %v3438_v26  ;;  %v3462_v23 = vpack.c.bf16 %v3441_v41, %v3440_v36  ;;  %9215 = vmatpush3.bf16.msra.mxu1 %v10129_v50 }
 0x221   : > { %9179 = vmatmul.mubr.msk.bf16.vlgmr.msra.gmra.mrb[0].mxu0 %vm256_vm0, %v3453_v10  ;;  %v3380_v10 = vld [vmem:[#allocation2 + $0xe1] sm:$0xff] }
 0x222   : > { %9182 = vmatprep.mubr.msk.bf16.mxu0 %vm256_vm0, %v3454_v17  ;;  %v3442_v17 = vmul.f32 %v7948_v31, %v3377_v3  ;;  %v3445_v55 = vmul.f32 %v7951_v7, %v3380_v10  ;;  %v7990_v31 = vld [vmem:[%s13993_s1 + $0x118] sm:$0xff] }
 0x224   : > { %v3463_v14 = vpack.c.bf16 %v3443_v42, %v3442_v17  ;;  %v3464_v47 = vpack.c.bf16 %v3445_v55, %v3444_v27  ;;  %v8127_v42 = vld [vmem:[%s13993_s1 + $0x300] sm:$0xff]  ;;  %v8128_v27 = vld [vmem:[%s13993_s1 + $0x308] sm:$0xff] }
 0x229   : > { %9183 = vmatmul.mubr.msk.bf16.gmra.mrb[4].mxu0 %vm256_vm0, %v3455_v48  ;;  %v3384_v48 = vld [vmem:[#allocation2 + $0x101] sm:$0xff] }
 0x22a   : > { %9186 = vmatprep.mubr.msk.bf16.mxu0 %vm256_vm0, %v3456_v62  ;;  %v3446_v62 = vmul.f32 %v7952_v51, %v3381_v34  ;;  %v3449_v11 = vmul.f32 %v7955_v15, %v3384_v48  ;;  %v8130_v48 = vld [vmem:[%s13993_s1 + $0x318] sm:$0xff] }
 0x22c   : > { %v3465_v4 = vpack.c.bf16 %v3447_v9, %v3446_v62  ;;  %v3466_v59 = vpack.c.bf16 %v3449_v11, %v3448_v57  ;;  %v10132_v11 = vld [vmem:[%s13996_s4 + $0x8] sm:$0xff]  }
 0x231   : > { %9187 = vmatmul.mubr.msk.bf16.gmra.mrb[8].mxu0 %vm256_vm0, %v3457_v0  ;;  %v3467_v0 = vpack.c.bf16 %v3451_v30, %v3450_v58 }
 0x232   : > { %9190 = vmatprep.mubr.msk.bf16.mxu0 %vm256_vm0, %v3458_v49  ;;  %v10130_v49 = vld [vmem:[%s13996_s4 + $0x38] sm:$0xff]  }
 0x233   : > { %9216 = vmatprep.subr.bf16.mxu1 %v10130_v49 }
 0x234   : > { %9217 = vmatpush3.bf16.msra.mxu1 %v10130_v49 }
 0x235   : > { %9250 = vmatprep.subr.bf16.mxu1 %v11832_v8 }
 0x239   : > { %9191 = vmatmul.mubr.msk.bf16.gmra.mrb[12].mxu0 %vm256_vm0, %v3459_v54 }
 0x23a   : > { %9194 = vmatprep.mubr.msk.bf16.mxu0 %vm256_vm0, %v3460_v60 }
 0x241   : > { %9195 = vmatmul.mubr.msk.bf16.gmra.mrb[16].mxu0 %vm256_vm0, %v3461_v45  ;;  %v7988_v45 = vld [vmem:[%s13993_s1 + $0x108] sm:$0xff] }
 0x242   : > { %9198 = vmatprep.mubr.msk.bf16.mxu0 %vm256_vm0, %v3462_v23  ;;  %v4029_v23 = vmul.f32 %v7987_v22, %v3965_v61 }
 0x249   : > { %9199 = vmatmul.mubr.msk.bf16.gmra.mrb[20].mxu0 %vm256_vm0, %v3463_v14 }
 0x24a   : > { %9202 = vmatprep.mubr.msk.bf16.mxu0 %vm256_vm0, %v3464_v47 }
 0x251   : > { %9203 = vmatmul.mubr.msk.bf16.gmra.mrb[24].mxu0 %vm256_vm0, %v3465_v4 }
 0x252   : > { %9206 = vmatprep.mubr.msk.bf16.mxu0 %vm256_vm0, %v3466_v59 }
 0x259   : > { %9207 = vmatmul.mubr.msk.bf16.gmra.mrb[28].mxu0 %vm256_vm0, %v3467_v0 }
 0x2f4   : > { %v9180_v33 = vpop.f32.mrb[0].mxu0 }
 0x2f5   : > { %v3751_v40 = vadd.f32 %v9180_v33, %v11838_v2  ;;  %v3583_v18 = vpop.f32.mrb[1].mxu0 }
 0x2f6   : > { %v3749_v19 = vadd.f32 %v11838_v2, %v3583_v18  ;;  %v9181_v29 = vpop.f32.mrb[2].mxu0 }
 0x2f7   : > { %v3783_v6 = vmax.f32 %v3751_v40, 0.0  ;;  %v3752_v20 = vadd.f32 %v9181_v29, %v11838_v2  ;;  %v3586_v5 = vpop.f32.mrb[3].mxu0  ;;  %v7994_v40 = vld [vmem:[%s13993_s1 + $0x138] sm:$0xff] }
 0x2f8   : > { %v3781_v54 = vmax.f32 %v3749_v19, 0.0  ;;  %v3750_v32 = vadd.f32 %v11838_v2, %v3586_v5 }
 0x2f9   : > { %3815 = vst.msk [vmem:[#allocation2 + $0x20] sm:$0xff] %vm256_vm0, %v3783_v6  ;;  %v3784_v44 = vmax.f32 %v3752_v20, 0.0  ;;  %v7993_v20 = vld [vmem:[%s13993_s1 + $0x130] sm:$0xff] }
 0x2fa   : > { %3813 = vst.msk [vmem:[#allocation2 + $0x10] sm:$0xff] %vm256_vm0, %v3781_v54  ;;  %v3782_v60 = vmax.f32 %v3750_v32, 0.0 }
 0x2fb   : > { %3816 = vst.msk [vmem:[#allocation2 + $0x28] sm:$0xff] %vm256_vm0, %v3784_v44 }
 0x2fc   : > { %3814 = vst.msk [vmem:[#allocation2 + $0x18] sm:$0xff] %vm256_vm0, %v3782_v60  ;;  %v9184_v63 = vpop.f32.mrb[4].mxu0  ;;  %v10133_v60 = vld [vmem:[%s13996_s4 + $0x10] sm:$0xff]  }
 0x2fd   : > { %v3755_v24 = vadd.f32 %v9184_v63, %v11838_v2  ;;  %v3599_v35 = vpop.f32.mrb[5].mxu0 }
 0x2fe   : > { %v3753_v43 = vadd.f32 %v11838_v2, %v3599_v35  ;;  %v9185_v26 = vpop.f32.mrb[6].mxu0 }
 0x2ff   : > { %v3787_v16 = vmax.f32 %v3755_v24, 0.0  ;;  %v3756_v36 = vadd.f32 %v9185_v26, %v11838_v2  ;;  %v3602_v41 = vpop.f32.mrb[7].mxu0  ;;  %v8132_v26 = vld [vmem:[%s13993_s1 + $0x328] sm:$0xff] }
 0x300   : > { %v3785_v3 = vmax.f32 %v3753_v43, 0.0  ;;  %v3754_v52 = vadd.f32 %v11838_v2, %v3602_v41  ;;  %v3968_v10 = vld [vmem:[#allocation2 + $0x20] sm:$0xff] }
 0x301   : > { %3819 = vst.msk [vmem:[#allocation2 + $0x40] sm:$0xff] %vm256_vm0, %v3787_v16  ;;  %v3788_v1 = vmax.f32 %v3756_v36, 0.0  ;;  %v3966_v13 = vld [vmem:[#allocation2 + $0x10] sm:$0xff]  ;;  %v4032_v56 = vmul.f32 %v7990_v31, %v3968_v10  ;;  %v8131_v43 = vld [vmem:[%s13993_s1 + $0x320] sm:$0xff]  ;;  %v8134_v16 = vld [vmem:[%s13993_s1 + $0x338] sm:$0xff] }
 0x302   : > { %3817 = vst.msk [vmem:[#allocation2 + $0x30] sm:$0xff] %vm256_vm0, %v3785_v3  ;;  %v3786_v7 = vmax.f32 %v3754_v52, 0.0  ;;  %v4030_v17 = vmul.f32 %v7988_v45, %v3966_v13  ;;  %v11873_v14 = vld [vmem:[#allocation2 + $0xf] sm:$0xff]  ;;  %v11878_v53 = vld [vmem:[#allocation2 + $0x27] sm:$0xff]  ;;  %v10134_v45 = vld [vmem:[%s13996_s4 + $0x18] sm:$0xff]  }
 0x303   : > { %3820 = vst.msk [vmem:[#allocation2 + $0x48] sm:$0xff] %vm256_vm0, %v3788_v1  ;;  %v3967_v55 = vld [vmem:[#allocation2 + $0x18] sm:$0xff]  ;;  %v11892_v59 = vmul.f32 %v8127_v42, %v11873_v14  ;;  %v3969_v0 = vld [vmem:[#allocation2 + $0x28] sm:$0xff]  ;;  %v11908_v50 = vmul.f32 %v8130_v48, %v11878_v53  ;;  %v8133_v52 = vld [vmem:[%s13993_s1 + $0x330] sm:$0xff] }
 0x304   : > { %v11875_v34 = vld [vmem:[#allocation2 + $0x17] sm:$0xff]  ;;  %3818 = vst.msk [vmem:[#allocation2 + $0x38] sm:$0xff] %vm256_vm0, %v3786_v7  ;;  %v9188_v37 = vpop.f32.mrb[8].mxu0  ;;  %v4061_v47 = vpack.c.bf16 %v4030_v17, %v4029_v23  ;;  %v4031_v51 = vmul.f32 %v7989_v28, %v3967_v55  ;;  %v11889_v4 = vld [vmem:[#allocation2 + $0x1f] sm:$0xff]  ;;  %v4033_v32 = vmul.f32 %v7991_v25, %v3969_v0 }
 0x305   : > { %v3759_v12 = vadd.f32 %v9188_v37, %v11838_v2  ;;  %v3615_v15 = vpop.f32.mrb[9].mxu0  ;;  %14135 = vst [vmem:[#allocation3_spill] sm:$0xff] %v11892_v59  ;;  %v11895_v46 = vmul.f32 %v8128_v27, %v11875_v34  ;;  %14137 = vst [vmem:[#allocation5_spill] sm:$0xff] %v11908_v50  ;;  %v11923_v5 = vmul.f32 %v8129_v38, %v11889_v4  ;;  %v7995_v55 = vld [vmem:[%s13993_s1 + $0x140] sm:$0xff]  ;;  %v7996_v37 = vld [vmem:[%s13993_s1 + $0x148] sm:$0xff] }
 0x306   : > { %v3757_v62 = vadd.f32 %v11838_v2, %v3615_v15  ;;  %v9189_v9 = vpop.f32.mrb[10].mxu0  ;;  %9218 = vmatprep.mubr.msk.bf16.mxu1 %vm256_vm0, %v4061_v47  ;;  %v4062_v57 = vpack.c.bf16 %v4032_v56, %v4031_v51  ;;  %v7998_v56 = vld [vmem:[%s13993_s1 + $0x158] sm:$0xff]  ;;  %v11991_v0 = vld [vmem:[%s13996_s4 + $0x40] sm:$0xff]   ;;  %v8268_v59 = vld [vmem:[%s13993_s1 + $0x5a8] sm:$0xff] }
 0x307   : > { %14136 = vst [vmem:[#allocation4_spill] sm:$0xff] %v11895_v46  ;;  %v3791_v21 = vmax.f32 %v3759_v12, 0.0  ;;  %v3760_v58 = vadd.f32 %v9189_v9, %v11838_v2  ;;  %v3618_v30 = vpop.f32.mrb[11].mxu0  ;;  %14138 = vst [vmem:[#allocation6_spill] sm:$0xff] %v11923_v5  ;;  %v7997_v9 = vld [vmem:[%s13993_s1 + $0x150] sm:$0xff] }
 0x308   : > { %v3789_v49 = vmax.f32 %v3757_v62, 0.0  ;;  %v3758_v33 = vadd.f32 %v11838_v2, %v3618_v30  ;;  %9219 = vmatmul.mubr.msk.bf16.vlgmr.msra.gmra.mrb[0].mxu1 %vm256_vm0, %v4062_v57  ;;  %v3972_v6 = vld [vmem:[#allocation2 + $0x40] sm:$0xff] }
 0x309   : > { %3823 = vst.msk [vmem:[#allocation2 + $0x60] sm:$0xff] %vm256_vm0, %v3791_v21  ;;  %v3792_v19 = vmax.f32 %v3760_v58, 0.0  ;;  %9251 = vmatpush3.bf16.msra.mxu1 %v11832_v8  ;;  %v3970_v29 = vld [vmem:[#allocation2 + $0x30] sm:$0xff]  ;;  %v4036_v22 = vmul.f32 %v7994_v40, %v3972_v6 }
 0x30a   : > { %3821 = vst.msk [vmem:[#allocation2 + $0x50] sm:$0xff] %vm256_vm0, %v3789_v49  ;;  %v3790_v54 = vmax.f32 %v3758_v33, 0.0  ;;  %v4034_v44 = vmul.f32 %v7992_v39, %v3970_v29  ;;  %9252 = vmatprep.subr.bf16.mxu1 %v10132_v11  ;;  %v11953_v13 = vld [vmem:[#allocation2 + $0x2f] sm:$0xff]  ;;  %v11957_v28 = vld [vmem:[#allocation2 + $0x47] sm:$0xff]  ;;  %v8150_v39 = vld [vmem:[%s13993_s1 + $0x3b8] sm:$0xff] }
 0x30b   : > { %3824 = vst.msk [vmem:[#allocation2 + $0x68] sm:$0xff] %vm256_vm0, %v3792_v19  ;;  %v3971_v8 = vld [vmem:[#allocation2 + $0x38] sm:$0xff]  ;;  %v3973_v27 = vld [vmem:[#allocation2 + $0x48] sm:$0xff]  ;;  %v11979_v57 = vmul.f32 %v8131_v43, %v11953_v13  ;;  %v11985_v38 = vmul.f32 %v8134_v16, %v11957_v28  ;;  %v7999_v16 = vld [vmem:[%s13993_s1 + $0x160] sm:$0xff] }
 0x30c   : > { %3822 = vst.msk [vmem:[#allocation2 + $0x58] sm:$0xff] %vm256_vm0, %v3790_v54  ;;  %v9192_v24 = vpop.f32.mrb[12].mxu0  ;;  %v4063_v35 = vpack.c.bf16 %v4034_v44, %v4033_v32  ;;  %v4035_v61 = vmul.f32 %v7993_v20, %v3971_v8  ;;  %v11946_v3 = vld [vmem:[#allocation2 + $0x37] sm:$0xff]  ;;  %v11955_v10 = vld [vmem:[#allocation2 + $0x3f] sm:$0xff]  ;;  %v4037_v58 = vmul.f32 %v7995_v55, %v3973_v27 }
 0x30d   : > { %v3763_v36 = vadd.f32 %v9192_v24, %v11838_v2  ;;  %v3631_v41 = vpop.f32.mrb[13].mxu0  ;;  %9253 = vmatpush3.bf16.msra.mxu1 %v10132_v11  ;;  %v11972_v48 = vmul.f32 %v8132_v26, %v11946_v3  ;;  %14140 = vst [vmem:[#allocation8_spill] sm:$0xff] %v11979_v57  ;;  %v11982_v11 = vmul.f32 %v8133_v52, %v11955_v10  ;;  %14142 = vst [vmem:[#allocation10_spill] sm:$0xff] %v11985_v38  ;;  %v8135_v54 = vld [vmem:[%s13993_s1 + $0x340] sm:$0xff]  ;;  %v8001_v52 = vld [vmem:[%s13993_s1 + $0x170] sm:$0xff] }
 0x30e   : > { %v3761_v23 = vadd.f32 %v11838_v2, %v3631_v41  ;;  %v9193_v31 = vpop.f32.mrb[14].mxu0  ;;  %9222 = vmatprep.mubr.msk.bf16.mxu1 %vm256_vm0, %v4063_v35  ;;  %v4064_v1 = vpack.c.bf16 %v4036_v22, %v4035_v61  ;;  %9254 = vmatprep.subr.bf16.mxu1 %v10133_v60  ;;  %v8136_v35 = vld [vmem:[%s13993_s1 + $0x348] sm:$0xff]  ;;  %v8265_v38 = vld [vmem:[%s13993_s1 + $0x590] sm:$0xff] }
 0x30f   : > { %v3795_v7 = vmax.f32 %v3763_v36, 0.0  ;;  %v3764_v17 = vadd.f32 %v9193_v31, %v11838_v2  ;;  %v3634_v42 = vpop.f32.mrb[15].mxu0  ;;  %14139 = vst [vmem:[#allocation7_spill] sm:$0xff] %v11972_v48  ;;  %14141 = vst [vmem:[#allocation9_spill] sm:$0xff] %v11982_v11  ;;  %v8000_v36 = vld [vmem:[%s13993_s1 + $0x168] sm:$0xff]  ;;  %v8137_v31 = vld [vmem:[%s13993_s1 + $0x350] sm:$0xff] }
 0x310   : > { %v3793_v47 = vmax.f32 %v3761_v23, 0.0  ;;  %v3762_v51 = vadd.f32 %v11838_v2, %v3634_v42  ;;  %9223 = vmatmul.mubr.msk.bf16.gmra.mrb[4].mxu1 %vm256_vm0, %v4064_v1  ;;  %v3976_v62 = vld [vmem:[#allocation2 + $0x60] sm:$0xff]  ;;  %v8002_v23 = vld [vmem:[%s13993_s1 + $0x178] sm:$0xff] }
 0x311   : > { %3827 = vst.msk [vmem:[#allocation2 + $0x80] sm:$0xff] %vm256_vm0, %v3795_v7  ;;  %v3796_v12 = vmax.f32 %v3764_v17, 0.0  ;;  %v3974_v15 = vld [vmem:[#allocation2 + $0x50] sm:$0xff]  ;;  %9255 = vmatpush3.bf16.msra.mxu1 %v10133_v60  ;;  %v4040_v29 = vmul.f32 %v7998_v56, %v3976_v62  ;;  %v8138_v62 = vld [vmem:[%s13993_s1 + $0x358] sm:$0xff] }
 0x312   : > { %3825 = vst.msk [vmem:[#allocation2 + $0x70] sm:$0xff] %vm256_vm0, %v3793_v47  ;;  %v3794_v21 = vmax.f32 %v3762_v51, 0.0  ;;  %v4038_v30 = vmul.f32 %v7996_v37, %v3974_v15  ;;  %9256 = vmatprep.subr.bf16.mxu1 %v10134_v45  ;;  %v12006_v8 = vld [vmem:[#allocation2 + $0x4f] sm:$0xff] }
 0x313   : > { %3828 = vst.msk [vmem:[#allocation2 + $0x88] sm:$0xff] %vm256_vm0, %v3796_v12  ;;  %v3975_v25 = vld [vmem:[#allocation2 + $0x58] sm:$0xff]  ;;  %v3977_v26 = vld [vmem:[#allocation2 + $0x68] sm:$0xff]  ;;  %v12035_v27 = vmul.f32 %v8135_v54, %v12006_v8 }
 0x314   : > { %3826 = vst.msk [vmem:[#allocation2 + $0x78] sm:$0xff] %vm256_vm0, %v3794_v21  ;;  %v9196_v33 = vpop.f32.mrb[16].mxu0  ;;  %v4065_v40 = vpack.c.bf16 %v4038_v30, %v4037_v58  ;;  %v4039_v19 = vmul.f32 %v7997_v9, %v3975_v25  ;;  %v12008_v24 = vld [vmem:[#allocation2 + $0x57] sm:$0xff]  ;;  %v12032_v42 = vld [vmem:[#allocation2 + $0x5f] sm:$0xff]  ;;  %v4041_v47 = vmul.f32 %v7999_v16, %v3977_v26  ;;  %v12042_v12 = vld [vmem:[#allocation2 + $0x67] sm:$0xff] }
 0x315   : > { %v3767_v6 = vadd.f32 %v9196_v33, %v11838_v2  ;;  %v3647_v20 = vpop.f32.mrb[17].mxu0  ;;  %9257 = vmatpush3.bf16.msra.mxu1 %v10134_v45  ;;  %14143 = vst [vmem:[#allocation11_spill] sm:$0xff] %v12035_v27  ;;  %v12038_v55 = vmul.f32 %v8136_v35, %v12008_v24  ;;  %v12051_v25 = vmul.f32 %v8137_v31, %v12032_v42 }
 0x316   : > { %v3765_v32 = vadd.f32 %v11838_v2, %v3647_v20  ;;  %v9197_v44 = vpop.f32.mrb[18].mxu0  ;;  %9226 = vmatprep.mubr.msk.bf16.mxu1 %vm256_vm0, %v4065_v40  ;;  %v4066_v60 = vpack.c.bf16 %v4040_v29, %v4039_v19  ;;  %9290 = vmatprep.subr.bf16.mxu1 %v11991_v0  ;;  %v8003_v19 = vld [vmem:[%s13993_s1 + $0x180] sm:$0xff]  ;;  %v8004_v29 = vld [vmem:[%s13993_s1 + $0x188] sm:$0xff]  ;;  %v12070_v35 = vmul.f32 %v8138_v62, %v12042_v12 }
 0x317   : > { %v3799_v61 = vmax.f32 %v3767_v6, 0.0  ;;  %v3768_v22 = vadd.f32 %v9197_v44, %v11838_v2  ;;  %v3650_v43 = vpop.f32.mrb[19].mxu0  ;;  %14144 = vst [vmem:[#allocation12_spill] sm:$0xff] %v12038_v55  ;;  %14145 = vst [vmem:[#allocation13_spill] sm:$0xff] %v12051_v25  ;;  %v8139_v6 = vld [vmem:[%s13993_s1 + $0x360] sm:$0xff] }
 0x318   : > { %v3797_v41 = vmax.f32 %v3765_v32, 0.0  ;;  %v3766_v45 = vadd.f32 %v11838_v2, %v3650_v43  ;;  %9227 = vmatmul.mubr.msk.bf16.gmra.mrb[8].mxu1 %vm256_vm0, %v4066_v60  ;;  %v3980_v17 = vld [vmem:[#allocation2 + $0x80] sm:$0xff]  ;;  %14146 = vst [vmem:[#allocation14_spill] sm:$0xff] %v12070_v35  ;;  %v8262_v35 = vld [vmem:[%s13993_s1 + $0x578] sm:$0xff] }
 0x319   : > { %3831 = vst.msk [vmem:[#allocation2 + $0xa0] sm:$0xff] %vm256_vm0, %v3799_v61  ;;  %v3800_v1 = vmax.f32 %v3768_v22, 0.0  ;;  %v3978_v7 = vld [vmem:[#allocation2 + $0x70] sm:$0xff]  ;;  %v4044_v30 = vmul.f32 %v8002_v23, %v3980_v17  ;;  %v8140_v61 = vld [vmem:[%s13993_s1 + $0x368] sm:$0xff]  ;;  %v8006_v23 = vld [vmem:[%s13993_s1 + $0x198] sm:$0xff] }
 0x31a   : > { %3829 = vst.msk [vmem:[#allocation2 + $0x90] sm:$0xff] %vm256_vm0, %v3797_v41  ;;  %v3798_v37 = vmax.f32 %v3766_v45, 0.0  ;;  %v4042_v51 = vmul.f32 %v8000_v36, %v3978_v7  ;;  %v12065_v44 = vld [vmem:[#allocation2 + $0x6f] sm:$0xff]  ;;  %v12086_v31 = vld [vmem:[#allocation2 + $0x87] sm:$0xff]  ;;  %v8142_v7 = vld [vmem:[%s13993_s1 + $0x378] sm:$0xff] }
 0x31b   : > { %3832 = vst.msk [vmem:[#allocation2 + $0xa8] sm:$0xff] %vm256_vm0, %v3800_v1  ;;  %v3979_v56 = vld [vmem:[#allocation2 + $0x78] sm:$0xff]  ;;  %v3981_v16 = vld [vmem:[#allocation2 + $0x88] sm:$0xff]  ;;  %v8141_v41 = vld [vmem:[%s13993_s1 + $0x370] sm:$0xff] }
 0x31c   : > { %3830 = vst.msk [vmem:[#allocation2 + $0x98] sm:$0xff] %vm256_vm0, %v3798_v37  ;;  %v9200_v9 = vpop.f32.mrb[20].mxu0  ;;  %v4067_v21 = vpack.c.bf16 %v4042_v51, %v4041_v47  ;;  %v4043_v58 = vmul.f32 %v8001_v52, %v3979_v56  ;;  %v12067_v60 = vld [vmem:[#allocation2 + $0x77] sm:$0xff]  ;;  %v12076_v36 = vld [vmem:[#allocation2 + $0x7f] sm:$0xff]  ;;  %v12098_v56 = vmul.f32 %v8139_v6, %v12065_v44  ;;  %v12111_v6 = vmul.f32 %v8142_v7, %v12086_v31 }
 0x31d   : > { %v3771_v33 = vadd.f32 %v9200_v9, %v11838_v2  ;;  %v3663_v40 = vpop.f32.mrb[21].mxu0  ;;  %v8005_v51 = vld [vmem:[%s13993_s1 + $0x190] sm:$0xff]  ;;  %v12101_v62 = vmul.f32 %v8140_v61, %v12067_v60  ;;  %v12445_v27 = vld [vmem:[#allocation2 + $0x81] sm:$0xff] }
 0x31e   : > { %v3769_v20 = vadd.f32 %v11838_v2, %v3663_v40  ;;  %v9201_v54 = vpop.f32.mrb[22].mxu0  ;;  %9230 = vmatprep.mubr.msk.bf16.mxu1 %vm256_vm0, %v4067_v21  ;;  %v4068_v32 = vpack.c.bf16 %v4044_v30, %v4043_v58  ;;  %14147 = vst [vmem:[#allocation15_spill] sm:$0xff] %v12098_v56  ;;  %v4045_v21 = vmul.f32 %v8003_v19, %v3981_v16  ;;  %14150 = vst [vmem:[#allocation18_spill] sm:$0xff] %v12111_v6  ;;  %v12426_v25 = vld [vmem:[#allocation2 + $0x71] sm:$0xff] }
 0x31f   : > { %v3803_v22 = vmax.f32 %v3771_v33, 0.0  ;;  %v3772_v43 = vadd.f32 %v9201_v54, %v11838_v2  ;;  %v3666_v26 = vpop.f32.mrb[23].mxu0  ;;  %14148 = vst [vmem:[#allocation16_spill] sm:$0xff] %v12101_v62  ;;  %v12105_v30 = vmul.f32 %v8141_v41, %v12076_v36  ;;  %v12424_v62 = vld [vmem:[#allocation2 + $0x69] sm:$0xff]  ;;  %14170 = vst [vmem:[#allocation38_spill] sm:$0xff] %v12426_v25 }
 0x320   : > { %v3801_v45 = vmax.f32 %v3769_v20, 0.0  ;;  %v3770_v52 = vadd.f32 %v11838_v2, %v3666_v26  ;;  %9231 = vmatmul.mubr.msk.bf16.gmra.mrb[12].mxu1 %vm256_vm0, %v4068_v32  ;;  %v3984_v47 = vld [vmem:[#allocation2 + $0xa0] sm:$0xff]  ;;  %14169 = vst [vmem:[#allocation37_spill] sm:$0xff] %v12424_v62  ;;  %14172 = vst [vmem:[#allocation40_spill] sm:$0xff] %v12445_v27 }
 0x321   : > { %3835 = vst.msk [vmem:[#allocation2 + $0xc0] sm:$0xff] %vm256_vm0, %v3803_v22  ;;  %v3804_v17 = vmax.f32 %v3772_v43, 0.0  ;;  %v3982_v37 = vld [vmem:[#allocation2 + $0x90] sm:$0xff]  ;;  %14149 = vst [vmem:[#allocation17_spill] sm:$0xff] %v12105_v30  ;;  %v4048_v61 = vmul.f32 %v8006_v23, %v3984_v47  ;;  %v8143_v22 = vld [vmem:[%s13993_s1 + $0x380] sm:$0xff] }
 0x322   : > { %3833 = vst.msk [vmem:[#allocation2 + $0xb0] sm:$0xff] %vm256_vm0, %v3801_v45  ;;  %v3802_v9 = vmax.f32 %v3770_v52, 0.0  ;;  %v4046_v58 = vmul.f32 %v8004_v29, %v3982_v37  ;;  %v12120_v41 = vld [vmem:[#allocation2 + $0x8f] sm:$0xff]  ;;  %v12488_v46 = vld [vmem:[#allocation2 + $0xa1] sm:$0xff] }
 0x323   : > { %3836 = vst.msk [vmem:[#allocation2 + $0xc8] sm:$0xff] %vm256_vm0, %v3804_v17  ;;  %v3983_v33 = vld [vmem:[#allocation2 + $0x98] sm:$0xff]  ;;  %v8144_v23 = vld [vmem:[%s13993_s1 + $0x388] sm:$0xff] }
 0x324   : > { %3834 = vst.msk [vmem:[#allocation2 + $0xb8] sm:$0xff] %vm256_vm0, %v3802_v9  ;;  %v9204_v20 = vpop.f32.mrb[24].mxu0  ;;  %v4069_v54 = vpack.c.bf16 %v4046_v58, %v4045_v21  ;;  %v4047_v32 = vmul.f32 %v8005_v51, %v3983_v33  ;;  %v12122_v45 = vld [vmem:[#allocation2 + $0x97] sm:$0xff]  ;;  %v3985_v47 = vld [vmem:[#allocation2 + $0xa8] sm:$0xff]  ;;  %v8007_v51 = vld [vmem:[%s13993_s1 + $0x1a0] sm:$0xff] }
 0x325   : > { %v3775_v19 = vadd.f32 %v9204_v20, %v11838_v2  ;;  %v3679_v29 = vpop.f32.mrb[25].mxu0  ;;  %v8008_v9 = vld [vmem:[%s13993_s1 + $0x1a8] sm:$0xff]  ;;  %v8009_v33 = vld [vmem:[%s13993_s1 + $0x1b0] sm:$0xff]  ;;  %v8010_v20 = vld [vmem:[%s13993_s1 + $0x1b8] sm:$0xff] }
 0x326   : > { %v3773_v43 = vadd.f32 %v11838_v2, %v3679_v29  ;;  %v9205_v26 = vpop.f32.mrb[26].mxu0  ;;  %9234 = vmatprep.mubr.msk.bf16.mxu1 %vm256_vm0, %v4069_v54  ;;  %v4070_v16 = vpack.c.bf16 %v4048_v61, %v4047_v32  ;;  %v8145_v54 = vld [vmem:[%s13993_s1 + $0x390] sm:$0xff]  ;;  %v12148_v29 = vld [vmem:[#allocation2 + $0x9f] sm:$0xff] }
 0x327   : > { %v3807_v7 = vmax.f32 %v3775_v19, 0.0  ;;  %v3776_v17 = vadd.f32 %v9205_v26, %v11838_v2  ;;  %v3682_v37 = vpop.f32.mrb[27].mxu0  ;;  %v12154_v26 = vmul.f32 %v8144_v23, %v12122_v45 }
 0x328   : > { %v3805_v21 = vmax.f32 %v3773_v43, 0.0  ;;  %v3774_v58 = vadd.f32 %v11838_v2, %v3682_v37  ;;  %9235 = vmatmul.mubr.msk.bf16.gmra.mrb[16].mxu1 %vm256_vm0, %v4070_v16  ;;  %v3988_v19 = vld [vmem:[#allocation2 + $0xc0] sm:$0xff]  ;;  %v12151_v43 = vmul.f32 %v8143_v22, %v12120_v41  ;;  %v4049_v37 = vmul.f32 %v8007_v51, %v3985_v47  ;;  %v8146_v22 = vld [vmem:[%s13993_s1 + $0x398] sm:$0xff] }
 0x329   : > { %3839 = vst.msk [vmem:[#allocation2 + $0xe0] sm:$0xff] %vm256_vm0, %v3807_v7  ;;  %v3808_v32 = vmax.f32 %v3776_v17, 0.0  ;;  %v3986_v61 = vld [vmem:[#allocation2 + $0xb0] sm:$0xff]  ;;  %14152 = vst [vmem:[#allocation20_spill] sm:$0xff] %v12154_v26  ;;  %v12158_v7 = vld [vmem:[#allocation2 + $0xa7] sm:$0xff]  ;;  %v12167_v47 = vmul.f32 %v8145_v54, %v12148_v29 }
 0x32a   : > { %14151 = vst [vmem:[#allocation19_spill] sm:$0xff] %v12151_v43  ;;  %3837 = vst.msk [vmem:[#allocation2 + $0xd0] sm:$0xff] %vm256_vm0, %v3805_v21  ;;  %v3806_v16 = vmax.f32 %v3774_v58, 0.0  ;;  %v4050_v52 = vmul.f32 %v8008_v9, %v3986_v61  ;;  %v4052_v58 = vmul.f32 %v8010_v20, %v3988_v19  ;;  %v8012_v61 = vld [vmem:[%s13993_s1 + $0x1c8] sm:$0xff] }
 0x32b   : > { %3840 = vst.msk [vmem:[#allocation2 + $0xe8] sm:$0xff] %vm256_vm0, %v3808_v32  ;;  %v3987_v40 = vld [vmem:[#allocation2 + $0xb8] sm:$0xff]  ;;  %14153 = vst [vmem:[#allocation21_spill] sm:$0xff] %v12167_v47  ;;  %v8011_v32 = vld [vmem:[%s13993_s1 + $0x1c0] sm:$0xff] }
 0x32c   : > { %3838 = vst.msk [vmem:[#allocation2 + $0xd8] sm:$0xff] %vm256_vm0, %v3806_v16  ;;  %v9208_v23 = vpop.f32.mrb[28].mxu0  ;;  %v4071_v1 = vpack.c.bf16 %v4050_v52, %v4049_v37  ;;  %v4051_v21 = vmul.f32 %v8009_v33, %v3987_v40  ;;  %v8147_v52 = vld [vmem:[%s13993_s1 + $0x3a0] sm:$0xff]  ;;  %v12181_v54 = vld [vmem:[#allocation2 + $0xaf] sm:$0xff]  ;;  %v12183_v19 = vld [vmem:[#allocation2 + $0xb7] sm:$0xff]  ;;  %v12186_v16 = vmul.f32 %v8146_v22, %v12158_v7 }
 0x32d   : > { %v3779_v51 = vadd.f32 %v9208_v23, %v11838_v2  ;;  %v3695_v9 = vpop.f32.mrb[29].mxu0  ;;  %v8148_v37 = vld [vmem:[%s13993_s1 + $0x3a8] sm:$0xff]  ;;  %v12192_v49 = vld [vmem:[#allocation2 + $0xbf] sm:$0xff] }
 0x32e   : > { %v3777_v40 = vadd.f32 %v11838_v2, %v3695_v9  ;;  %v9209_v33 = vpop.f32.mrb[30].mxu0  ;;  %9238 = vmatprep.mubr.msk.bf16.mxu1 %vm256_vm0, %v4071_v1  ;;  %v4072_v20 = vpack.c.bf16 %v4052_v58, %v4051_v21  ;;  %14154 = vst [vmem:[#allocation22_spill] sm:$0xff] %v12186_v16  ;;  %v3989_v9 = vld [vmem:[#allocation2 + $0xc8] sm:$0xff]  ;;  %v8149_v1 = vld [vmem:[%s13993_s1 + $0x3b0] sm:$0xff]  ;;  %v8014_v22 = vld [vmem:[%s13993_s1 + $0x1d8] sm:$0xff]  ;;  %v12217_v18 = vmul.f32 %v8148_v37, %v12183_v19 }
 0x32f   : > { %v3811_v23 = vmax.f32 %v3779_v51, 0.0  ;;  %v3780_v17 = vadd.f32 %v9209_v33, %v11838_v2  ;;  %v3698_v15 = vpop.f32.mrb[31].mxu0  ;;  %v12202_v51 = vld [vmem:[#allocation2 + $0xc7] sm:$0xff]  ;;  %v4053_v47 = vmul.f32 %v8011_v32, %v3989_v9 }
 0x330   : > { %v3809_v21 = vmax.f32 %v3777_v40, 0.0  ;;  %v3778_v58 = vadd.f32 %v11838_v2, %v3698_v15  ;;  %9239 = vmatmul.mubr.msk.bf16.gmra.mrb[20].mxu1 %vm256_vm0, %v4072_v20  ;;  %v3992_v2 = vld [vmem:[#allocation2 + $0xe0] sm:$0xff]  ;;  %v8013_v15 = vld [vmem:[%s13993_s1 + $0x1d0] sm:$0xff]  ;;  %v12214_v20 = vmul.f32 %v8147_v52, %v12181_v54  ;;  %14156 = vst [vmem:[#allocation24_spill] sm:$0xff] %v12217_v18  ;;  %v8152_v52 = vld [vmem:[%s13993_s1 + $0x3c8] sm:$0xff]  ;;  %v12237_v32 = vmul.f32 %v8150_v39, %v12202_v51 }
 0x331   : > { %3843 = vst.msk [vmem:[#allocation2 + $0x100] sm:$0xff] %vm256_vm0, %v3811_v23  ;;  %v3812_v40 = vmax.f32 %v3780_v17, 0.0  ;;  %v3990_v63 = vld [vmem:[#allocation2 + $0xd0] sm:$0xff]  ;;  %v12221_v23 = vmul.f32 %v8149_v1, %v12192_v49  ;;  %v8151_v17 = vld [vmem:[%s13993_s1 + $0x3c0] sm:$0xff]  ;;  %v4056_v1 = vmul.f32 %v8014_v22, %v3992_v2 }
 0x332   : > { %14155 = vst [vmem:[#allocation23_spill] sm:$0xff] %v12214_v20  ;;  %3841 = vst.msk [vmem:[#allocation2 + $0xf0] sm:$0xff] %vm256_vm0, %v3809_v21  ;;  %v3810_v33 = vmax.f32 %v3778_v58, 0.0  ;;  %v4054_v16 = vmul.f32 %v8012_v61, %v3990_v63  ;;  %v12230_v43 = vld [vmem:[#allocation2 + $0xcf] sm:$0xff]  ;;  %v12245_v26 = vld [vmem:[#allocation2 + $0xe7] sm:$0xff] }
 0x333   : > { %14157 = vst [vmem:[#allocation25_spill] sm:$0xff] %v12221_v23  ;;  %3844 = vst.msk [vmem:[#allocation2 + $0x108] sm:$0xff] %vm256_vm0, %v3812_v40  ;;  %v3991_v37 = vld [vmem:[#allocation2 + $0xd8] sm:$0xff]  ;;  %v8153_v40 = vld [vmem:[%s13993_s1 + $0x3d0] sm:$0xff] }
 0x334   : > { %v12232_v21 = vld [vmem:[#allocation2 + $0xd7] sm:$0xff]  ;;  %14158 = vst [vmem:[#allocation26_spill] sm:$0xff] %v12237_v32  ;;  %3842 = vst.msk [vmem:[#allocation2 + $0xf8] sm:$0xff] %vm256_vm0, %v3810_v33  ;;  %v4073_v61 = vpack.c.bf16 %v4054_v16, %v4053_v47  ;;  %v4055_v9 = vmul.f32 %v8013_v15, %v3991_v37  ;;  %v12240_v58 = vld [vmem:[#allocation2 + $0xdf] sm:$0xff]  ;;  %v12254_v16 = vmul.f32 %v8151_v17, %v12230_v43 }
 0x335   : > { %v8154_v63 = vld [vmem:[%s13993_s1 + $0x3d8] sm:$0xff]  ;;  %v3845_v20 = vld [vmem:[#allocation2 + $0x7] sm:$0xff]  ;;  %v12257_v22 = vmul.f32 %v8152_v52, %v12232_v21  ;;  %v12266_v37 = vmul.f32 %v8153_v40, %v12240_v58  ;;  %v8017_v47 = vld [vmem:[%s13993_s1 + $0x1f0] sm:$0xff] }
 0x336   : > { %9242 = vmatprep.mubr.msk.bf16.mxu1 %vm256_vm0, %v4073_v61  ;;  %v4074_v39 = vpack.c.bf16 %v4056_v1, %v4055_v9  ;;  %14159 = vst [vmem:[#allocation27_spill] sm:$0xff] %v12254_v16  ;;  %v3993_v33 = vld [vmem:[#allocation2 + $0xe8] sm:$0xff]  ;;  %v8015_v2 = vld [vmem:[%s13993_s1 + $0x1e0] sm:$0xff]  ;;  %v8018_v17 = vld [vmem:[%s13993_s1 + $0x1f8] sm:$0xff]  ;;  %v12281_v1 = vmul.f32 %v8154_v63, %v12245_v26 }
 0x337   : > { %14160 = vst [vmem:[#allocation28_spill] sm:$0xff] %v12257_v22  ;;  %v8016_v15 = vld [vmem:[%s13993_s1 + $0x1e8] sm:$0xff]  ;;  %14161 = vst [vmem:[#allocation29_spill] sm:$0xff] %v12266_v37  ;;  %v3877_v52 = vld [vmem:[%s13993_s1] sm:$0xff]  ;;  %v4057_v23 = vmul.f32 %v8015_v2, %v3993_v33 }
 0x338   : > { %9243 = vmatmul.mubr.msk.bf16.gmra.mrb[24].mxu1 %vm256_vm0, %v4074_v39  ;;  %v3878_v61 = vld [vmem:[%s13993_s1 + $0x8] sm:$0xff]  ;;  %14162 = vst [vmem:[#allocation30_spill] sm:$0xff] %v12281_v1  ;;  %v3996_v39 = vld [vmem:[#allocation2 + $0x100] sm:$0xff]  ;;  %v3909_v22 = vmul.f32 %v3877_v52, %v3845_v20  ;;  %v3879_v20 = vld [vmem:[%s13993_s1 + $0x10] sm:$0xff] }
 0x339   : > { %v3994_v40 = vld [vmem:[#allocation2 + $0xf0] sm:$0xff]  ;;  %v8155_v9 = vld [vmem:[%s13993_s1 + $0x3e0] sm:$0xff]  ;;  %v8156_v63 = vld [vmem:[%s13993_s1 + $0x3e8] sm:$0xff]  ;;  %v3910_v6 = vmul.f32 %v3878_v61, %v11873_v14 }
 0x33a   : > { %v4058_v32 = vmul.f32 %v8016_v15, %v3994_v40  ;;  %v12286_v18 = vld [vmem:[#allocation2 + $0xef] sm:$0xff]  ;;  %v4060_v15 = vmul.f32 %v8018_v17, %v3996_v39  ;;  %v3880_v14 = vld [vmem:[%s13993_s1 + $0x18] sm:$0xff]  ;;  %v3885_v52 = vld [vmem:[%s13993_s1 + $0x40] sm:$0xff] }
 0x33b   : > { %v3995_v16 = vld [vmem:[#allocation2 + $0xf8] sm:$0xff]  ;;  %v12300_v40 = vmul.f32 %v8155_v9, %v12286_v18  ;;  %v3941_v1 = vpack.c.bf16 %v3910_v6, %v3909_v22  ;;  %v3911_v6 = vmul.f32 %v3879_v20, %v11875_v34  ;;  %v3886_v34 = vld [vmem:[%s13993_s1 + $0x48] sm:$0xff]  ;;  %v8255_v20 = vld [vmem:[%s13993_s1 + $0x540] sm:$0xff] }
 0x33c   : > { %v12297_v56 = vld [vmem:[#allocation2 + $0xf7] sm:$0xff]  ;;  %v4075_v33 = vpack.c.bf16 %v4058_v32, %v4057_v23  ;;  %v4059_v2 = vmul.f32 %v8017_v47, %v3995_v16  ;;  %v3882_v32 = vld [vmem:[%s13993_s1 + $0x28] sm:$0xff]  ;;  %v3912_v47 = vmul.f32 %v3880_v14, %v11889_v4  ;;  %v3881_v16 = vld [vmem:[%s13993_s1 + $0x20] sm:$0xff]  ;;  %v12348_v39 = vmul.f32 %v3886_v34, %v12006_v8 }
 0x33d   : > { %14163 = vst [vmem:[#allocation31_spill] sm:$0xff] %v12300_v40  ;;  %v12303_v30 = vmul.f32 %v8156_v63, %v12297_v56  ;;  %v3914_v22 = vmul.f32 %v3882_v32, %v11953_v13  ;;  %v3884_v17 = vld [vmem:[%s13993_s1 + $0x38] sm:$0xff]  ;;  %v3913_v4 = vmul.f32 %v3881_v16, %v11878_v53  ;;  %v3887_v13 = vld [vmem:[%s13993_s1 + $0x50] sm:$0xff]  ;;  %v10136_v53 = vld [vmem:[%s13996_s4 + $0x48] sm:$0xff]   ;;  %v12379_v32 = vmul.f32 %v3885_v52, %v11957_v28 }
 0x33e   : > { %9246 = vmatprep.mubr.msk.bf16.mxu1 %vm256_vm0, %v4075_v33  ;;  %v4076_v37 = vpack.c.bf16 %v4060_v15, %v4059_v2  ;;  %v3942_v61 = vpack.c.bf16 %v3912_v47, %v3911_v6  ;;  %v3888_v63 = vld [vmem:[%s13993_s1 + $0x58] sm:$0xff]  ;;  %v3890_v33 = vld [vmem:[%s13993_s1 + $0x68] sm:$0xff]  ;;  %v8253_v2 = vld [vmem:[%s13993_s1 + $0x530] sm:$0xff] }
 0x33f   : > { %14164 = vst [vmem:[#allocation32_spill] sm:$0xff] %v12303_v30  ;;  %v3943_v8 = vpack.c.bf16 %v3914_v22, %v3913_v4  ;;  %v8254_v15 = vld [vmem:[%s13993_s1 + $0x538] sm:$0xff]  ;;  %v8256_v14 = vld [vmem:[%s13993_s1 + $0x548] sm:$0xff]  ;;  %v12384_v6 = vld [vmem:[%s13996_s4 + $0x50] sm:$0xff]  }
 0x340   : > { %9247 = vmatmul.mubr.msk.bf16.gmra.mrb[28].mxu1 %vm256_vm0, %v4076_v37  ;;  %v3883_v37 = vld [vmem:[%s13993_s1 + $0x30] sm:$0xff]  ;;  %v12388_v16 = vld [vmem:[#allocation2 + $0x39] sm:$0xff]  ;;  %v12390_v22 = vld [vmem:[#allocation2 + $0x41] sm:$0xff] }
 0x341   : > { %9258 = vmatprep.mubr.msk.bf16.mxu1 %vm256_vm0, %v3941_v1  ;;  %v12342_v9 = vmul.f32 %v3883_v37, %v11946_v3  ;;  %v12345_v1 = vmul.f32 %v3884_v17, %v11955_v10  ;;  %v8251_v3 = vld [vmem:[%s13993_s1 + $0x520] sm:$0xff]  ;;  %v8252_v10 = vld [vmem:[%s13993_s1 + $0x528] sm:$0xff]  ;;  %v12386_v47 = vld [vmem:[#allocation2 + $0x31] sm:$0xff]  ;;  %14165 = vst [vmem:[#allocation33_spill] sm:$0xff] %v12388_v16  ;;  %v12474_v57 = vmul.f32 %v8253_v2, %v12390_v22 }
 0x342   : > { %v8257_v37 = vld [vmem:[%s13993_s1 + $0x550] sm:$0xff]  ;;  %v8258_v28 = vld [vmem:[%s13993_s1 + $0x558] sm:$0xff]  ;;  %v8259_v17 = vld [vmem:[%s13993_s1 + $0x560] sm:$0xff]  ;;  %v12448_v55 = vmul.f32 %v8251_v3, %v12386_v47  ;;  %v12451_v11 = vmul.f32 %v8252_v10, %v12388_v16 }
 0x343   : > { %v12403_v34 = vld [vmem:[#allocation2 + $0x49] sm:$0xff]  ;;  %v12405_v4 = vld [vmem:[#allocation2 + $0x51] sm:$0xff]  ;;  %v12407_v52 = vld [vmem:[#allocation2 + $0x59] sm:$0xff]  ;;  %v3944_v40 = vpack.c.bf16 %v12345_v1, %v12342_v9  ;;  %14176 = vst [vmem:[#allocation44_spill] sm:$0xff] %v12474_v57 }
 0x344   : > { %14166 = vst [vmem:[#allocation34_spill] sm:$0xff] %v12403_v34  ;;  %14167 = vst [vmem:[#allocation35_spill] sm:$0xff] %v12407_v52  ;;  %v8261_v23 = vld [vmem:[%s13993_s1 + $0x570] sm:$0xff]  ;;  %v12422_v30 = vld [vmem:[#allocation2 + $0x61] sm:$0xff]  ;;  %v12477_v48 = vmul.f32 %v8254_v15, %v12403_v34  ;;  %v12480_v5 = vmul.f32 %v8255_v20, %v12405_v4  ;;  %v12483_v50 = vmul.f32 %v8256_v14, %v12407_v52 }
 0x345   : > { %14168 = vst [vmem:[#allocation36_spill] sm:$0xff] %v12422_v30  ;;  %v8263_v9 = vld [vmem:[%s13993_s1 + $0x580] sm:$0xff]  ;;  %v8264_v1 = vld [vmem:[%s13993_s1 + $0x588] sm:$0xff]  ;;  %14173 = vst [vmem:[#allocation41_spill] sm:$0xff] %v12448_v55  ;;  %v12497_v20 = vmul.f32 %v8257_v37, %v12422_v30  ;;  %v12500_v14 = vmul.f32 %v8258_v28, %v12424_v62  ;;  %v12503_v52 = vmul.f32 %v8259_v17, %v12426_v25 }
 0x346   : > { %14174 = vst [vmem:[#allocation42_spill] sm:$0xff] %v12451_v11  ;;  %v12469_v3 = vld [vmem:[#allocation2 + $0x91] sm:$0xff]  ;;  %v12471_v10 = vld [vmem:[#allocation2 + $0x99] sm:$0xff]  ;;  %14177 = vst [vmem:[#allocation45_spill] sm:$0xff] %v12477_v48  ;;  %v12525_v11 = vmul.f32 %v8261_v23, %v12445_v27 }
 0x347   : > { %14175 = vst [vmem:[#allocation43_spill] sm:$0xff] %v12471_v10  ;;  %14178 = vst [vmem:[#allocation46_spill] sm:$0xff] %v12480_v5  ;;  %v12490_v16 = vld [vmem:[#allocation2 + $0xa9] sm:$0xff]  ;;  %v12492_v2 = vld [vmem:[#allocation2 + $0xb1] sm:$0xff]  ;;  %v12551_v48 = vmul.f32 %v8264_v1, %v12471_v10 }
 0x348   : > { %9259 = vmatmul.mubr.msk.bf16.vlgmr.msra.gmra.mrb[0].mxu1 %vm256_vm0, %v3942_v61  ;;  %v8260_v61 = vld [vmem:[%s13993_s1 + $0x568] sm:$0xff]  ;;  %14179 = vst [vmem:[#allocation47_spill] sm:$0xff] %v12483_v50  ;;  %14180 = vst [vmem:[#allocation48_spill] sm:$0xff] %v12497_v20  ;;  %v8270_v34 = vld [vmem:[%s13993_s1 + $0x5b8] sm:$0xff]  ;;  %v12548_v50 = vmul.f32 %v8263_v9, %v12469_v3  ;;  %v12566_v9 = vmul.f32 %v8265_v38, %v12488_v46 }
 0x349   : > { %9291 = vmatpush3.bf16.msra.mxu1 %v11991_v0  ;;  %9262 = vmatprep.mubr.msk.bf16.mxu1 %vm256_vm0, %v3943_v8  ;;  %v12420_v8 = vmul.f32 %v3887_v13, %v12008_v24  ;;  %v12438_v24 = vmul.f32 %v3888_v63, %v12032_v42  ;;  %v12441_v13 = vmul.f32 %v3890_v33, %v12065_v44  ;;  %v12443_v0 = vld [vmem:[#allocation2 + $0x79] sm:$0xff]  ;;  %v12467_v33 = vld [vmem:[#allocation2 + $0x89] sm:$0xff]  ;;  %v12536_v57 = vld [vmem:[#allocation2 + $0xc1] sm:$0xff] }
 0x34a   : > { %9292 = vmatprep.subr.bf16.mxu1 %v10136_v53  ;;  %14171 = vst [vmem:[#allocation39_spill] sm:$0xff] %v12443_v0  ;;  %v8266_v42 = vld [vmem:[%s13993_s1 + $0x598] sm:$0xff]  ;;  %v8267_v44 = vld [vmem:[%s13993_s1 + $0x5a0] sm:$0xff]  ;;  %14181 = vst [vmem:[#allocation49_spill] sm:$0xff] %v12500_v14  ;;  %v12522_v55 = vmul.f32 %v8260_v61, %v12443_v0  ;;  %v12545_v5 = vmul.f32 %v8262_v35, %v12467_v33 }
 0x34b   : > { %v12465_v63 = vld [vmem:[%s13996_s4 + $0x58] sm:$0xff]   ;;  %14182 = vst [vmem:[#allocation50_spill] sm:$0xff] %v12503_v52  ;;  %v8271_v15 = vld [vmem:[%s13993_s1 + $0x5c0] sm:$0xff]  ;;  %14184 = vst [vmem:[#allocation52_spill] sm:$0xff] %v12525_v11  ;;  %v12569_v1 = vmul.f32 %v8266_v42, %v12490_v16  ;;  %v12572_v20 = vmul.f32 %v8267_v44, %v12492_v2 }
 0x34c   : > { %v12515_v37 = vld [vmem:[#allocation2 + $0xb9] sm:$0xff]  ;;  %14183 = vst [vmem:[#allocation51_spill] sm:$0xff] %v12522_v55  ;;  %v8272_v62 = vld [vmem:[%s13993_s1 + $0x5c8] sm:$0xff]  ;;  %v8273_v25 = vld [vmem:[%s13993_s1 + $0x5d0] sm:$0xff] }
 0x34d   : > { %9293 = vmatpush3.bf16.msra.mxu1 %v10136_v53  ;;  %v8269_v53 = vld [vmem:[%s13993_s1 + $0x5b0] sm:$0xff]  ;;  %v8274_v28 = vld [vmem:[%s13993_s1 + $0x5d8] sm:$0xff]  ;;  %14185 = vst [vmem:[#allocation53_spill] sm:$0xff] %v12536_v57  ;;  %14188 = vst [vmem:[#allocation56_spill] sm:$0xff] %v12545_v5  ;;  %v12588_v44 = vmul.f32 %v8268_v59, %v12515_v37 }
 0x34e   : > { %9294 = vmatprep.subr.bf16.mxu1 %v12384_v6  ;;  %v12538_v17 = vld [vmem:[#allocation2 + $0xc9] sm:$0xff]  ;;  %v12540_v61 = vld [vmem:[#allocation2 + $0xd1] sm:$0xff]  ;;  %14189 = vst [vmem:[#allocation57_spill] sm:$0xff] %v12548_v50  ;;  %14190 = vst [vmem:[#allocation58_spill] sm:$0xff] %v12551_v48  ;;  %v12605_v59 = vmul.f32 %v8269_v53, %v12536_v57 }
 0x34f   : > { %14186 = vst [vmem:[#allocation54_spill] sm:$0xff] %v12538_v17  ;;  %14187 = vst [vmem:[#allocation55_spill] sm:$0xff] %v12540_v61  ;;  %v8275_v27 = vld [vmem:[%s13993_s1 + $0x5e0] sm:$0xff]  ;;  %v12561_v23 = vld [vmem:[#allocation2 + $0xe9] sm:$0xff]  ;;  %v12608_v42 = vmul.f32 %v8270_v34, %v12538_v17  ;;  %v12611_v38 = vmul.f32 %v8271_v15, %v12540_v61 }
 0x350   : > { %9263 = vmatmul.mubr.msk.bf16.gmra.mrb[4].mxu1 %vm256_vm0, %v3944_v40  ;;  %v12557_v0 = vld [vmem:[#allocation2 + $0xd9] sm:$0xff]  ;;  %v12559_v30 = vld [vmem:[#allocation2 + $0xe1] sm:$0xff]  ;;  %14193 = vst [vmem:[#allocation61_spill] sm:$0xff] %v12561_v23  ;;  %14194 = vst [vmem:[#allocation62_spill] sm:$0xff] %v12566_v9  ;;  %v14197_v40 = vpack.c.bf16 %v12348_v39, %v12379_v32 }
 0x351   : > { %14191 = vst [vmem:[#allocation59_spill] sm:$0xff] %v12557_v0  ;;  %14192 = vst [vmem:[#allocation60_spill] sm:$0xff] %v12559_v30  ;;  %9295 = vmatpush3.bf16.msra.mxu1 %v12384_v6  ;;  %v12579_v14 = vld [vmem:[#allocation2 + $0xf1] sm:$0xff]  ;;  %v12581_v10 = vld [vmem:[#allocation2 + $0xf9] sm:$0xff]  ;;  %v12616_v50 = vmul.f32 %v8272_v62, %v12557_v0  ;;  %v12619_v48 = vmul.f32 %v8273_v25, %v12559_v30 }
 0x352   : > { %14195 = vst [vmem:[#allocation63_spill] sm:$0xff] %v12569_v1  ;;  %14196 = vst [vmem:[#allocation64_spill] sm:$0xff] %v12572_v20  ;;  %9266 = vmatprep.mubr.msk.bf16.mxu1 %vm256_vm0, %v14197_v40  ;;  %v8276_v39 = vld [vmem:[%s13993_s1 + $0x5e8] sm:$0xff]  ;;  %v3889_v32 = vld [vmem:[%s13993_s1 + $0x60] sm:$0xff]  ;;  %9296 = vmatprep.subr.bf16.mxu1 %v12465_v63  ;;  %v12622_v40 = vmul.f32 %v8274_v28, %v12561_v23  ;;  %v12627_v34 = vmul.f32 %v8275_v27, %v12579_v14 }
 0x353   : > { %14198 = vst [vmem:[#allocation65_spill] sm:$0xff] %v12579_v14  ;;  %14199 = vst [vmem:[#allocation66_spill] sm:$0xff] %v12581_v10  ;;  %v12600_v6 = vld [vmem:[%s13996_s4 + $0x60] sm:$0xff]   ;;  %v12630_v15 = vmul.f32 %v8276_v39, %v12581_v10  ;;  %v3921_v35 = vmul.f32 %v3889_v32, %v12042_v12  ;;  %v3946_v28 = vpack.c.bf16 %v12438_v24, %v12420_v8  ;;  %v3891_v12 = vld [vmem:[%s13993_s1 + $0x70] sm:$0xff] }
 0x354   : > { %14200 = vst [vmem:[#allocation67_spill] sm:$0xff] %v12588_v44  ;;  %14201 = vst [vmem:[#allocation68_spill] sm:$0xff] %v12605_v59  ;;  %v3894_v8 = vld [vmem:[%s13993_s1 + $0x88] sm:$0xff]  ;;  %v3893_v24 = vld [vmem:[%s13993_s1 + $0x80] sm:$0xff] }
 0x355   : > { %14202 = vst [vmem:[#allocation69_spill] sm:$0xff] %v12608_v42  ;;  %14203 = vst [vmem:[#allocation70_spill] sm:$0xff] %v12611_v38  ;;  %9297 = vmatpush3.bf16.msra.mxu1 %v12465_v63  ;;  %v3947_v39 = vpack.c.bf16 %v12441_v13, %v3921_v35  ;;  %v3892_v63 = vld [vmem:[%s13993_s1 + $0x78] sm:$0xff]  ;;  %v3923_v13 = vmul.f32 %v3891_v12, %v12067_v60  ;;  %v3895_v32 = vld [vmem:[%s13993_s1 + $0x90] sm:$0xff]  ;;  %v3926_v27 = vmul.f32 %v3894_v8, %v12120_v41 }
 0x356   : > { %14204 = vst [vmem:[#allocation71_spill] sm:$0xff] %v12616_v50  ;;  %14205 = vst [vmem:[#allocation72_spill] sm:$0xff] %v12619_v48  ;;  %9330 = vmatprep.subr.bf16.mxu1 %v12600_v6  ;;  %v3924_v35 = vmul.f32 %v3892_v63, %v12076_v36  ;;  %v3897_v60 = vld [vmem:[%s13993_s1 + $0xa0] sm:$0xff]  ;;  %v3899_v36 = vld [vmem:[%s13993_s1 + $0xb0] sm:$0xff]  ;;  %v3925_v62 = vmul.f32 %v3893_v24, %v12086_v31  ;;  %v12684_v41 = vmul.f32 %v3895_v32, %v12122_v45 }
 0x357   : > { %14206 = vst [vmem:[#allocation73_spill] sm:$0xff] %v12622_v40  ;;  %14207 = vst [vmem:[#allocation74_spill] sm:$0xff] %v12627_v34  ;;  %v8367_v12 = vld [vmem:[%s13993_s1 + $0x700] sm:$0xff]  ;;  %v8368_v63 = vld [vmem:[%s13993_s1 + $0x708] sm:$0xff]  ;;  %v12766_v5 = vmul.f32 %v3899_v36, %v12183_v19 }
 0x358   : > { %14208 = vst [vmem:[#allocation75_spill] sm:$0xff] %v12630_v15  ;;  %9267 = vmatmul.mubr.msk.bf16.gmra.mrb[8].mxu1 %vm256_vm0, %v3946_v28  ;;  %v3896_v28 = vld [vmem:[%s13993_s1 + $0x98] sm:$0xff]  ;;  %v12697_v15 = vld [vmem:[#allocation2 + $0x20] sm:$0xff]  ;;  %v8369_v31 = vld [vmem:[%s13993_s1 + $0x710] sm:$0xff]  ;;  %v3949_v38 = vpack.c.bf16 %v3926_v27, %v3925_v62 }
 0x359   : > { %9270 = vmatprep.mubr.msk.bf16.mxu1 %vm256_vm0, %v3947_v39  ;;  %v3898_v39 = vld [vmem:[%s13993_s1 + $0xa8] sm:$0xff]  ;;  %v12687_v8 = vmul.f32 %v3896_v28, %v12148_v29  ;;  %v3900_v53 = vld [vmem:[%s13993_s1 + $0xb8] sm:$0xff]  ;;  %14210 = vst [vmem:[#allocation77_spill] sm:$0xff] %v12697_v15  ;;  %v8371_v29 = vld [vmem:[%s13993_s1 + $0x720] sm:$0xff]  ;;  %v12749_v44 = vmul.f32 %v8368_v63, %v12697_v15 }
 0x35a   : > { %v12690_v25 = vmul.f32 %v3898_v39, %v12181_v54  ;;  %v12695_v34 = vld [vmem:[#allocation2 + $0x18] sm:$0xff]  ;;  %v3948_v54 = vpack.c.bf16 %v3924_v35, %v3923_v13  ;;  %v3902_v24 = vld [vmem:[%s13993_s1 + $0xc8] sm:$0xff]  ;;  %v12713_v28 = vld [vmem:[#allocation2 + $0x30] sm:$0xff]  ;;  %v12724_v13 = vmul.f32 %v3897_v60, %v12158_v7  ;;  %v12786_v36 = vmul.f32 %v3900_v53, %v12192_v49 }
 0x35b   : > { %14209 = vst [vmem:[#allocation76_spill] sm:$0xff] %v12695_v34  ;;  %v8370_v45 = vld [vmem:[%s13993_s1 + $0x718] sm:$0xff]  ;;  %v12711_v32 = vld [vmem:[#allocation2 + $0x28] sm:$0xff]  ;;  %14212 = vst [vmem:[#allocation79_spill] sm:$0xff] %v12713_v28  ;;  %v3950_v11 = vpack.c.bf16 %v12687_v8, %v12684_v41  ;;  %v12777_v23 = vmul.f32 %v8367_v12, %v12695_v34 }
 0x35c   : > { %14211 = vst [vmem:[#allocation78_spill] sm:$0xff] %v12711_v32  ;;  %v12715_v39 = vld [vmem:[#allocation2 + $0x40] sm:$0xff]  ;;  %v8372_v48 = vld [vmem:[%s13993_s1 + $0x728] sm:$0xff]  ;;  %v8373_v40 = vld [vmem:[%s13993_s1 + $0x730] sm:$0xff]  ;;  %v12795_v12 = vmul.f32 %v8369_v31, %v12711_v32  ;;  %v12798_v34 = vmul.f32 %v8370_v45, %v12713_v28  ;;  %v12813_v31 = vmul.f32 %v3902_v24, %v12230_v43 }
 0x35d   : > { %14213 = vst [vmem:[#allocation80_spill] sm:$0xff] %v12715_v39  ;;  %v12726_v35 = vld [vmem:[#allocation2 + $0x38] sm:$0xff]  ;;  %v12728_v50 = vld [vmem:[#allocation2 + $0x48] sm:$0xff]  ;;  %v12730_v59 = vld [vmem:[#allocation2 + $0x60] sm:$0xff]  ;;  %v12824_v32 = vmul.f32 %v8372_v48, %v12715_v39 }
 0x35e   : > { %14214 = vst [vmem:[#allocation81_spill] sm:$0xff] %v12726_v35  ;;  %14215 = vst [vmem:[#allocation82_spill] sm:$0xff] %v12728_v50  ;;  %v8374_v42 = vld [vmem:[%s13993_s1 + $0x738] sm:$0xff]  ;;  %v8375_v20 = vld [vmem:[%s13993_s1 + $0x740] sm:$0xff]  ;;  %v12801_v14 = vmul.f32 %v8371_v29, %v12726_v35  ;;  %v12827_v0 = vmul.f32 %v8373_v40, %v12728_v50 }
 0x35f   : > { %14216 = vst [vmem:[#allocation83_spill] sm:$0xff] %v12730_v59  ;;  %v8376_v62 = vld [vmem:[%s13993_s1 + $0x748] sm:$0xff]  ;;  %v12742_v7 = vld [vmem:[#allocation2 + $0x50] sm:$0xff]  ;;  %v12744_v27 = vld [vmem:[#allocation2 + $0x58] sm:$0xff] }
 0x360   : > { %9271 = vmatmul.mubr.msk.bf16.gmra.mrb[12].mxu1 %vm256_vm0, %v3948_v54  ;;  %v12746_v60 = vld [vmem:[#allocation2 + $0x68] sm:$0xff]  ;;  %14218 = vst [vmem:[#allocation85_spill] sm:$0xff] %v12749_v44  ;;  %v8377_v9 = vld [vmem:[%s13993_s1 + $0x750] sm:$0xff]  ;;  %v8378_v1 = vld [vmem:[%s13993_s1 + $0x758] sm:$0xff]  ;;  %v12845_v40 = vmul.f32 %v8374_v42, %v12742_v7  ;;  %v12851_v44 = vmul.f32 %v8376_v62, %v12730_v59 }
 0x361   : > { %14217 = vst [vmem:[#allocation84_spill] sm:$0xff] %v12746_v60  ;;  %v8379_v54 = vld [vmem:[%s13993_s1 + $0x760] sm:$0xff]  ;;  %9274 = vmatprep.mubr.msk.bf16.mxu1 %vm256_vm0, %v3949_v38  ;;  %v12768_v52 = vld [vmem:[#allocation2 + $0x70] sm:$0xff]  ;;  %v12770_v55 = vld [vmem:[#allocation2 + $0x78] sm:$0xff]  ;;  %v12864_v48 = vmul.f32 %v8377_v9, %v12746_v60 }
 0x362   : > { %14219 = vst [vmem:[#allocation86_spill] sm:$0xff] %v12768_v52  ;;  %14220 = vst [vmem:[#allocation87_spill] sm:$0xff] %v12770_v55  ;;  %v12772_v15 = vld [vmem:[#allocation2 + $0x80] sm:$0xff]  ;;  %v12774_v10 = vld [vmem:[#allocation2 + $0x88] sm:$0xff]  ;;  %v12870_v62 = vmul.f32 %v8379_v54, %v12770_v55 }
 0x363   : > { %14221 = vst [vmem:[#allocation88_spill] sm:$0xff] %v12777_v23  ;;  %v8380_v38 = vld [vmem:[%s13993_s1 + $0x768] sm:$0xff]  ;;  %v8381_v19 = vld [vmem:[%s13993_s1 + $0x770] sm:$0xff]  ;;  %v12790_v8 = vld [vmem:[#allocation2 + $0x98] sm:$0xff]  ;;  %v12848_v23 = vmul.f32 %v8375_v20, %v12744_v27  ;;  %v12867_v20 = vmul.f32 %v8378_v1, %v12768_v52 }
 0x364   : > { %v12788_v41 = vld [vmem:[#allocation2 + $0x90] sm:$0xff]  ;;  %v12792_v63 = vld [vmem:[#allocation2 + $0xa0] sm:$0xff]  ;;  %14222 = vst [vmem:[#allocation89_spill] sm:$0xff] %v12795_v12  ;;  %14223 = vst [vmem:[#allocation90_spill] sm:$0xff] %v12798_v34 }
 0x365   : > { %14224 = vst [vmem:[#allocation91_spill] sm:$0xff] %v12801_v14  ;;  %v8382_v49 = vld [vmem:[%s13993_s1 + $0x778] sm:$0xff]  ;;  %v8383_v53 = vld [vmem:[%s13993_s1 + $0x780] sm:$0xff]  ;;  %v8384_v30 = vld [vmem:[%s13993_s1 + $0x788] sm:$0xff]  ;;  %v12889_v14 = vmul.f32 %v8380_v38, %v12772_v15 }
 0x366   : > { %v12815_v45 = vld [vmem:[#allocation2 + $0xa8] sm:$0xff]  ;;  %v12817_v28 = vld [vmem:[#allocation2 + $0xb0] sm:$0xff]  ;;  %v12819_v29 = vld [vmem:[#allocation2 + $0xb8] sm:$0xff]  ;;  %14225 = vst [vmem:[#allocation92_spill] sm:$0xff] %v12824_v32  ;;  %v12892_v32 = vmul.f32 %v8381_v19, %v12774_v10  ;;  %v12897_v55 = vmul.f32 %v8382_v49, %v12788_v41  ;;  %v12900_v60 = vmul.f32 %v8383_v53, %v12790_v8  ;;  %v12903_v1 = vmul.f32 %v8384_v30, %v12792_v63 }
 0x367   : > { %v8385_v43 = vld [vmem:[%s13993_s1 + $0x790] sm:$0xff]  ;;  %v8386_v24 = vld [vmem:[%s13993_s1 + $0x798] sm:$0xff]  ;;  %v8387_v17 = vld [vmem:[%s13993_s1 + $0x7a0] sm:$0xff]  ;;  %14226 = vst [vmem:[#allocation93_spill] sm:$0xff] %v12848_v23  ;;  %v14233_v23 = vpack.c.bf16 %v12690_v25, %v12724_v13 }
 0x368   : > { %v12838_v61 = vld [vmem:[#allocation2 + $0xc0] sm:$0xff]  ;;  %v12840_v35 = vld [vmem:[#allocation2 + $0xc8] sm:$0xff]  ;;  %14227 = vst [vmem:[#allocation94_spill] sm:$0xff] %v12851_v44  ;;  %v8389_v50 = vld [vmem:[%s13993_s1 + $0x7b0] sm:$0xff]  ;;  %9275 = vmatmul.mubr.msk.bf16.gmra.mrb[16].mxu1 %vm256_vm0, %v3950_v11  ;;  %v12922_v54 = vmul.f32 %v8385_v43, %v12815_v45 }
 0x369   : > { %v8388_v39 = vld [vmem:[%s13993_s1 + $0x7a8] sm:$0xff]  ;;  %v12859_v57 = vld [vmem:[#allocation2 + $0xe0] sm:$0xff]  ;;  %14228 = vst [vmem:[#allocation95_spill] sm:$0xff] %v12864_v48  ;;  %14229 = vst [vmem:[#allocation96_spill] sm:$0xff] %v12867_v20  ;;  %v12925_v48 = vmul.f32 %v8386_v24, %v12817_v28  ;;  %v12928_v20 = vmul.f32 %v8387_v17, %v12819_v29  ;;  %9278 = vmatprep.mubr.msk.bf16.mxu1 %vm256_vm0, %v14233_v23  ;;  %v12947_v30 = vmul.f32 %v8389_v50, %v12840_v35 }
 0x36a   : > { %v8390_v12 = vld [vmem:[%s13993_s1 + $0x7b8] sm:$0xff]  ;;  %v8391_v34 = vld [vmem:[%s13993_s1 + $0x7c0] sm:$0xff]  ;;  %v12878_v59 = vld [vmem:[#allocation2 + $0xd0] sm:$0xff]  ;;  %14230 = vst [vmem:[#allocation97_spill] sm:$0xff] %v12900_v60  ;;  %v12944_v17 = vmul.f32 %v8388_v39, %v12838_v61 }
 0x36b   : > { %v12880_v42 = vld [vmem:[#allocation2 + $0xd8] sm:$0xff]  ;;  %v12882_v9 = vld [vmem:[#allocation2 + $0xe8] sm:$0xff]  ;;  %14231 = vst [vmem:[#allocation98_spill] sm:$0xff] %v12903_v1  ;;  %v8393_v19 = vld [vmem:[%s13993_s1 + $0x7d0] sm:$0xff]  ;;  %v12958_v43 = vmul.f32 %v8390_v12, %v12878_v59 }
 0x36c   : > { %v8392_v38 = vld [vmem:[%s13993_s1 + $0x7c8] sm:$0xff]  ;;  %v8394_v52 = vld [vmem:[%s13993_s1 + $0x7d8] sm:$0xff]  ;;  %v12915_v49 = vld [vmem:[#allocation2 + $0xf0] sm:$0xff]  ;;  %14232 = vst [vmem:[#allocation99_spill] sm:$0xff] %v12928_v20  ;;  %v12961_v39 = vmul.f32 %v8391_v34, %v12880_v42  ;;  %v12969_v60 = vmul.f32 %v8393_v19, %v12882_v9 }
 0x36d   : > { %v12917_v53 = vld [vmem:[#allocation2 + $0xf8] sm:$0xff]  ;;  %v8395_v11 = vld [vmem:[%s13993_s1 + $0x7e0] sm:$0xff]  ;;  %v8396_v25 = vld [vmem:[%s13993_s1 + $0x7e8] sm:$0xff]  ;;  %v12964_v50 = vmul.f32 %v8392_v38, %v12859_v57  ;;  %v12972_v1 = vmul.f32 %v8394_v52, %v12915_v49  ;;  %v6589_v12 = vpack.c.bf16 %v12958_v43, %v12947_v30  ;;  %v3952_v52 = vpack.c.bf16 %v12786_v36, %v12766_v5 }
 0x36e   : > { %v12937_v44 = vld [vmem:[#allocation2 + $0x100] sm:$0xff]  ;;  %v12975_v13 = vmul.f32 %v8395_v11, %v12917_v53  ;;  %v3903_v34 = vld [vmem:[%s13993_s1 + $0xd0] sm:$0xff] }
 0x36f   : > { %v3901_v23 = vld [vmem:[%s13993_s1 + $0xc0] sm:$0xff]  ;;  %v12982_v38 = vmul.f32 %v8396_v25, %v12937_v44  ;;  %v3904_v25 = vld [vmem:[%s13993_s1 + $0xd8] sm:$0xff]  ;;  %v3935_v5 = vmul.f32 %v3903_v34, %v12232_v21  ;;  %v14371_v30 = vpack.c.bf16 %v12972_v1, %v12969_v60 }
 0x370   : > { %v3933_v24 = vmul.f32 %v3901_v23, %v12202_v51  ;;  %9279 = vmatmul.mubr.msk.bf16.gmra.mrb[20].mxu1 %vm256_vm0, %v3952_v52  ;;  %v3906_v51 = vld [vmem:[%s13993_s1 + $0xe8] sm:$0xff]  ;;  %v3936_v36 = vmul.f32 %v3904_v25, %v12240_v58  ;;  %v13010_v19 = vld [vmem:[#allocation2 + $0xff] sm:$0xff]  ;;  %v13019_v58 = vld [vmem:[#allocation2 + $0x11] sm:$0xff] }
 0x371   : > { %v3908_v21 = vld [vmem:[%s13993_s1 + $0xf8] sm:$0xff]  ;;  %v4552_v25 = vld [vmem:[#allocation2 + $0x9] sm:$0xff] }
 0x372   : > { %v3953_v20 = vpack.c.bf16 %v12813_v31, %v3933_v24  ;;  %v3905_v31 = vld [vmem:[%s13993_s1 + $0xe0] sm:$0xff]  ;;  %v3938_v24 = vmul.f32 %v3906_v51, %v12286_v18  ;;  %v3954_v11 = vpack.c.bf16 %v3936_v36, %v3935_v5  ;;  %v8068_v18 = vld [vmem:[%s13993_s1 + $0x208] sm:$0xff]  ;;  %v3940_v34 = vmul.f32 %v3908_v21, %v13010_v19  ;;  %v6871_v1 = vld [vmem:[#allocation2 + $0x31] sm:$0xff] }
 0x373   : > { %v3937_v23 = vmul.f32 %v3905_v31, %v12245_v26  ;;  %v8067_v51 = vld [vmem:[%s13993_s1 + $0x200] sm:$0xff]  ;;  %v4617_v5 = vmul.f32 %v8068_v18, %v13019_v58  ;;  %v8069_v31 = vld [vmem:[%s13993_s1 + $0x210] sm:$0xff] }
 0x374   : > { %9282 = vmatprep.mubr.msk.bf16.mxu1 %vm256_vm0, %v3953_v20  ;;  %v3907_v20 = vld [vmem:[%s13993_s1 + $0xf0] sm:$0xff]  ;;  %v6868_v43 = vld [vmem:[#allocation2 + $0x19] sm:$0xff] }
 0x375   : > { %v3955_v52 = vpack.c.bf16 %v3938_v24, %v3937_v23  ;;  %v3939_v26 = vmul.f32 %v3907_v20, %v12297_v56  ;;  %v13034_v23 = vld [vmem:[#allocation2 + $0x19] sm:$0xff]  ;;  %v8072_v20 = vld [vmem:[%s13993_s1 + $0x228] sm:$0xff] }
 0x376   : > { %v8070_v56 = vld [vmem:[%s13993_s1 + $0x218] sm:$0xff]  ;;  %v4618_v21 = vmul.f32 %v8069_v31, %v13034_v23  ;;  %v8073_v31 = vld [vmem:[%s13993_s1 + $0x230] sm:$0xff] }
 0x377   : > { %v3956_v36 = vpack.c.bf16 %v3940_v34, %v3939_v26  ;;  %v13048_v26 = vld [vmem:[#allocation2 + $0x29] sm:$0xff]  ;;  %v8071_v34 = vld [vmem:[%s13993_s1 + $0x220] sm:$0xff] }
 0x378   : > { %9283 = vmatmul.mubr.msk.bf16.gmra.mrb[24].mxu1 %vm256_vm0, %v3954_v11  ;;  %v4616_v11 = vmul.f32 %v8067_v51, %v4552_v25  ;;  %v4621_v25 = vmul.f32 %v8072_v20, %v12386_v47  ;;  %v4620_v51 = vmul.f32 %v8071_v34, %v13048_v26  ;;  %v8076_v47 = vld [vmem:[%s13993_s1 + $0x248] sm:$0xff]  ;;  %v10141_v34 = vld [vmem:[%s13996_s4 + $0x70] sm:$0xff]  }
 0x379   : > { %9286 = vmatprep.mubr.msk.bf16.mxu1 %vm256_vm0, %v3955_v52  ;;  %v13036_v52 = vld [vmem:[#allocation2 + $0x21] sm:$0xff] }
 0x37a   : > { %v4648_v24 = vpack.c.bf16 %v4617_v5, %v4616_v11  ;;  %v4619_v18 = vmul.f32 %v8070_v56, %v13036_v52  ;;  %v10140_v11 = vld [vmem:[%s13996_s4 + $0x68] sm:$0xff]   ;;  %v14234_v56 = vld [vmem:[#allocation33_spill] sm:$0xff] }
 0x37b   : > { %v4622_v20 = vmul.f32 %v8073_v31, %v14234_v56  ;;  %v8077_v31 = vld [vmem:[%s13993_s1 + $0x250] sm:$0xff]  ;;  %v14237_v56 = vld [vmem:[#allocation36_spill] sm:$0xff] }
 0x37c   : > { %v4649_v5 = vpack.c.bf16 %v4619_v18, %v4618_v21  ;;  %v8075_v18 = vld [vmem:[%s13993_s1 + $0x240] sm:$0xff] }
 0x380   : > { %9287 = vmatmul.mubr.msk.bf16.gmra.mrb[28].mxu1 %vm256_vm0, %v3956_v36  ;;  %v4650_v36 = vpack.c.bf16 %v4621_v25, %v4620_v51  ;;  %v4625_v25 = vmul.f32 %v8076_v47, %v12405_v4  ;;  %v14235_v51 = vld [vmem:[#allocation34_spill] sm:$0xff]  ;;  %v8080_v4 = vld [vmem:[%s13993_s1 + $0x268] sm:$0xff] }
 0x381   : > { %9298 = vmatprep.mubr.msk.bf16.mxu1 %vm256_vm0, %v4648_v24  ;;  %v8074_v24 = vld [vmem:[%s13993_s1 + $0x238] sm:$0xff] }
 0x382   : > { %v4623_v21 = vmul.f32 %v8074_v24, %v12390_v22  ;;  %v10142_v22 = vld [vmem:[%s13996_s4 + $0x78] sm:$0xff]  }
 0x383   : > { %v8078_v24 = vld [vmem:[%s13993_s1 + $0x258] sm:$0xff] }
 0x388   : > { %9299 = vmatmul.mubr.msk.bf16.vlgmr.msra.gmra.mrb[0].mxu1 %vm256_vm0, %v4649_v5  ;;  %v4624_v5 = vmul.f32 %v8075_v18, %v14235_v51  ;;  %v13102_v18 = vld [vmem:[%s13996_s4 + $0x80] sm:$0xff]  }
 0x389   : > { %9331 = vmatpush3.bf16.msra.mxu1 %v12600_v6  ;;  %9302 = vmatprep.mubr.msk.bf16.mxu1 %vm256_vm0, %v4650_v36  ;;  %v4651_v6 = vpack.c.bf16 %v4623_v21, %v4622_v20  ;;  %v4627_v20 = vmul.f32 %v8078_v24, %v14237_v56  ;;  %v8079_v21 = vld [vmem:[%s13993_s1 + $0x260] sm:$0xff]  ;;  %v8082_v24 = vld [vmem:[%s13993_s1 + $0x278] sm:$0xff] }
 0x38a   : > { %9332 = vmatprep.subr.bf16.mxu1 %v10140_v11  ;;  %v4652_v36 = vpack.c.bf16 %v4625_v25, %v4624_v5  ;;  %v14238_v25 = vld [vmem:[#allocation38_spill] sm:$0xff]  ;;  %v14239_v5 = vld [vmem:[#allocation37_spill] sm:$0xff] }
 0x38b   : > { %v4629_v51 = vmul.f32 %v8080_v4, %v14238_v25  ;;  %v8084_v4 = vld [vmem:[%s13993_s1 + $0x288] sm:$0xff] }
 0x38d   : > { %9333 = vmatpush3.bf16.msra.mxu1 %v10140_v11  ;;  %v14236_v11 = vld [vmem:[#allocation35_spill] sm:$0xff] }
 0x38e   : > { %9334 = vmatprep.subr.bf16.mxu1 %v10141_v34  ;;  %v4626_v47 = vmul.f32 %v8077_v31, %v14236_v11  ;;  %v8081_v31 = vld [vmem:[%s13993_s1 + $0x270] sm:$0xff] }
 0x390   : > { %9303 = vmatmul.mubr.msk.bf16.gmra.mrb[4].mxu1 %vm256_vm0, %v4651_v6  ;;  %v4628_v6 = vmul.f32 %v8079_v21, %v14239_v5  ;;  %v4633_v21 = vmul.f32 %v8084_v4, %v12469_v3  ;;  %v14242_v3 = vld [vmem:[#allocation43_spill] sm:$0xff] }
 0x391   : > { %9306 = vmatprep.mubr.msk.bf16.mxu1 %vm256_vm0, %v4652_v36  ;;  %9335 = vmatpush3.bf16.msra.mxu1 %v10141_v34  ;;  %v4653_v34 = vpack.c.bf16 %v4627_v20, %v4626_v47  ;;  %v14241_v47 = vld [vmem:[#allocation40_spill] sm:$0xff]  ;;  %v8083_v20 = vld [vmem:[%s13993_s1 + $0x280] sm:$0xff] }
 0x392   : > { %9336 = vmatprep.subr.bf16.mxu1 %v10142_v22  ;;  %v4654_v36 = vpack.c.bf16 %v4629_v51, %v4628_v6  ;;  %v4631_v56 = vmul.f32 %v8082_v24, %v14241_v47  ;;  %v4632_v25 = vmul.f32 %v8083_v20, %v12467_v33  ;;  %v8085_v6 = vld [vmem:[%s13993_s1 + $0x290] sm:$0xff]  ;;  %v8087_v24 = vld [vmem:[%s13993_s1 + $0x2a0] sm:$0xff]  ;;  %v8090_v20 = vld [vmem:[%s13993_s1 + $0x2b8] sm:$0xff] }
 0x393   : > { %v4634_v33 = vmul.f32 %v8085_v6, %v14242_v3  ;;  %v14245_v6 = vld [vmem:[#allocation54_spill] sm:$0xff] }
 0x394   : > { %v4656_v5 = vpack.c.bf16 %v4633_v21, %v4632_v25  ;;  %v8091_v25 = vld [vmem:[%s13993_s1 + $0x2c0] sm:$0xff] }
 0x395   : > { %9337 = vmatpush3.bf16.msra.mxu1 %v10142_v22  ;;  %v14240_v22 = vld [vmem:[#allocation39_spill] sm:$0xff] }
 0x396   : > { %9370 = vmatprep.subr.bf16.mxu1 %v13102_v18  ;;  %v4630_v11 = vmul.f32 %v8081_v31, %v14240_v22  ;;  %v4636_v22 = vmul.f32 %v8087_v24, %v12490_v16  ;;  %v14246_v24 = vld [vmem:[#allocation59_spill] sm:$0xff] }
 0x398   : > { %9307 = vmatmul.mubr.msk.bf16.gmra.mrb[8].mxu1 %vm256_vm0, %v4653_v34  ;;  %v4655_v51 = vpack.c.bf16 %v4631_v56, %v4630_v11  ;;  %v8086_v34 = vld [vmem:[%s13993_s1 + $0x298] sm:$0xff]  ;;  %v8089_v56 = vld [vmem:[%s13993_s1 + $0x2b0] sm:$0xff] }
 0x399   : > { %9310 = vmatprep.mubr.msk.bf16.mxu1 %vm256_vm0, %v4654_v36  ;;  %v8088_v36 = vld [vmem:[%s13993_s1 + $0x2a8] sm:$0xff]  ;;  %v4635_v31 = vmul.f32 %v8086_v34, %v12488_v46  ;;  %v4638_v16 = vmul.f32 %v8089_v56, %v12515_v37  ;;  %v4640_v34 = vmul.f32 %v8091_v25, %v14245_v6  ;;  %v8094_v37 = vld [vmem:[%s13993_s1 + $0x2d8] sm:$0xff]  ;;  %v14248_v56 = vld [vmem:[#allocation65_spill] sm:$0xff] }
 0x39a   : > { %v4637_v4 = vmul.f32 %v8088_v36, %v12492_v2  ;;  %v8092_v46 = vld [vmem:[%s13993_s1 + $0x2c8] sm:$0xff]  ;;  %v14243_v2 = vld [vmem:[#allocation53_spill] sm:$0xff]  ;;  %v14250_v6 = vld [vmem:[#allocation66_spill] sm:$0xff] }
 0x39b   : > { %v4657_v11 = vpack.c.bf16 %v4635_v31, %v4634_v33  ;;  %v4639_v21 = vmul.f32 %v8090_v20, %v14243_v2  ;;  %v8093_v33 = vld [vmem:[%s13993_s1 + $0x2d0] sm:$0xff]  ;;  %v8096_v31 = vld [vmem:[%s13993_s1 + $0x2e8] sm:$0xff] }
 0x39c   : > { %v4658_v47 = vpack.c.bf16 %v4637_v4, %v4636_v22  ;;  %v4642_v4 = vmul.f32 %v8093_v33, %v14246_v24  ;;  %v14247_v22 = vld [vmem:[#allocation60_spill] sm:$0xff]  ;;  %v4645_v20 = vmul.f32 %v8096_v31, %v14248_v56 }
 0x39d   : > { %v4659_v36 = vpack.c.bf16 %v4639_v21, %v4638_v16  ;;  %v13179_v25 = vld [vmem:[#allocation2 + $0x101] sm:$0xff] }
 0x39e   : > { %v14251_v33 = vld [vmem:[#allocation4_spill] sm:$0xff] }
 0x39f   : > { %v10144_v24 = vld [vmem:[%s13996_s4 + $0x88] sm:$0xff]  }
 0x3a0   : > { %9311 = vmatmul.mubr.msk.bf16.gmra.mrb[12].mxu1 %vm256_vm0, %v4655_v51  ;;  %v14244_v51 = vld [vmem:[#allocation55_spill] sm:$0xff]  ;;  %v14258_v56 = vld [vmem:[#allocation8_spill] sm:$0xff] }
 0x3a1   : > { %9314 = vmatprep.mubr.msk.bf16.mxu1 %vm256_vm0, %v4656_v5  ;;  %v4641_v5 = vmul.f32 %v8092_v46, %v14244_v51  ;;  %v14249_v46 = vld [vmem:[#allocation61_spill] sm:$0xff] }
 0x3a2   : > { %v8097_v51 = vld [vmem:[%s13993_s1 + $0x2f0] sm:$0xff] }
 0x3a3   : > { %v4660_v3 = vpack.c.bf16 %v4641_v5, %v4640_v34  ;;  %v8098_v5 = vld [vmem:[%s13993_s1 + $0x2f8] sm:$0xff]  ;;  %v4646_v34 = vmul.f32 %v8097_v51, %v14250_v6 }
 0x3a8   : > { %9315 = vmatmul.mubr.msk.bf16.gmra.mrb[16].mxu1 %vm256_vm0, %v4657_v11  ;;  %v4643_v11 = vmul.f32 %v8094_v37, %v14247_v22  ;;  %v14252_v37 = vld [vmem:[#allocation3_spill] sm:$0xff]  ;;  %v14255_v22 = vld [vmem:[#allocation6_spill] sm:$0xff] }
 0x3a9   : > { %9318 = vmatprep.mubr.msk.bf16.mxu1 %vm256_vm0, %v4658_v47  ;;  %v8095_v47 = vld [vmem:[%s13993_s1 + $0x2e0] sm:$0xff]  ;;  %v14253_v31 = vpack.c.bf16 %v14251_v33, %v14252_v37  ;;  %v14269_v37 = vld [vmem:[#allocation16_spill] sm:$0xff] }
 0x3aa   : > { %v4644_v16 = vmul.f32 %v8095_v47, %v14249_v46  ;;  %v4661_v2 = vpack.c.bf16 %v4643_v11, %v4642_v4  ;;  %v14254_v4 = vld [vmem:[#allocation5_spill] sm:$0xff]  ;;  %v14257_v47 = vld [vmem:[#allocation7_spill] sm:$0xff] }
 0x3ab   : > { %v14256_v11 = vpack.c.bf16 %v14254_v4, %v14255_v22  ;;  %v10145_v46 = vld [vmem:[%s13996_s4 + $0x90] sm:$0xff]   ;;  %v14272_v4 = vld [vmem:[#allocation18_spill] sm:$0xff] }
 0x3ac   : > { %v4662_v21 = vpack.c.bf16 %v4645_v20, %v4644_v16  ;;  %v14259_v20 = vpack.c.bf16 %v14257_v47, %v14258_v56  ;;  %v10146_v16 = vld [vmem:[%s13996_s4 + $0x98] sm:$0xff]   ;;  %v14273_v22 = vld [vmem:[#allocation17_spill] sm:$0xff]  ;;  %v14275_v47 = vld [vmem:[#allocation20_spill] sm:$0xff] }
 0x3ad   : > { %v14276_v56 = vld [vmem:[#allocation19_spill] sm:$0xff] }
 0x3b0   : > { %9319 = vmatmul.mubr.msk.bf16.gmra.mrb[20].mxu1 %vm256_vm0, %v4659_v36  ;;  %v4647_v36 = vmul.f32 %v8098_v5, %v13179_v25  ;;  %v14264_v5 = vld [vmem:[#allocation11_spill] sm:$0xff] }
 0x3b1   : > { %9322 = vmatprep.mubr.msk.bf16.mxu1 %vm256_vm0, %v4660_v3 }
 0x3b2   : > { %v4663_v3 = vpack.c.bf16 %v4647_v36, %v4646_v34  ;;  %v10147_v34 = vld [vmem:[%s13996_s4 + $0xa0] sm:$0xff]   ;;  %v14266_v36 = vld [vmem:[#allocation14_spill] sm:$0xff] }
 0x3b8   : > { %9323 = vmatmul.mubr.msk.bf16.gmra.mrb[24].mxu1 %vm256_vm0, %v4661_v2  ;;  %v14260_v2 = vld [vmem:[#allocation10_spill] sm:$0xff] }
 0x3b9   : > { %9326 = vmatprep.mubr.msk.bf16.mxu1 %vm256_vm0, %v4662_v21  ;;  %v14261_v21 = vld [vmem:[#allocation9_spill] sm:$0xff] }
 0x3ba   : > { %v14262_v51 = vpack.c.bf16 %v14260_v2, %v14261_v21  ;;  %v14281_v21 = vld [vmem:[#allocation24_spill] sm:$0xff] }
 0x3c0   : > { %9327 = vmatmul.mubr.msk.bf16.gmra.mrb[28].mxu1 %vm256_vm0, %v4663_v3  ;;  %v14267_v3 = vld [vmem:[#allocation13_spill] sm:$0xff] }
 0x3c1   : > { %9338 = vmatprep.mubr.msk.bf16.mxu1 %vm256_vm0, %v14253_v31  ;;  %v14268_v33 = vpack.c.bf16 %v14266_v36, %v14267_v3  ;;  %v14270_v31 = vld [vmem:[#allocation15_spill] sm:$0xff]  ;;  %v14287_v3 = vld [vmem:[#allocation28_spill] sm:$0xff] }
 0x3c8   : > { %9339 = vmatmul.mubr.msk.bf16.vlgmr.msra.gmra.mrb[0].mxu1 %vm256_vm0, %v14256_v11  ;;  %v14274_v11 = vpack.c.bf16 %v14272_v4, %v14273_v22  ;;  %v8158_v4 = vld [vmem:[%s13993_s1 + $0x3f8] sm:$0xff] }
 0x3c9   : > { %9371 = vmatpush3.bf16.msra.mxu1 %v13102_v18  ;;  %9342 = vmatprep.mubr.msk.bf16.mxu1 %vm256_vm0, %v14259_v20  ;;  %v14263_v18 = vld [vmem:[#allocation12_spill] sm:$0xff]  ;;  %v14277_v20 = vpack.c.bf16 %v14275_v47, %v14276_v56  ;;  %v14290_v22 = vld [vmem:[#allocation30_spill] sm:$0xff] }
 0x3ca   : > { %9372 = vmatprep.subr.bf16.mxu1 %v10144_v24  ;;  %v14265_v6 = vpack.c.bf16 %v14263_v18, %v14264_v5  ;;  %v14284_v5 = vld [vmem:[#allocation26_spill] sm:$0xff]  ;;  %v8188_v56 = vld [vmem:[%s13993_s1 + $0x408] sm:$0xff] }
 0x3cd   : > { %9373 = vmatpush3.bf16.msra.mxu1 %v10144_v24  ;;  %v14271_v24 = vpack.c.bf16 %v14269_v37, %v14270_v31  ;;  %v13257_v31 = vld [vmem:[#allocation2 + $0x107] sm:$0xff] }
 0x3ce   : > { %9374 = vmatprep.subr.bf16.mxu1 %v10145_v46 }
 0x3d0   : > { %9343 = vmatmul.mubr.msk.bf16.gmra.mrb[4].mxu1 %vm256_vm0, %v14262_v51  ;;  %v14282_v51 = vld [vmem:[#allocation23_spill] sm:$0xff] }
 0x3d1   : > { %9346 = vmatprep.mubr.msk.bf16.mxu1 %vm256_vm0, %v14265_v6  ;;  %9375 = vmatpush3.bf16.msra.mxu1 %v10145_v46  ;;  %v14278_v46 = vld [vmem:[#allocation22_spill] sm:$0xff]  ;;  %v14283_v18 = vpack.c.bf16 %v14281_v21, %v14282_v51  ;;  %v14285_v6 = vld [vmem:[#allocation25_spill] sm:$0xff]  ;;  %v5033_v21 = vmul.f32 %v8158_v4, %v13257_v31 }
 0x3d2   : > { %9376 = vmatprep.subr.bf16.mxu1 %v10146_v16  ;;  %v14286_v36 = vpack.c.bf16 %v14284_v5, %v14285_v6  ;;  %v5324_v51 = vld [vmem:[#allocation2 + $0x10] sm:$0xff]  ;;  %v14296_v5 = vld [vmem:[#allocation76_spill] sm:$0xff]  ;;  %v14297_v4 = vld [vmem:[#allocation78_spill] sm:$0xff] }
 0x3d3   : > { %v5389_v6 = vmul.f32 %v8188_v56, %v14296_v5  ;;  %v8194_v5 = vld [vmem:[%s13993_s1 + $0x438] sm:$0xff] }
 0x3d5   : > { %9377 = vmatpush3.bf16.msra.mxu1 %v10146_v16  ;;  %v14279_v16 = vld [vmem:[#allocation21_spill] sm:$0xff] }
 0x3d6   : > { %9410 = vmatprep.subr.bf16.mxu1 %v10147_v34  ;;  %v14280_v2 = vpack.c.bf16 %v14278_v46, %v14279_v16  ;;  %v14294_v46 = vld [vmem:[#allocation31_spill] sm:$0xff] }
 0x3d8   : > { %9347 = vmatmul.mubr.msk.bf16.gmra.mrb[8].mxu1 %vm256_vm0, %v14268_v33  ;;  %v14288_v33 = vld [vmem:[#allocation27_spill] sm:$0xff] }
 0x3d9   : > { %9350 = vmatprep.mubr.msk.bf16.mxu1 %vm256_vm0, %v14271_v24  ;;  %v14289_v37 = vpack.c.bf16 %v14287_v3, %v14288_v33  ;;  %v8157_v24 = vld [vmem:[%s13993_s1 + $0x3f0] sm:$0xff] }
 0x3e0   : > { %9351 = vmatmul.mubr.msk.bf16.gmra.mrb[12].mxu1 %vm256_vm0, %v14274_v11  ;;  %v14291_v11 = vld [vmem:[#allocation29_spill] sm:$0xff] }
 0x3e1   : > { %9354 = vmatprep.mubr.msk.bf16.mxu1 %vm256_vm0, %v14277_v20  ;;  %v14292_v47 = vpack.c.bf16 %v14290_v22, %v14291_v11  ;;  %v14293_v20 = vld [vmem:[#allocation32_spill] sm:$0xff]  ;;  %v8191_v11 = vld [vmem:[%s13993_s1 + $0x420] sm:$0xff] }
 0x3e2   : > { %v14295_v16 = vpack.c.bf16 %v14293_v20, %v14294_v46  ;;  %v14299_v20 = vld [vmem:[#allocation77_spill] sm:$0xff] }
 0x3e8   : > { %9355 = vmatmul.mubr.msk.bf16.gmra.mrb[16].mxu1 %vm256_vm0, %v14280_v2  ;;  %v5032_v2 = vmul.f32 %v8157_v24, %v13010_v19  ;;  %v8192_v19 = vld [vmem:[%s13993_s1 + $0x428] sm:$0xff]  ;;  %v8189_v24 = vld [vmem:[%s13993_s1 + $0x410] sm:$0xff] }
 0x3e9   : > { %9358 = vmatprep.mubr.msk.bf16.mxu1 %vm256_vm0, %v14283_v18  ;;  %v8187_v18 = vld [vmem:[%s13993_s1 + $0x400] sm:$0xff]  ;;  %v5390_v46 = vmul.f32 %v8189_v24, %v14299_v20  ;;  %v8198_v20 = vld [vmem:[%s13993_s1 + $0x458] sm:$0xff] }
 0x3ea   : > { %v5049_v3 = vpack.c.bf16 %v5033_v21, %v5032_v2 }
 0x3f0   : > { %9359 = vmatmul.mubr.msk.bf16.gmra.mrb[20].mxu1 %vm256_vm0, %v14286_v36  ;;  %v5388_v36 = vmul.f32 %v8187_v18, %v5324_v51  ;;  %v10148_v51 = vld [vmem:[%s13996_s4 + $0xa8] sm:$0xff]  }
 0x3f1   : > { %9362 = vmatprep.mubr.msk.bf16.mxu1 %vm256_vm0, %v14289_v37  ;;  %v8190_v37 = vld [vmem:[%s13993_s1 + $0x418] sm:$0xff] }
 0x3f2   : > { %v5420_v33 = vpack.c.bf16 %v5389_v6, %v5388_v36  ;;  %v5391_v22 = vmul.f32 %v8190_v37, %v14297_v4  ;;  %v8196_v6 = vld [vmem:[%s13993_s1 + $0x448] sm:$0xff]  ;;  %v8193_v36 = vld [vmem:[%s13993_s1 + $0x430] sm:$0xff]  ;;  %v8195_v37 = vld [vmem:[%s13993_s1 + $0x440] sm:$0xff] }
 0x3f3   : > { %v5397_v24 = vmul.f32 %v8196_v6, %v12744_v27  ;;  %v8200_v27 = vld [vmem:[%s13993_s1 + $0x468] sm:$0xff] }
 0x3f4   : > { %v5421_v21 = vpack.c.bf16 %v5391_v22, %v5390_v46  ;;  %v5396_v22 = vmul.f32 %v8195_v37, %v12742_v7  ;;  %v8197_v7 = vld [vmem:[%s13993_s1 + $0x450] sm:$0xff]  ;;  %v14303_v46 = vld [vmem:[#allocation84_spill] sm:$0xff] }
 0x3f8   : > { %9363 = vmatmul.mubr.msk.bf16.gmra.mrb[24].mxu1 %vm256_vm0, %v14292_v47  ;;  %v14298_v47 = vld [vmem:[#allocation81_spill] sm:$0xff] }
 0x3f9   : > { %9366 = vmatprep.mubr.msk.bf16.mxu1 %vm256_vm0, %v14295_v16  ;;  %v5393_v56 = vmul.f32 %v8192_v19, %v14298_v47  ;;  %v14300_v16 = vld [vmem:[#allocation79_spill] sm:$0xff]  ;;  %v10149_v19 = vld [vmem:[%s13996_s4 + $0xb0] sm:$0xff]   ;;  %v10150_v47 = vld [vmem:[%s13996_s4 + $0xb8] sm:$0xff]  }
 0x3fa   : > { %v5392_v2 = vmul.f32 %v8191_v11, %v14300_v16  ;;  %v5399_v16 = vmul.f32 %v8198_v20, %v14303_v46 }
 0x3fc   : > { %v5422_v18 = vpack.c.bf16 %v5393_v56, %v5392_v2  ;;  %v5424_v56 = vpack.c.bf16 %v5397_v24, %v5396_v22  ;;  %v8199_v2 = vld [vmem:[%s13993_s1 + $0x460] sm:$0xff]  ;;  %v8204_v24 = vld [vmem:[%s13993_s1 + $0x488] sm:$0xff] }
 0x3fd   : > { %v8203_v22 = vld [vmem:[%s13993_s1 + $0x480] sm:$0xff] }
 0x400   : > { %9367 = vmatmul.mubr.msk.bf16.gmra.mrb[28].mxu1 %vm256_vm0, %v5049_v3  ;;  %v14301_v3 = vld [vmem:[#allocation82_spill] sm:$0xff] }
 0x401   : > { %9378 = vmatprep.mubr.msk.bf16.mxu1 %vm256_vm0, %v5420_v33  ;;  %v5395_v33 = vmul.f32 %v8194_v5, %v14301_v3  ;;  %v14305_v5 = vld [vmem:[#allocation83_spill] sm:$0xff] }
 0x402   : > { %v5398_v6 = vmul.f32 %v8197_v7, %v14305_v5  ;;  %v8206_v7 = vld [vmem:[%s13993_s1 + $0x498] sm:$0xff] }
 0x403   : > { %v8210_v5 = vld [vmem:[%s13993_s1 + $0x4b8] sm:$0xff] }
 0x408   : > { %9379 = vmatmul.mubr.msk.bf16.vlgmr.msra.gmra.mrb[0].mxu1 %vm256_vm0, %v5421_v21  ;;  %v13345_v21 = vld [vmem:[%s13996_s4 + $0xc0] sm:$0xff]  }
 0x409   : > { %9411 = vmatpush3.bf16.msra.mxu1 %v10147_v34  ;;  %9382 = vmatprep.mubr.msk.bf16.mxu1 %vm256_vm0, %v5422_v18  ;;  %v14302_v34 = vld [vmem:[#allocation80_spill] sm:$0xff] }
 0x40a   : > { %9412 = vmatprep.subr.bf16.mxu1 %v10148_v51  ;;  %v5394_v4 = vmul.f32 %v8193_v36, %v14302_v34  ;;  %v14306_v36 = vld [vmem:[#allocation86_spill] sm:$0xff]  ;;  %v8201_v34 = vld [vmem:[%s13993_s1 + $0x470] sm:$0xff] }
 0x40b   : > { %v5400_v3 = vmul.f32 %v8199_v2, %v14306_v36 }
 0x40c   : > { %v5423_v11 = vpack.c.bf16 %v5395_v33, %v5394_v4  ;;  %v5425_v33 = vpack.c.bf16 %v5399_v16, %v5398_v6 }
 0x40d   : > { %9413 = vmatpush3.bf16.msra.mxu1 %v10148_v51  ;;  %v14304_v51 = vld [vmem:[#allocation87_spill] sm:$0xff] }
 0x40e   : > { %9414 = vmatprep.subr.bf16.mxu1 %v10149_v19  ;;  %v5401_v18 = vmul.f32 %v8200_v27, %v14304_v51 }
 0x410   : > { %9383 = vmatmul.mubr.msk.bf16.gmra.mrb[4].mxu1 %vm256_vm0, %v5423_v11  ;;  %v5426_v37 = vpack.c.bf16 %v5401_v18, %v5400_v3  ;;  %v5405_v11 = vmul.f32 %v8204_v24, %v12790_v8  ;;  %v8207_v8 = vld [vmem:[%s13993_s1 + $0x4a0] sm:$0xff] }
 0x411   : > { %9386 = vmatprep.mubr.msk.bf16.mxu1 %vm256_vm0, %v5424_v56  ;;  %9415 = vmatpush3.bf16.msra.mxu1 %v10149_v19  ;;  %v8202_v19 = vld [vmem:[%s13993_s1 + $0x478] sm:$0xff]  ;;  %v5404_v56 = vmul.f32 %v8203_v22, %v12788_v41  ;;  %v5407_v41 = vmul.f32 %v8206_v7, %v12815_v45  ;;  %v5408_v2 = vmul.f32 %v8207_v8, %v12817_v28  ;;  %v8212_v45 = vld [vmem:[%s13993_s1 + $0x4c8] sm:$0xff]  ;;  %v8249_v8 = vld [vmem:[%s13993_s1 + $0x510] sm:$0xff] }
 0x412   : > { %9416 = vmatprep.subr.bf16.mxu1 %v10150_v47  ;;  %v5403_v4 = vmul.f32 %v8202_v19, %v12774_v10  ;;  %v8208_v10 = vld [vmem:[%s13993_s1 + $0x4a8] sm:$0xff]  ;;  %v5411_v28 = vmul.f32 %v8210_v5, %v12840_v35  ;;  %v5413_v6 = vmul.f32 %v8212_v45, %v12880_v42  ;;  %v8214_v19 = vld [vmem:[%s13993_s1 + $0x4d8] sm:$0xff]  ;;  %v8215_v42 = vld [vmem:[%s13993_s1 + $0x4e0] sm:$0xff] }
 0x413   : > { %v5428_v27 = vpack.c.bf16 %v5405_v11, %v5404_v56  ;;  %v5409_v46 = vmul.f32 %v8208_v10, %v12819_v29  ;;  %v8211_v29 = vld [vmem:[%s13993_s1 + $0x4c0] sm:$0xff]  ;;  %v8216_v35 = vld [vmem:[%s13993_s1 + $0x4e8] sm:$0xff]  ;;  %v8218_v56 = vld [vmem:[%s13993_s1 + $0x4f8] sm:$0xff] }
 0x414   : > { %v5412_v3 = vmul.f32 %v8211_v29, %v12878_v59  ;;  %v5415_v59 = vmul.f32 %v8214_v19, %v12882_v9  ;;  %v5417_v24 = vmul.f32 %v8216_v35, %v12917_v53  ;;  %v8247_v9 = vld [vmem:[%s13993_s1 + $0x500] sm:$0xff]  ;;  %v14311_v5 = vld [vmem:[#allocation44_spill] sm:$0xff] }
 0x415   : > { %9417 = vmatpush3.bf16.msra.mxu1 %v10150_v47  ;;  %v5402_v47 = vmul.f32 %v8201_v34, %v12772_v15  ;;  %v8205_v15 = vld [vmem:[%s13993_s1 + $0x490] sm:$0xff]  ;;  %v5430_v18 = vpack.c.bf16 %v5409_v46, %v5408_v2  ;;  %v10155_v29 = vld [vmem:[%s13996_s4 + $0xe0] sm:$0xff]   ;;  %v14322_v35 = vld [vmem:[#allocation56_spill] sm:$0xff] }
 0x416   : > { %9450 = vmatprep.subr.bf16.mxu1 %v13345_v21  ;;  %v5406_v16 = vmul.f32 %v8205_v15, %v12792_v63  ;;  %v8209_v63 = vld [vmem:[%s13993_s1 + $0x4b0] sm:$0xff] }
 0x417   : > { %v5427_v20 = vpack.c.bf16 %v5403_v4, %v5402_v47  ;;  %v5410_v36 = vmul.f32 %v8209_v63, %v12838_v61  ;;  %v8213_v61 = vld [vmem:[%s13993_s1 + $0x4d0] sm:$0xff]  ;;  %v5416_v4 = vmul.f32 %v8215_v42, %v12915_v49  ;;  %v13423_v47 = vld [vmem:[#allocation2 + $0x108] sm:$0xff]  ;;  %v14314_v63 = vld [vmem:[#allocation46_spill] sm:$0xff] }
 0x418   : > { %9387 = vmatmul.mubr.msk.bf16.gmra.mrb[8].mxu1 %vm256_vm0, %v5425_v33  ;;  %v5429_v51 = vpack.c.bf16 %v5407_v41, %v5406_v16  ;;  %v5414_v34 = vmul.f32 %v8213_v61, %v12859_v57  ;;  %v8248_v57 = vld [vmem:[%s13993_s1 + $0x508] sm:$0xff]  ;;  %v8217_v49 = vld [vmem:[%s13993_s1 + $0x4f0] sm:$0xff]  ;;  %v5419_v53 = vmul.f32 %v8218_v56, %v13423_v47  ;;  %v8250_v41 = vld [vmem:[%s13993_s1 + $0x518] sm:$0xff] }
 0x419   : > { %9390 = vmatprep.mubr.msk.bf16.mxu1 %vm256_vm0, %v5426_v37  ;;  %v5431_v33 = vpack.c.bf16 %v5411_v28, %v5410_v36  ;;  %v5432_v37 = vpack.c.bf16 %v5413_v6, %v5412_v3  ;;  %v5434_v11 = vpack.c.bf16 %v5417_v24, %v5416_v4  ;;  %v5418_v7 = vmul.f32 %v8217_v49, %v12937_v44  ;;  %v10152_v44 = vld [vmem:[%s13996_s4 + $0xc8] sm:$0xff]   ;;  %v14307_v16 = vld [vmem:[#allocation42_spill] sm:$0xff]  ;;  %v14308_v2 = vld [vmem:[#allocation41_spill] sm:$0xff] }
 0x41a   : > { %v5433_v22 = vpack.c.bf16 %v5415_v59, %v5414_v34  ;;  %v14316_v6 = vld [vmem:[#allocation49_spill] sm:$0xff]  ;;  %v14317_v36 = vld [vmem:[#allocation48_spill] sm:$0xff]  ;;  %v14325_v42 = vld [vmem:[#allocation58_spill] sm:$0xff] }
 0x41b   : > { %v5435_v10 = vpack.c.bf16 %v5419_v53, %v5418_v7  ;;  %v14318_v3 = vpack.c.bf16 %v14316_v6, %v14317_v36  ;;  %v14323_v61 = vld [vmem:[#allocation52_spill] sm:$0xff]  ;;  %v14326_v24 = vld [vmem:[#allocation57_spill] sm:$0xff]  ;;  %v14328_v4 = vld [vmem:[#allocation63_spill] sm:$0xff] }
 0x41c   : > { %v14324_v59 = vpack.c.bf16 %v14322_v35, %v14323_v61  ;;  %v14327_v34 = vpack.c.bf16 %v14325_v42, %v14326_v24  ;;  %v14331_v56 = vld [vmem:[#allocation67_spill] sm:$0xff]  ;;  %v14334_v49 = vld [vmem:[#allocation69_spill] sm:$0xff]  ;;  %v14335_v53 = vld [vmem:[#allocation68_spill] sm:$0xff] }
 0x41d   : > { %v14338_v7 = vld [vmem:[#allocation70_spill] sm:$0xff]  ;;  %v6099_v36 = vld [vmem:[#allocation2 + $0x2f] sm:$0xff]  ;;  %v6098_v35 = vld [vmem:[#allocation2 + $0x27] sm:$0xff] }
 0x41e   : > { %v8309_v61 = vld [vmem:[%s13993_s1 + $0x610] sm:$0xff] }
 0x420   : > { %9391 = vmatmul.mubr.msk.bf16.gmra.mrb[12].mxu1 %vm256_vm0, %v5427_v20  ;;  %v5774_v20 = vmul.f32 %v8247_v9, %v13019_v58  ;;  %v5777_v58 = vmul.f32 %v8250_v41, %v13048_v26  ;;  %v10153_v26 = vld [vmem:[%s13996_s4 + $0xd0] sm:$0xff]   ;;  %v14332_v9 = vld [vmem:[#allocation64_spill] sm:$0xff] }
 0x421   : > { %9394 = vmatprep.mubr.msk.bf16.mxu1 %vm256_vm0, %v5428_v27  ;;  %v5775_v27 = vmul.f32 %v8248_v57, %v13034_v23  ;;  %v5776_v23 = vmul.f32 %v8249_v8, %v13036_v52  ;;  %v10154_v52 = vld [vmem:[%s13996_s4 + $0xd8] sm:$0xff]   ;;  %v14333_v57 = vpack.c.bf16 %v14331_v56, %v14332_v9  ;;  %v13514_v41 = vld [vmem:[#allocation2 + $0x109] sm:$0xff] }
 0x422   : > { %v8277_v8 = vld [vmem:[%s13993_s1 + $0x5f0] sm:$0xff]  ;;  %v8314_v9 = vld [vmem:[%s13993_s1 + $0x638] sm:$0xff] }
 0x423   : > { %v5806_v15 = vpack.c.bf16 %v5775_v27, %v5774_v20  ;;  %v5807_v46 = vpack.c.bf16 %v5777_v58, %v5776_v23  ;;  %v14336_v20 = vpack.c.bf16 %v14334_v49, %v14335_v53  ;;  %v14337_v27 = vld [vmem:[#allocation71_spill] sm:$0xff]  ;;  %v8278_v58 = vld [vmem:[%s13993_s1 + $0x5f8] sm:$0xff]  ;;  %v14340_v23 = vld [vmem:[#allocation73_spill] sm:$0xff] }
 0x424   : > { %v6103_v56 = vld [vmem:[#allocation2 + $0x4f] sm:$0xff]  ;;  %v6104_v49 = vld [vmem:[#allocation2 + $0x57] sm:$0xff]  ;;  %v6105_v53 = vld [vmem:[#allocation2 + $0x5f] sm:$0xff] }
 0x428   : > { %9395 = vmatmul.mubr.msk.bf16.gmra.mrb[16].mxu1 %vm256_vm0, %v5429_v51  ;;  %v14309_v51 = vpack.c.bf16 %v14307_v16, %v14308_v2  ;;  %v6096_v16 = vld [vmem:[#allocation2 + $0x17] sm:$0xff]  ;;  %v6097_v2 = vld [vmem:[#allocation2 + $0x1f] sm:$0xff] }
 0x429   : > { %9398 = vmatprep.mubr.msk.bf16.mxu1 %vm256_vm0, %v5430_v18  ;;  %v14310_v18 = vld [vmem:[#allocation45_spill] sm:$0xff] }
 0x42a   : > { %v14312_v45 = vpack.c.bf16 %v14310_v18, %v14311_v5  ;;  %v5804_v5 = vmul.f32 %v8277_v8, %v13179_v25  ;;  %v8312_v25 = vld [vmem:[%s13993_s1 + $0x628] sm:$0xff] }
 0x430   : > { %9399 = vmatmul.mubr.msk.bf16.gmra.mrb[20].mxu1 %vm256_vm0, %v5431_v33  ;;  %v14319_v33 = vld [vmem:[#allocation51_spill] sm:$0xff] }
 0x431   : > { %9402 = vmatprep.mubr.msk.bf16.mxu1 %vm256_vm0, %v5432_v37  ;;  %v14320_v37 = vld [vmem:[#allocation50_spill] sm:$0xff] }
 0x432   : > { %v14321_v19 = vpack.c.bf16 %v14319_v33, %v14320_v37  ;;  %v8311_v33 = vld [vmem:[%s13993_s1 + $0x620] sm:$0xff]  ;;  %v6100_v37 = vld [vmem:[#allocation2 + $0x37] sm:$0xff] }
 0x433   : > { %v6164_v42 = vmul.f32 %v8311_v33, %v6100_v37  ;;  %v6111_v37 = vld [vmem:[#allocation2 + $0x8f] sm:$0xff] }
 0x438   : > { %9403 = vmatmul.mubr.msk.bf16.gmra.mrb[24].mxu1 %vm256_vm0, %v5433_v22  ;;  %v14329_v22 = vld [vmem:[#allocation62_spill] sm:$0xff] }
 0x439   : > { %9406 = vmatprep.mubr.msk.bf16.mxu1 %vm256_vm0, %v5434_v11  ;;  %v14330_v11 = vpack.c.bf16 %v14328_v4, %v14329_v22  ;;  %v10156_v22 = vld [vmem:[%s13996_s4 + $0xe8] sm:$0xff]  }
 0x440   : > { %9407 = vmatmul.mubr.msk.bf16.gmra.mrb[28].mxu1 %vm256_vm0, %v5435_v10  ;;  %v14339_v10 = vpack.c.bf16 %v14337_v27, %v14338_v7  ;;  %v6102_v27 = vld [vmem:[#allocation2 + $0x47] sm:$0xff]  ;;  %v8313_v7 = vld [vmem:[%s13993_s1 + $0x630] sm:$0xff] }
 0x441   : > { %9418 = vmatprep.mubr.msk.bf16.mxu1 %vm256_vm0, %v5806_v15  ;;  %v8307_v15 = vld [vmem:[%s13993_s1 + $0x600] sm:$0xff] }
 0x448   : > { %9419 = vmatmul.mubr.msk.bf16.vlgmr.msra.gmra.mrb[0].mxu1 %vm256_vm0, %v5807_v46  ;;  %v14341_v46 = vld [vmem:[#allocation72_spill] sm:$0xff] }
 0x449   : > { %9451 = vmatpush3.bf16.msra.mxu1 %v13345_v21  ;;  %9422 = vmatprep.mubr.msk.bf16.mxu1 %vm256_vm0, %v14309_v51  ;;  %v14313_v21 = vld [vmem:[#allocation47_spill] sm:$0xff]  ;;  %v8308_v51 = vld [vmem:[%s13993_s1 + $0x608] sm:$0xff] }
 0x44a   : > { %9452 = vmatprep.subr.bf16.mxu1 %v10152_v44  ;;  %v14315_v28 = vpack.c.bf16 %v14313_v21, %v14314_v63  ;;  %v6160_v21 = vmul.f32 %v8307_v15, %v6096_v16  ;;  %v6161_v63 = vmul.f32 %v8308_v51, %v6097_v2  ;;  %v10157_v15 = vld [vmem:[%s13996_s4 + $0xf0] sm:$0xff]   ;;  %v8318_v2 = vld [vmem:[%s13993_s1 + $0x658] sm:$0xff]  ;;  %v8319_v51 = vld [vmem:[%s13993_s1 + $0x660] sm:$0xff] }
 0x44b   : > { %v6107_v16 = vld [vmem:[#allocation2 + $0x6f] sm:$0xff] }
 0x44c   : > { %v6192_v6 = vpack.c.bf16 %v6161_v63, %v6160_v21  ;;  %v6171_v21 = vmul.f32 %v8318_v2, %v6107_v16  ;;  %v13589_v63 = vld [vmem:[%s13996_s4 + $0x100] sm:$0xff]   ;;  %v6119_v16 = vld [vmem:[#allocation2 + $0xcf] sm:$0xff]  ;;  %v8330_v2 = vld [vmem:[%s13993_s1 + $0x6b8] sm:$0xff] }
 0x44d   : > { %9453 = vmatpush3.bf16.msra.mxu1 %v10152_v44  ;;  %v14342_v44 = vpack.c.bf16 %v14340_v23, %v14341_v46  ;;  %v6166_v23 = vmul.f32 %v8313_v7, %v6102_v27  ;;  %v6117_v27 = vld [vmem:[#allocation2 + $0xbf] sm:$0xff]  ;;  %v8328_v7 = vld [vmem:[%s13993_s1 + $0x6a8] sm:$0xff] }
 0x44e   : > { %9454 = vmatprep.subr.bf16.mxu1 %v10153_v26 }
 0x450   : > { %9423 = vmatmul.mubr.msk.bf16.gmra.mrb[4].mxu1 %vm256_vm0, %v14312_v45  ;;  %v5805_v45 = vmul.f32 %v8278_v58, %v13514_v41 }
 0x451   : > { %9426 = vmatprep.mubr.msk.bf16.mxu1 %vm256_vm0, %v14315_v28  ;;  %9455 = vmatpush3.bf16.msra.mxu1 %v10153_v26  ;;  %v14343_v26 = vld [vmem:[#allocation75_spill] sm:$0xff] }
 0x452   : > { %9456 = vmatprep.subr.bf16.mxu1 %v10154_v52  ;;  %v5821_v28 = vpack.c.bf16 %v5805_v45, %v5804_v5  ;;  %v6106_v5 = vld [vmem:[#allocation2 + $0x67] sm:$0xff]  ;;  %v8317_v45 = vld [vmem:[%s13993_s1 + $0x650] sm:$0xff] }
 0x455   : > { %9457 = vmatpush3.bf16.msra.mxu1 %v10154_v52  ;;  %v14344_v52 = vld [vmem:[#allocation74_spill] sm:$0xff] }
 0x456   : > { %9490 = vmatprep.subr.bf16.mxu1 %v10155_v29  ;;  %v14345_v18 = vpack.c.bf16 %v14343_v26, %v14344_v52  ;;  %v6108_v26 = vld [vmem:[#allocation2 + $0x77] sm:$0xff]  ;;  %v6109_v52 = vld [vmem:[#allocation2 + $0x7f] sm:$0xff] }
 0x458   : > { %9427 = vmatmul.mubr.msk.bf16.gmra.mrb[8].mxu1 %vm256_vm0, %v14318_v3  ;;  %v8310_v3 = vld [vmem:[%s13993_s1 + $0x618] sm:$0xff] }
 0x459   : > { %9430 = vmatprep.mubr.msk.bf16.mxu1 %vm256_vm0, %v14321_v19  ;;  %v6101_v19 = vld [vmem:[#allocation2 + $0x3f] sm:$0xff] }
 0x45a   : > { %v6165_v24 = vmul.f32 %v8312_v25, %v6101_v19  ;;  %v8322_v19 = vld [vmem:[%s13993_s1 + $0x678] sm:$0xff]  ;;  %v8323_v25 = vld [vmem:[%s13993_s1 + $0x680] sm:$0xff] }
 0x460   : > { %9431 = vmatmul.mubr.msk.bf16.gmra.mrb[12].mxu1 %vm256_vm0, %v14324_v59  ;;  %v6163_v59 = vmul.f32 %v8310_v3, %v6099_v36  ;;  %v6170_v36 = vmul.f32 %v8317_v45, %v6106_v5  ;;  %v6118_v5 = vld [vmem:[#allocation2 + $0xc7] sm:$0xff]  ;;  %v8329_v45 = vld [vmem:[%s13993_s1 + $0x6b0] sm:$0xff] }
 0x461   : > { %9434 = vmatprep.mubr.msk.bf16.mxu1 %vm256_vm0, %v14327_v34  ;;  %v6162_v34 = vmul.f32 %v8309_v61, %v6098_v35  ;;  %v6112_v35 = vld [vmem:[#allocation2 + $0x97] sm:$0xff]  ;;  %v6113_v61 = vld [vmem:[#allocation2 + $0x9f] sm:$0xff] }
 0x462   : > { %v6197_v3 = vpack.c.bf16 %v6171_v21, %v6170_v36  ;;  %v6183_v21 = vmul.f32 %v8330_v2, %v6119_v16  ;;  %v6182_v36 = vmul.f32 %v8329_v45, %v6118_v5  ;;  %v10161_v2 = vld [vmem:[%s13996_s4 + $0x110] sm:$0xff]   ;;  %v14359_v5 = vld [vmem:[#allocation96_spill] sm:$0xff]  ;;  %v14360_v45 = vld [vmem:[#allocation95_spill] sm:$0xff] }
 0x463   : > { %v6193_v4 = vpack.c.bf16 %v6163_v59, %v6162_v34  ;;  %v8324_v59 = vld [vmem:[%s13993_s1 + $0x688] sm:$0xff]  ;;  %v6175_v34 = vmul.f32 %v8322_v19, %v6111_v37  ;;  %v8334_v19 = vld [vmem:[%s13993_s1 + $0x6d8] sm:$0xff] }
 0x464   : > { %v6123_v37 = vld [vmem:[#allocation2 + $0xef] sm:$0xff] }
 0x468   : > { %9435 = vmatmul.mubr.msk.bf16.gmra.mrb[16].mxu1 %vm256_vm0, %v14330_v11  ;;  %v6194_v11 = vpack.c.bf16 %v6165_v24, %v6164_v42  ;;  %v6110_v42 = vld [vmem:[#allocation2 + $0x87] sm:$0xff]  ;;  %v8321_v24 = vld [vmem:[%s13993_s1 + $0x670] sm:$0xff] }
 0x469   : > { %9438 = vmatprep.mubr.msk.bf16.mxu1 %vm256_vm0, %v14333_v57  ;;  %v8315_v57 = vld [vmem:[%s13993_s1 + $0x640] sm:$0xff] }
 0x46a   : > { %v6168_v8 = vmul.f32 %v8315_v57, %v6104_v49  ;;  %v6115_v57 = vld [vmem:[#allocation2 + $0xaf] sm:$0xff]  ;;  %v8326_v49 = vld [vmem:[%s13993_s1 + $0x698] sm:$0xff] }
 0x470   : > { %9439 = vmatmul.mubr.msk.bf16.gmra.mrb[20].mxu1 %vm256_vm0, %v14336_v20  ;;  %v8316_v20 = vld [vmem:[%s13993_s1 + $0x648] sm:$0xff] }
 0x471   : > { %9442 = vmatprep.mubr.msk.bf16.mxu1 %vm256_vm0, %v14339_v10  ;;  %v6167_v10 = vmul.f32 %v8314_v9, %v6103_v56  ;;  %v6169_v58 = vmul.f32 %v8316_v20, %v6105_v53  ;;  %v8327_v53 = vld [vmem:[%s13993_s1 + $0x6a0] sm:$0xff]  ;;  %v6116_v20 = vld [vmem:[#allocation2 + $0xb7] sm:$0xff] }
 0x473   : > { %v6195_v46 = vpack.c.bf16 %v6167_v10, %v6166_v23  ;;  %v6114_v10 = vld [vmem:[#allocation2 + $0xa7] sm:$0xff]  ;;  %v6181_v23 = vmul.f32 %v8328_v7, %v6117_v27 }
 0x478   : > { %9443 = vmatmul.mubr.msk.bf16.gmra.mrb[24].mxu1 %vm256_vm0, %v14342_v44  ;;  %v6196_v44 = vpack.c.bf16 %v6169_v58, %v6168_v8  ;;  %v6179_v8 = vmul.f32 %v8326_v49, %v6115_v57  ;;  %v6180_v58 = vmul.f32 %v8327_v53, %v6116_v20  ;;  %v6127_v57 = vld [vmem:[#allocation2 + $0x10f] sm:$0xff]  ;;  %v8338_v53 = vld [vmem:[%s13993_s1 + $0x6f8] sm:$0xff] }
 0x479   : > { %9446 = vmatprep.mubr.msk.bf16.mxu1 %vm256_vm0, %v14345_v18  ;;  %v8320_v18 = vld [vmem:[%s13993_s1 + $0x668] sm:$0xff]  ;;  %v8337_v49 = vld [vmem:[%s13993_s1 + $0x6f0] sm:$0xff]  ;;  %v6191_v27 = vmul.f32 %v8338_v53, %v6127_v57 }
 0x47a   : > { %v6190_v20 = vmul.f32 %v8337_v49, %v13257_v31  ;;  %v14352_v31 = vld [vmem:[#allocation92_spill] sm:$0xff]  ;;  %v6875_v57 = vld [vmem:[#allocation2 + $0x51] sm:$0xff] }
 0x47b   : > { %v8434_v49 = vld [vmem:[%s13993_s1 + $0x838] sm:$0xff]  ;;  %v8436_v53 = vld [vmem:[%s13993_s1 + $0x848] sm:$0xff] }
 0x47c   : > { %v6207_v7 = vpack.c.bf16 %v6191_v27, %v6190_v20  ;;  %v6876_v20 = vld [vmem:[#allocation2 + $0x59] sm:$0xff]  ;;  %v6877_v27 = vld [vmem:[#allocation2 + $0x61] sm:$0xff] }
 0x480   : > { %9447 = vmatmul.mubr.msk.bf16.gmra.mrb[28].mxu1 %vm256_vm0, %v5821_v28  ;;  %v6172_v28 = vmul.f32 %v8319_v51, %v6108_v26  ;;  %v8331_v51 = vld [vmem:[%s13993_s1 + $0x6c0] sm:$0xff]  ;;  %v6120_v26 = vld [vmem:[#allocation2 + $0xd7] sm:$0xff] }
 0x481   : > { %9458 = vmatprep.mubr.msk.bf16.mxu1 %vm256_vm0, %v6192_v6  ;;  %v6173_v6 = vmul.f32 %v8320_v18, %v6109_v52  ;;  %v6121_v52 = vld [vmem:[#allocation2 + $0xdf] sm:$0xff]  ;;  %v8332_v18 = vld [vmem:[%s13993_s1 + $0x6c8] sm:$0xff] }
 0x483   : > { %v6198_v33 = vpack.c.bf16 %v6173_v6, %v6172_v28  ;;  %v6184_v28 = vmul.f32 %v8331_v51, %v6120_v26  ;;  %v6185_v6 = vmul.f32 %v8332_v18, %v6121_v52  ;;  %v10162_v51 = vld [vmem:[%s13996_s4 + $0x118] sm:$0xff]   ;;  %v14355_v26 = vpack.c.bf16 %v12845_v40, %v12827_v0  ;;  %v14357_v52 = vld [vmem:[#allocation93_spill] sm:$0xff] }
 0x484   : > { %v14363_v0 = vpack.c.bf16 %v12897_v55, %v12892_v32  ;;  %v14364_v40 = vld [vmem:[#allocation98_spill] sm:$0xff]  ;;  %v14370_v55 = vpack.c.bf16 %v12964_v50, %v12961_v39  ;;  %v8427_v32 = vld [vmem:[%s13993_s1 + $0x800] sm:$0xff]  ;;  %v8428_v39 = vld [vmem:[%s13993_s1 + $0x808] sm:$0xff]  ;;  %v14372_v50 = vpack.c.bf16 %v12982_v38, %v12975_v13 }
 0x485   : > { %v6872_v13 = vld [vmem:[#allocation2 + $0x39] sm:$0xff]  ;;  %v6873_v38 = vld [vmem:[#allocation2 + $0x41] sm:$0xff] }
 0x488   : > { %9459 = vmatmul.mubr.msk.bf16.vlgmr.msra.gmra.mrb[0].mxu1 %vm256_vm0, %v6193_v4  ;;  %v6176_v4 = vmul.f32 %v8323_v25, %v6112_v35  ;;  %v8335_v25 = vld [vmem:[%s13993_s1 + $0x6e0] sm:$0xff]  ;;  %v6124_v35 = vld [vmem:[#allocation2 + $0xf7] sm:$0xff] }
 0x489   : > { %9491 = vmatpush3.bf16.msra.mxu1 %v10155_v29  ;;  %9462 = vmatprep.mubr.msk.bf16.mxu1 %vm256_vm0, %v6194_v11  ;;  %v10158_v29 = vld [vmem:[%s13996_s4 + $0xf8] sm:$0xff]   ;;  %v6174_v11 = vmul.f32 %v8321_v24, %v6110_v42  ;;  %v6122_v42 = vld [vmem:[#allocation2 + $0xe7] sm:$0xff]  ;;  %v8333_v24 = vld [vmem:[%s13993_s1 + $0x6d0] sm:$0xff] }
 0x48a   : > { %9492 = vmatprep.subr.bf16.mxu1 %v10156_v22 }
 0x48b   : > { %v6199_v56 = vpack.c.bf16 %v6175_v34, %v6174_v11  ;;  %v6187_v34 = vmul.f32 %v8334_v19, %v6123_v37  ;;  %v6186_v11 = vmul.f32 %v8333_v24, %v6122_v42  ;;  %v6932_v19 = vmul.f32 %v8427_v32, %v6868_v43  ;;  %v6870_v42 = vld [vmem:[#allocation2 + $0x29] sm:$0xff] }
 0x48c   : > { %v8429_v24 = vld [vmem:[%s13993_s1 + $0x810] sm:$0xff] }
 0x48d   : > { %9493 = vmatpush3.bf16.msra.mxu1 %v10156_v22  ;;  %v6177_v22 = vmul.f32 %v8324_v59, %v6113_v61  ;;  %v6125_v61 = vld [vmem:[#allocation2 + $0xff] sm:$0xff]  ;;  %v8336_v59 = vld [vmem:[%s13993_s1 + $0x6e8] sm:$0xff] }
 0x48e   : > { %9494 = vmatprep.subr.bf16.mxu1 %v10157_v15  ;;  %v6882_v32 = vld [vmem:[#allocation2 + $0x89] sm:$0xff] }
 0x48f   : > { %v6200_v9 = vpack.c.bf16 %v6177_v22, %v6176_v4  ;;  %v6188_v4 = vmul.f32 %v8335_v25, %v6124_v35  ;;  %v6189_v22 = vmul.f32 %v8336_v59, %v6125_v61  ;;  %v8430_v61 = vld [vmem:[%s13993_s1 + $0x818] sm:$0xff]  ;;  %v8431_v59 = vld [vmem:[%s13993_s1 + $0x820] sm:$0xff] }
 0x490   : > { %9463 = vmatmul.mubr.msk.bf16.gmra.mrb[4].mxu1 %vm256_vm0, %v6195_v46 }
 0x491   : > { %9466 = vmatprep.mubr.msk.bf16.mxu1 %vm256_vm0, %v6196_v44  ;;  %9495 = vmatpush3.bf16.msra.mxu1 %v10157_v15  ;;  %v8325_v15 = vld [vmem:[%s13993_s1 + $0x690] sm:$0xff]  ;;  %v6202_v44 = vpack.c.bf16 %v6181_v23, %v6180_v58  ;;  %v10160_v58 = vld [vmem:[%s13996_s4 + $0x108] sm:$0xff]   ;;  %v14349_v23 = vld [vmem:[#allocation90_spill] sm:$0xff] }
 0x492   : > { %9496 = vmatprep.subr.bf16.mxu1 %v10158_v29  ;;  %v6178_v46 = vmul.f32 %v8325_v15, %v6114_v10  ;;  %v14346_v10 = vld [vmem:[#allocation85_spill] sm:$0xff]  ;;  %v14347_v15 = vld [vmem:[#allocation88_spill] sm:$0xff] }
 0x495   : > { %9497 = vmatpush3.bf16.msra.mxu1 %v10158_v29  ;;  %v6201_v29 = vpack.c.bf16 %v6179_v8, %v6178_v46  ;;  %v14348_v8 = vpack.c.bf16 %v14346_v10, %v14347_v15  ;;  %v14350_v46 = vld [vmem:[#allocation89_spill] sm:$0xff] }
 0x496   : > { %9530 = vmatprep.subr.bf16.mxu1 %v13589_v63  ;;  %v6874_v10 = vld [vmem:[#allocation2 + $0x49] sm:$0xff] }
 0x497   : > { %v8433_v15 = vld [vmem:[%s13993_s1 + $0x830] sm:$0xff] }
 0x498   : > { %9467 = vmatmul.mubr.msk.bf16.gmra.mrb[8].mxu1 %vm256_vm0, %v6197_v3  ;;  %v6203_v3 = vpack.c.bf16 %v6183_v21, %v6182_v36  ;;  %v14361_v21 = vpack.c.bf16 %v14359_v5, %v14360_v45 }
 0x499   : > { %9470 = vmatprep.mubr.msk.bf16.mxu1 %vm256_vm0, %v6198_v33  ;;  %v6204_v33 = vpack.c.bf16 %v6185_v6, %v6184_v28  ;;  %v14362_v28 = vpack.c.bf16 %v12889_v14, %v12870_v62  ;;  %v14365_v6 = vld [vmem:[#allocation97_spill] sm:$0xff] }
 0x49a   : > { %v14366_v36 = vpack.c.bf16 %v14364_v40, %v14365_v6  ;;  %v8397_v62 = vld [vmem:[%s13993_s1 + $0x7f0] sm:$0xff] }
 0x49b   : > { %v6883_v6 = vld [vmem:[#allocation2 + $0x91] sm:$0xff] }
 0x4a0   : > { %9471 = vmatmul.mubr.msk.bf16.gmra.mrb[12].mxu1 %vm256_vm0, %v6199_v56  ;;  %v6205_v56 = vpack.c.bf16 %v6187_v34, %v6186_v11  ;;  %v6935_v34 = vmul.f32 %v8430_v61, %v6871_v1  ;;  %v6934_v11 = vmul.f32 %v8429_v24, %v6870_v42  ;;  %v8445_v1 = vld [vmem:[%s13993_s1 + $0x890] sm:$0xff] }
 0x4a1   : > { %9474 = vmatprep.mubr.msk.bf16.mxu1 %vm256_vm0, %v6200_v9  ;;  %v6206_v9 = vpack.c.bf16 %v6189_v22, %v6188_v4  ;;  %v6936_v4 = vmul.f32 %v8431_v59, %v6872_v13  ;;  %v6891_v24 = vld [vmem:[#allocation2 + $0xd1] sm:$0xff] }
 0x4a8   : > { %9475 = vmatmul.mubr.msk.bf16.gmra.mrb[16].mxu1 %vm256_vm0, %v6201_v29  ;;  %v14351_v29 = vpack.c.bf16 %v14349_v23, %v14350_v46  ;;  %v6941_v23 = vmul.f32 %v8436_v53, %v6877_v27  ;;  %v6938_v46 = vmul.f32 %v8433_v15, %v6874_v10  ;;  %v6895_v15 = vld [vmem:[#allocation2 + $0xf1] sm:$0xff] }
 0x4a9   : > { %9478 = vmatprep.mubr.msk.bf16.mxu1 %vm256_vm0, %v6202_v44  ;;  %v14353_v44 = vld [vmem:[#allocation91_spill] sm:$0xff] }
 0x4aa   : > { %v14354_v16 = vpack.c.bf16 %v14352_v31, %v14353_v44  ;;  %v6879_v44 = vld [vmem:[#allocation2 + $0x71] sm:$0xff] }
 0x4b0   : > { %9479 = vmatmul.mubr.msk.bf16.gmra.mrb[20].mxu1 %vm256_vm0, %v6203_v3  ;;  %v14367_v3 = vpack.c.bf16 %v12925_v48, %v12922_v54  ;;  %v6513_v48 = vld [vmem:[#allocation2 + $0x110] sm:$0xff]  ;;  %v8398_v54 = vld [vmem:[%s13993_s1 + $0x7f8] sm:$0xff] }
 0x4b1   : > { %9482 = vmatprep.mubr.msk.bf16.mxu1 %vm256_vm0, %v6204_v33  ;;  %v14368_v33 = vld [vmem:[#allocation99_spill] sm:$0xff]  ;;  %v6577_v37 = vmul.f32 %v8398_v54, %v6513_v48  ;;  %v8441_v48 = vld [vmem:[%s13993_s1 + $0x870] sm:$0xff] }
 0x4b2   : > { %v14369_v14 = vpack.c.bf16 %v12944_v17, %v14368_v33  ;;  %v6869_v17 = vld [vmem:[#allocation2 + $0x21] sm:$0xff]  ;;  %v6946_v43 = vmul.f32 %v8441_v48, %v6882_v32  ;;  %v7296_v32 = vld [vmem:[%s10239_s11 + $0x18] sm:$0xff] }
 0x4b3   : > { %v6933_v25 = vmul.f32 %v8428_v39, %v6869_v17  ;;  %v6885_v33 = vld [vmem:[#allocation2 + $0xa1] sm:$0xff] }
 0x4b5   : > { %v6964_v60 = vpack.c.bf16 %v6933_v25, %v6932_v19  ;;  %v6889_v19 = vld [vmem:[#allocation2 + $0xc1] sm:$0xff] }
 0x4b6   : > { %v8447_v25 = vld [vmem:[%s13993_s1 + $0x8a0] sm:$0xff] }
 0x4b8   : > { %9483 = vmatmul.mubr.msk.bf16.gmra.mrb[24].mxu1 %vm256_vm0, %v6205_v56  ;;  %v6965_v56 = vpack.c.bf16 %v6935_v34, %v6934_v11  ;;  %v8450_v34 = vld [vmem:[%s13993_s1 + $0x8b8] sm:$0xff]  ;;  %v8451_v11 = vld [vmem:[%s13993_s1 + $0x8c0] sm:$0xff] }
 0x4b9   : > { %9486 = vmatprep.mubr.msk.bf16.mxu1 %vm256_vm0, %v6206_v9 }
 0x4c0   : > { %9487 = vmatmul.mubr.msk.bf16.gmra.mrb[28].mxu1 %vm256_vm0, %v6207_v7  ;;  %v8435_v7 = vld [vmem:[%s13993_s1 + $0x840] sm:$0xff] }
 0x4c1   : > { %9498 = vmatprep.mubr.msk.bf16.mxu1 %vm256_vm0, %v14348_v8  ;;  %v6939_v8 = vmul.f32 %v8434_v49, %v6875_v57  ;;  %v8449_v57 = vld [vmem:[%s13993_s1 + $0x8b0] sm:$0xff]  ;;  %v6955_v49 = vmul.f32 %v8450_v34, %v6891_v24 }
 0x4c8   : > { %9499 = vmatmul.mubr.msk.bf16.vlgmr.msra.gmra.mrb[0].mxu1 %vm256_vm0, %v14351_v29  ;;  %v6967_v29 = vpack.c.bf16 %v6939_v8, %v6938_v46  ;;  %v8454_v8 = vld [vmem:[%s13993_s1 + $0x8d8] sm:$0xff]  ;;  %v8455_v46 = vld [vmem:[%s13993_s1 + $0x8e0] sm:$0xff] }
 0x4c9   : > { %9531 = vmatpush3.bf16.msra.mxu1 %v13589_v63  ;;  %9502 = vmatprep.mubr.msk.bf16.mxu1 %vm256_vm0, %v14354_v16  ;;  %v14356_v63 = vld [vmem:[#allocation94_spill] sm:$0xff] }
 0x4ca   : > { %9532 = vmatprep.subr.bf16.mxu1 %v10160_v58  ;;  %v14358_v18 = vpack.c.bf16 %v14356_v63, %v14357_v52  ;;  %v8438_v16 = vld [vmem:[%s13993_s1 + $0x858] sm:$0xff]  ;;  %v8440_v63 = vld [vmem:[%s13993_s1 + $0x868] sm:$0xff] }
 0x4cb   : > { %v6878_v52 = vld [vmem:[#allocation2 + $0x69] sm:$0xff]  ;;  %v6943_v5 = vmul.f32 %v8438_v16, %v6879_v44  ;;  %v6959_v16 = vmul.f32 %v8454_v8, %v6895_v15  ;;  %v7301_v8 = vld [vmem:[%s10239_s11 + $0x40] sm:$0xff] }
 0x4cc   : > { %v8453_v44 = vld [vmem:[%s13993_s1 + $0x8d0] sm:$0xff] }
 0x4cd   : > { %9533 = vmatpush3.bf16.msra.mxu1 %v10160_v58  ;;  %v6940_v58 = vmul.f32 %v8435_v7, %v6876_v20 }
 0x4ce   : > { %9534 = vmatprep.subr.bf16.mxu1 %v10161_v2 }
 0x4cf   : > { %v6968_v31 = vpack.c.bf16 %v6941_v23, %v6940_v58  ;;  %v6896_v58 = vld [vmem:[#allocation2 + $0xf9] sm:$0xff]  ;;  %v6897_v23 = vld [vmem:[#allocation2 + $0x101] sm:$0xff] }
 0x4d0   : > { %9503 = vmatmul.mubr.msk.bf16.gmra.mrb[4].mxu1 %vm256_vm0, %v14355_v26  ;;  %v8439_v26 = vld [vmem:[%s13993_s1 + $0x860] sm:$0xff] }
 0x4d1   : > { %9506 = vmatprep.mubr.msk.bf16.mxu1 %vm256_vm0, %v14358_v18  ;;  %9535 = vmatpush3.bf16.msra.mxu1 %v10161_v2  ;;  %v6880_v2 = vld [vmem:[#allocation2 + $0x79] sm:$0xff]  ;;  %v8437_v18 = vld [vmem:[%s13993_s1 + $0x850] sm:$0xff] }
 0x4d2   : > { %9536 = vmatprep.subr.bf16.mxu1 %v10162_v51  ;;  %v6944_v45 = vmul.f32 %v8439_v26, %v6880_v2  ;;  %v6960_v2 = vmul.f32 %v8455_v46, %v6896_v58  ;;  %v7304_v46 = vld [vmem:[%s10239_s11 + $0x58] sm:$0xff] }
 0x4d5   : > { %9537 = vmatpush3.bf16.msra.mxu1 %v10162_v51  ;;  %v6881_v51 = vld [vmem:[#allocation2 + $0x81] sm:$0xff] }
 0x4d8   : > { %9507 = vmatmul.mubr.msk.bf16.gmra.mrb[8].mxu1 %vm256_vm0, %v14361_v21  ;;  %v6945_v21 = vmul.f32 %v8440_v63, %v6881_v51 }
 0x4d9   : > { %9510 = vmatprep.mubr.msk.bf16.mxu1 %vm256_vm0, %v14362_v28  ;;  %v6942_v28 = vmul.f32 %v8437_v18, %v6878_v52  ;;  %v6899_v18 = vld [vmem:[#allocation2 + $0x111] sm:$0xff] }
 0x4da   : > { %v6970_v40 = vpack.c.bf16 %v6945_v21, %v6944_v45  ;;  %v8458_v45 = vld [vmem:[%s13993_s1 + $0x8f8] sm:$0xff] }
 0x4e0   : > { %9511 = vmatmul.mubr.msk.bf16.gmra.mrb[12].mxu1 %vm256_vm0, %v14363_v0  ;;  %v6969_v0 = vpack.c.bf16 %v6943_v5, %v6942_v28  ;;  %v8457_v5 = vld [vmem:[%s13993_s1 + $0x8f0] sm:$0xff]  ;;  %v6963_v28 = vmul.f32 %v8458_v45, %v6899_v18 }
 0x4e1   : > { %9514 = vmatprep.mubr.msk.bf16.mxu1 %vm256_vm0, %v14366_v36  ;;  %v8442_v36 = vld [vmem:[%s13993_s1 + $0x878] sm:$0xff]  ;;  %v6962_v21 = vmul.f32 %v8457_v5, %v13514_v41 }
 0x4e8   : > { %9515 = vmatmul.mubr.msk.bf16.gmra.mrb[16].mxu1 %vm256_vm0, %v14367_v3  ;;  %v6884_v3 = vld [vmem:[#allocation2 + $0x99] sm:$0xff] }
 0x4e9   : > { %9518 = vmatprep.mubr.msk.bf16.mxu1 %vm256_vm0, %v14369_v14  ;;  %v8443_v14 = vld [vmem:[%s13993_s1 + $0x880] sm:$0xff] }
 0x4ea   : > { %v6948_v54 = vmul.f32 %v8443_v14, %v6884_v3  ;;  %v7293_v14 = vld [vmem:[%s10239_s11] sm:$0xff] }
 0x4f0   : > { %9519 = vmatmul.mubr.msk.bf16.gmra.mrb[20].mxu1 %vm256_vm0, %v6589_v12  ;;  %v6576_v12 = vmul.f32 %v8397_v62, %v13423_v47  ;;  %v8432_v47 = vld [vmem:[%s13993_s1 + $0x828] sm:$0xff]  ;;  %v6947_v62 = vmul.f32 %v8442_v36, %v6883_v6  ;;  %v7295_v36 = vld [vmem:[%s10239_s11 + $0x10] sm:$0xff] }
 0x4f1   : > { %9522 = vmatprep.mubr.msk.bf16.mxu1 %vm256_vm0, %v14370_v55  ;;  %v6937_v22 = vmul.f32 %v8432_v47, %v6873_v38  ;;  %v8444_v55 = vld [vmem:[%s13993_s1 + $0x888] sm:$0xff] }
 0x4f2   : > { %v6593_v35 = vpack.c.bf16 %v6577_v37, %v6576_v12  ;;  %v6971_v17 = vpack.c.bf16 %v6947_v62, %v6946_v43  ;;  %v8446_v12 = vld [vmem:[%s13993_s1 + $0x898] sm:$0xff] }
 0x4f3   : > { %v6966_v9 = vpack.c.bf16 %v6937_v22, %v6936_v4  ;;  %v6888_v37 = vld [vmem:[#allocation2 + $0xb9] sm:$0xff]  ;;  %v6893_v22 = vld [vmem:[#allocation2 + $0xe1] sm:$0xff] }
 0x4f4   : > { %v6952_v59 = vmul.f32 %v8447_v25, %v6888_v37  ;;  %v6892_v4 = vld [vmem:[#allocation2 + $0xd9] sm:$0xff] }
 0x4f5   : > { %v6956_v53 = vmul.f32 %v8451_v11, %v6892_v4  ;;  %v7298_v4 = vld [vmem:[%s10239_s11 + $0x28] sm:$0xff] }
 0x4f8   : > { %9523 = vmatmul.mubr.msk.bf16.gmra.mrb[24].mxu1 %vm256_vm0, %v14371_v30  ;;  %v6949_v30 = vmul.f32 %v8444_v55, %v6885_v33 }
 0x4f9   : > { %9526 = vmatprep.mubr.msk.bf16.mxu1 %vm256_vm0, %v14372_v50  ;;  %v6887_v50 = vld [vmem:[#allocation2 + $0xb1] sm:$0xff] }
 0x4fa   : > { %v6972_v39 = vpack.c.bf16 %v6949_v30, %v6948_v54  ;;  %v6951_v61 = vmul.f32 %v8446_v12, %v6887_v50  ;;  %v7294_v30 = vld [vmem:[%s10239_s11 + $0x8] sm:$0xff] }
 0x500   : > { %9527 = vmatmul.mubr.msk.bf16.gmra.mrb[28].mxu1 %vm256_vm0, %v6593_v35  ;;  %v8448_v35 = vld [vmem:[%s13993_s1 + $0x8a8] sm:$0xff] }
 0x501   : > { %9538 = vmatprep.mubr.msk.bf16.mxu1 %vm256_vm0, %v6964_v60  ;;  %v6886_v60 = vld [vmem:[#allocation2 + $0xa9] sm:$0xff]  ;;  %v6953_v13 = vmul.f32 %v8448_v35, %v6889_v19 }
 0x502   : > { %v6950_v38 = vmul.f32 %v8445_v1, %v6886_v60  ;;  %v7299_v60 = vld [vmem:[%s10239_s11 + $0x30] sm:$0xff] }
 0x503   : > { %v6974_v42 = vpack.c.bf16 %v6953_v13, %v6952_v59  ;;  %v7297_v59 = vld [vmem:[%s10239_s11 + $0x20] sm:$0xff] }
 0x504   : > { %v6973_v47 = vpack.c.bf16 %v6951_v61, %v6950_v38 }
 0x508   : > { %9539 = vmatmul.mubr.msk.bf16.vlgmr.msra.gmra.mrb[0].mxu1 %vm256_vm0, %v6965_v56  ;;  %v8452_v56 = vld [vmem:[%s13993_s1 + $0x8c8] sm:$0xff] }
 0x509   : > { %9542 = vmatprep.mubr.msk.bf16.mxu1 %vm256_vm0, %v6966_v9  ;;  %v6890_v9 = vld [vmem:[#allocation2 + $0xc9] sm:$0xff]  ;;  %v6957_v20 = vmul.f32 %v8452_v56, %v6893_v22 }
 0x50a   : > { %v6954_v27 = vmul.f32 %v8449_v57, %v6890_v9 }
 0x50b   : > { %v6976_v10 = vpack.c.bf16 %v6957_v20, %v6956_v53 }
 0x50c   : > { %v6975_v7 = vpack.c.bf16 %v6955_v49, %v6954_v27 }
 0x510   : > { %9543 = vmatmul.mubr.msk.bf16.gmra.mrb[4].mxu1 %vm256_vm0, %v6967_v29  ;;  %v8456_v29 = vld [vmem:[%s13993_s1 + $0x8e8] sm:$0xff] }
 0x511   : > { %9546 = vmatprep.mubr.msk.bf16.mxu1 %vm256_vm0, %v6968_v31  ;;  %v6894_v31 = vld [vmem:[#allocation2 + $0xe9] sm:$0xff]  ;;  %v6961_v51 = vmul.f32 %v8456_v29, %v6897_v23 }
 0x512   : > { %v6958_v26 = vmul.f32 %v8453_v44, %v6894_v31 }
 0x513   : > { %v6978_v52 = vpack.c.bf16 %v6961_v51, %v6960_v2 }
 0x514   : > { %v6977_v63 = vpack.c.bf16 %v6959_v16, %v6958_v26  ;;  %v7302_v16 = vld [vmem:[%s10239_s11 + $0x48] sm:$0xff] }
 0x518   : > { %9547 = vmatmul.mubr.msk.bf16.gmra.mrb[8].mxu1 %vm256_vm0, %v6969_v0  ;;  %v6979_v0 = vpack.c.bf16 %v6963_v28, %v6962_v21  ;;  %v7307_v28 = vld [vmem:[%s10239_s11 + $0x70] sm:$0xff] }
 0x519   : > { %9550 = vmatprep.mubr.msk.bf16.mxu1 %vm256_vm0, %v6970_v40  ;;  %v13852_v40 = vld [vmem:[%s13997_s5] ss:$0 sm:$0xff] }
 0x520   : > { %9551 = vmatmul.mubr.msk.bf16.gmra.mrb[12].mxu1 %vm256_vm0, %v6971_v17 }
 0x521   : > { %9554 = vmatprep.mubr.msk.bf16.mxu1 %vm256_vm0, %v6972_v39 }
 0x528   : > { %9555 = vmatmul.mubr.msk.bf16.gmra.mrb[16].mxu1 %vm256_vm0, %v6973_v47  ;;  %v7300_v47 = vld [vmem:[%s10239_s11 + $0x38] sm:$0xff] }
 0x529   : > { %9558 = vmatprep.mubr.msk.bf16.mxu1 %vm256_vm0, %v6974_v42 }
 0x530   : > { %9559 = vmatmul.mubr.msk.bf16.gmra.mrb[20].mxu1 %vm256_vm0, %v6975_v7  ;;  %v7303_v7 = vld [vmem:[%s10239_s11 + $0x50] sm:$0xff] }
 0x531   : > { %9562 = vmatprep.mubr.msk.bf16.mxu1 %vm256_vm0, %v6976_v10 }
 0x538   : > { %9563 = vmatmul.mubr.msk.bf16.gmra.mrb[24].mxu1 %vm256_vm0, %v6977_v63 }
 0x539   : > { %9566 = vmatprep.mubr.msk.bf16.mxu1 %vm256_vm0, %v6978_v52 }
 0x540   : > { %9567 = vmatmul.mubr.msk.bf16.gmra.mrb[28].mxu1 %vm256_vm0, %v6979_v0 }
 0x5db   : > { %v9540_v6 = vpop.f32.mrb[0].mxu1 }
 0x5dc   : > { %v7263_v3 = vadd.f32 %v9540_v6, %v13852_v40  ;;  %v7095_v33 = vpop.f32.mrb[1].mxu1 }
 0x5dd   : > { %v7261_v55 = vadd.f32 %v13852_v40, %v7095_v33  ;;  %v9541_v41 = vpop.f32.mrb[2].mxu1 }
 0x5de   : > { %v7327_v48 = vadd.f32 %v7295_v36, %v7263_v3  ;;  %v7264_v62 = vadd.f32 %v9541_v41, %v13852_v40  ;;  %v7098_v54 = vpop.f32.mrb[3].mxu1  ;;  %v7305_v36 = vld [vmem:[%s10239_s11 + $0x60] sm:$0xff] }
 0x5df   : > { %v7325_v43 = vadd.f32 %v7293_v14, %v7261_v55  ;;  %v7262_v17 = vadd.f32 %v13852_v40, %v7098_v54  ;;  %v7308_v14 = vld [vmem:[%s10239_s11 + $0x78] sm:$0xff] }
 0x5e0   : > { %v7359_v39 = vmax.f32 %v7327_v48, 0.0  ;;  %v7328_v50 = vadd.f32 %v7296_v32, %v7264_v62  ;;  %v7306_v48 = vld [vmem:[%s10239_s11 + $0x68] sm:$0xff] }
 0x5e1   : > { %v7357_v12 = vmax.f32 %v7325_v43, 0.0  ;;  %v7326_v37 = vadd.f32 %v7294_v30, %v7262_v17 }
 0x5e2   : > { %7391 = vst.msk [vmem:[%s13866_s28 + $0x10] sm:$0xff] %vm256_vm0, %v7359_v39  ;;  %v7360_v19 = vmax.f32 %v7328_v50, 0.0 }
 0x5e3   : > { %7389 = vst.msk [vmem:[%s13866_s28] sm:$0xff] %vm256_vm0, %v7357_v12  ;;  %v7358_v25 = vmax.f32 %v7326_v37, 0.0  ;;  %v9544_v35 = vpop.f32.mrb[4].mxu1 }
 0x5e4   : > { %7392 = vst.msk [vmem:[%s13866_s28 + $0x18] sm:$0xff] %vm256_vm0, %v7360_v19  ;;  %v7267_v1 = vadd.f32 %v9544_v35, %v13852_v40  ;;  %v7111_v61 = vpop.f32.mrb[5].mxu1  ;;  %v7311_v19 = vld [vmem:[%s10239_s11 + $0x90] sm:$0xff] }
 0x5e5   : > { %7390 = vst.msk [vmem:[%s13866_s28 + $0x8] sm:$0xff] %vm256_vm0, %v7358_v25  ;;  %v7265_v13 = vadd.f32 %v13852_v40, %v7111_v61  ;;  %v9545_v38 = vpop.f32.mrb[6].mxu1 }
 0x5e6   : > { %v7331_v42 = vadd.f32 %v7299_v60, %v7267_v1  ;;  %v7268_v24 = vadd.f32 %v9545_v38, %v13852_v40  ;;  %v7114_v34 = vpop.f32.mrb[7].mxu1  ;;  %v7309_v60 = vld [vmem:[%s10239_s11 + $0x80] sm:$0xff] }
 0x5e7   : > { %v7329_v22 = vadd.f32 %v7297_v59, %v7265_v13  ;;  %v7266_v11 = vadd.f32 %v13852_v40, %v7114_v34  ;;  %v7312_v59 = vld [vmem:[%s10239_s11 + $0x98] sm:$0xff] }
 0x5e8   : > { %v7363_v56 = vmax.f32 %v7331_v42, 0.0  ;;  %v7332_v9 = vadd.f32 %v7300_v47, %v7268_v24  ;;  %v7310_v42 = vld [vmem:[%s10239_s11 + $0x88] sm:$0xff] }
 0x5e9   : > { %v7361_v57 = vmax.f32 %v7329_v22, 0.0  ;;  %v7330_v49 = vadd.f32 %v7298_v4, %v7266_v11 }
 0x5ea   : > { %7395 = vst.msk [vmem:[%s13866_s28 + $0x30] sm:$0xff] %vm256_vm0, %v7363_v56  ;;  %v7364_v53 = vmax.f32 %v7332_v9, 0.0 }
 0x5eb   : > { %7393 = vst.msk [vmem:[%s13866_s28 + $0x20] sm:$0xff] %vm256_vm0, %v7361_v57  ;;  %v7362_v20 = vmax.f32 %v7330_v49, 0.0  ;;  %v9548_v27 = vpop.f32.mrb[8].mxu1 }
 0x5ec   : > { %7396 = vst.msk [vmem:[%s13866_s28 + $0x38] sm:$0xff] %vm256_vm0, %v7364_v53  ;;  %v7271_v10 = vadd.f32 %v9548_v27, %v13852_v40  ;;  %v7127_v15 = vpop.f32.mrb[9].mxu1  ;;  %v7315_v53 = vld [vmem:[%s10239_s11 + $0xb0] sm:$0xff] }
 0x5ed   : > { %7394 = vst.msk [vmem:[%s13866_s28 + $0x28] sm:$0xff] %vm256_vm0, %v7362_v20  ;;  %v7269_v58 = vadd.f32 %v13852_v40, %v7127_v15  ;;  %v9549_v23 = vpop.f32.mrb[10].mxu1 }
 0x5ee   : > { %v7335_v29 = vadd.f32 %v7303_v7, %v7271_v10  ;;  %v7272_v31 = vadd.f32 %v9549_v23, %v13852_v40  ;;  %v7130_v44 = vpop.f32.mrb[11].mxu1  ;;  %v7313_v7 = vld [vmem:[%s10239_s11 + $0xa0] sm:$0xff] }
 0x5ef   : > { %v7333_v2 = vadd.f32 %v7301_v8, %v7269_v58  ;;  %v7270_v51 = vadd.f32 %v13852_v40, %v7130_v44  ;;  %v7316_v8 = vld [vmem:[%s10239_s11 + $0xb8] sm:$0xff] }
 0x5f0   : > { %v7367_v26 = vmax.f32 %v7335_v29, 0.0  ;;  %v7336_v63 = vadd.f32 %v7304_v46, %v7272_v31  ;;  %v7314_v29 = vld [vmem:[%s10239_s11 + $0xa8] sm:$0xff] }
 0x5f1   : > { %v7365_v52 = vmax.f32 %v7333_v2, 0.0  ;;  %v7334_v18 = vadd.f32 %v7302_v16, %v7270_v51 }
 0x5f2   : > { %7399 = vst.msk [vmem:[%s13866_s28 + $0x50] sm:$0xff] %vm256_vm0, %v7367_v26  ;;  %v7368_v5 = vmax.f32 %v7336_v63, 0.0 }
 0x5f3   : > { %7397 = vst.msk [vmem:[%s13866_s28 + $0x40] sm:$0xff] %vm256_vm0, %v7365_v52  ;;  %v7366_v45 = vmax.f32 %v7334_v18, 0.0  ;;  %v9552_v21 = vpop.f32.mrb[12].mxu1 }
 0x5f4   : > { %7400 = vst.msk [vmem:[%s13866_s28 + $0x58] sm:$0xff] %vm256_vm0, %v7368_v5  ;;  %v7275_v0 = vadd.f32 %v9552_v21, %v13852_v40  ;;  %v7143_v6 = vpop.f32.mrb[13].mxu1  ;;  %v7319_v5 = vld [vmem:[%s10239_s11 + $0xd0] sm:$0xff] }
 0x5f5   : > { %7398 = vst.msk [vmem:[%s13866_s28 + $0x48] sm:$0xff] %vm256_vm0, %v7366_v45  ;;  %v7273_v3 = vadd.f32 %v13852_v40, %v7143_v6  ;;  %v9553_v33 = vpop.f32.mrb[14].mxu1 }
 0x5f6   : > { %v7339_v55 = vadd.f32 %v7307_v28, %v7275_v0  ;;  %v7276_v41 = vadd.f32 %v9553_v33, %v13852_v40  ;;  %v7146_v32 = vpop.f32.mrb[15].mxu1  ;;  %v7317_v28 = vld [vmem:[%s10239_s11 + $0xc0] sm:$0xff] }
 0x5f7   : > { %v7337_v62 = vadd.f32 %v7305_v36, %v7273_v3  ;;  %v7274_v54 = vadd.f32 %v13852_v40, %v7146_v32  ;;  %v7320_v36 = vld [vmem:[%s10239_s11 + $0xd8] sm:$0xff] }
 0x5f8   : > { %v7371_v30 = vmax.f32 %v7339_v55, 0.0  ;;  %v7340_v43 = vadd.f32 %v7308_v14, %v7276_v41  ;;  %v7318_v55 = vld [vmem:[%s10239_s11 + $0xc8] sm:$0xff] }
 0x5f9   : > { %v7369_v17 = vmax.f32 %v7337_v62, 0.0  ;;  %v7338_v39 = vadd.f32 %v7306_v48, %v7274_v54 }
 0x5fa   : > { %7403 = vst.msk [vmem:[%s13866_s28 + $0x70] sm:$0xff] %vm256_vm0, %v7371_v30  ;;  %v7372_v50 = vmax.f32 %v7340_v43, 0.0 }
 0x5fb   : > { %7401 = vst.msk [vmem:[%s13866_s28 + $0x60] sm:$0xff] %vm256_vm0, %v7369_v17  ;;  %v7370_v12 = vmax.f32 %v7338_v39, 0.0  ;;  %v9556_v37 = vpop.f32.mrb[16].mxu1 }
 0x5fc   : > { %7404 = vst.msk [vmem:[%s13866_s28 + $0x78] sm:$0xff] %vm256_vm0, %v7372_v50  ;;  %v7279_v25 = vadd.f32 %v9556_v37, %v13852_v40  ;;  %v7159_v35 = vpop.f32.mrb[17].mxu1  ;;  %v7323_v50 = vld [vmem:[%s10239_s11 + $0xf0] sm:$0xff] }
 0x5fd   : > { %7402 = vst.msk [vmem:[%s13866_s28 + $0x68] sm:$0xff] %vm256_vm0, %v7370_v12  ;;  %v7277_v1 = vadd.f32 %v13852_v40, %v7159_v35  ;;  %v9557_v61 = vpop.f32.mrb[18].mxu1 }
 0x5fe   : > { %v7343_v13 = vadd.f32 %v7311_v19, %v7279_v25  ;;  %v7280_v38 = vadd.f32 %v9557_v61, %v13852_v40  ;;  %v7162_v47 = vpop.f32.mrb[19].mxu1  ;;  %v7321_v19 = vld [vmem:[%s10239_s11 + $0xe0] sm:$0xff] }
 0x5ff   : > { %v7341_v24 = vadd.f32 %v7309_v60, %v7277_v1  ;;  %v7278_v34 = vadd.f32 %v13852_v40, %v7162_v47  ;;  %v7324_v60 = vld [vmem:[%s10239_s11 + $0xf8] sm:$0xff] }
 0x600   : > { %v7375_v4 = vmax.f32 %v7343_v13, 0.0  ;;  %v7344_v22 = vadd.f32 %v7312_v59, %v7280_v38  ;;  %v7322_v13 = vld [vmem:[%s10239_s11 + $0xe8] sm:$0xff] }
 0x601   : > { %v7373_v11 = vmax.f32 %v7341_v24, 0.0  ;;  %v7342_v56 = vadd.f32 %v7310_v42, %v7278_v34 }
 0x602   : > { %7407 = vst.msk [vmem:[%s13866_s28 + $0x90] sm:$0xff] %vm256_vm0, %v7375_v4  ;;  %v7376_v9 = vmax.f32 %v7344_v22, 0.0 }
 0x603   : > { %7405 = vst.msk [vmem:[%s13866_s28 + $0x80] sm:$0xff] %vm256_vm0, %v7373_v11  ;;  %v7374_v57 = vmax.f32 %v7342_v56, 0.0  ;;  %v9560_v49 = vpop.f32.mrb[20].mxu1 }
 0x604   : > { %7408 = vst.msk [vmem:[%s13866_s28 + $0x98] sm:$0xff] %vm256_vm0, %v7376_v9  ;;  %v7283_v20 = vadd.f32 %v9560_v49, %v13852_v40  ;;  %v7175_v27 = vpop.f32.mrb[21].mxu1 }
 0x605   : > { %7406 = vst.msk [vmem:[%s13866_s28 + $0x88] sm:$0xff] %vm256_vm0, %v7374_v57  ;;  %v7281_v10 = vadd.f32 %v13852_v40, %v7175_v27  ;;  %v9561_v15 = vpop.f32.mrb[22].mxu1 }
 0x606   : > { %v7347_v58 = vadd.f32 %v7315_v53, %v7283_v20  ;;  %v7284_v23 = vadd.f32 %v9561_v15, %v13852_v40  ;;  %v7178_v46 = vpop.f32.mrb[23].mxu1 }
 0x607   : > { %v7345_v31 = vadd.f32 %v7313_v7, %v7281_v10  ;;  %v7282_v44 = vadd.f32 %v13852_v40, %v7178_v46 }
 0x608   : > { %v7379_v16 = vmax.f32 %v7347_v58, 0.0  ;;  %v7348_v2 = vadd.f32 %v7316_v8, %v7284_v23 }
 0x609   : > { %v7377_v51 = vmax.f32 %v7345_v31, 0.0  ;;  %v7346_v26 = vadd.f32 %v7314_v29, %v7282_v44 }
 0x60a   : > { %7411 = vst.msk [vmem:[%s13866_s28 + $0xb0] sm:$0xff] %vm256_vm0, %v7379_v16  ;;  %v7380_v63 = vmax.f32 %v7348_v2, 0.0 }
 0x60b   : > { %7409 = vst.msk [vmem:[%s13866_s28 + $0xa0] sm:$0xff] %vm256_vm0, %v7377_v51  ;;  %v7378_v52 = vmax.f32 %v7346_v26, 0.0  ;;  %v9564_v18 = vpop.f32.mrb[24].mxu1 }
 0x60c   : > { %7412 = vst.msk [vmem:[%s13866_s28 + $0xb8] sm:$0xff] %vm256_vm0, %v7380_v63  ;;  %v7287_v45 = vadd.f32 %v9564_v18, %v13852_v40  ;;  %v7191_v21 = vpop.f32.mrb[25].mxu1 }
 0x60d   : > { %7410 = vst.msk [vmem:[%s13866_s28 + $0xa8] sm:$0xff] %vm256_vm0, %v7378_v52  ;;  %v7285_v0 = vadd.f32 %v13852_v40, %v7191_v21  ;;  %v9565_v6 = vpop.f32.mrb[26].mxu1 }
 0x60e   : > { %v7351_v3 = vadd.f32 %v7319_v5, %v7287_v45  ;;  %v7288_v33 = vadd.f32 %v9565_v6, %v13852_v40  ;;  %v7194_v14 = vpop.f32.mrb[27].mxu1 }
 0x60f   : > { %v7349_v41 = vadd.f32 %v7317_v28, %v7285_v0  ;;  %v7286_v32 = vadd.f32 %v13852_v40, %v7194_v14 }
 0x610   : > { %v7383_v48 = vmax.f32 %v7351_v3, 0.0  ;;  %v7352_v62 = vadd.f32 %v7320_v36, %v7288_v33 }
 0x611   : > { %v7381_v54 = vmax.f32 %v7349_v41, 0.0  ;;  %v7350_v30 = vadd.f32 %v7318_v55, %v7286_v32 }
 0x612   : > { %7415 = vst.msk [vmem:[%s13866_s28 + $0xd0] sm:$0xff] %vm256_vm0, %v7383_v48  ;;  %v7384_v43 = vmax.f32 %v7352_v62, 0.0 }
 0x613   : > { %7413 = vst.msk [vmem:[%s13866_s28 + $0xc0] sm:$0xff] %vm256_vm0, %v7381_v54  ;;  %v7382_v17 = vmax.f32 %v7350_v30, 0.0  ;;  %v9568_v39 = vpop.f32.mrb[28].mxu1 }
 0x614   : > { %7416 = vst.msk [vmem:[%s13866_s28 + $0xd8] sm:$0xff] %vm256_vm0, %v7384_v43  ;;  %v7291_v12 = vadd.f32 %v9568_v39, %v13852_v40  ;;  %v7207_v37 = vpop.f32.mrb[29].mxu1 }
 0x615   : > { %7414 = vst.msk [vmem:[%s13866_s28 + $0xc8] sm:$0xff] %vm256_vm0, %v7382_v17  ;;  %v7289_v25 = vadd.f32 %v13852_v40, %v7207_v37  ;;  %v9569_v35 = vpop.f32.mrb[30].mxu1 }
 0x616   : > { %v7355_v1 = vadd.f32 %v7323_v50, %v7291_v12  ;;  %v7292_v61 = vadd.f32 %v9569_v35, %v13852_v40  ;;  %v7210_v59 = vpop.f32.mrb[31].mxu1 }
 0x617   : > { %v7353_v38 = vadd.f32 %v7321_v19, %v7289_v25  ;;  %v7290_v47 = vadd.f32 %v13852_v40, %v7210_v59 }
 0x618   : > { %v7387_v42 = vmax.f32 %v7355_v1, 0.0  ;;  %v7356_v24 = vadd.f32 %v7324_v60, %v7292_v61 }
 0x619   : > { %v7385_v34 = vmax.f32 %v7353_v38, 0.0  ;;  %v7354_v4 = vadd.f32 %v7322_v13, %v7290_v47 }
 0x61a   : > { %7419 = vst.msk [vmem:[%s13866_s28 + $0xf0] sm:$0xff] %vm256_vm0, %v7387_v42  ;;  %v7388_v22 = vmax.f32 %v7356_v24, 0.0 }
 0x61b   : > { %7417 = vst.msk [vmem:[%s13866_s28 + $0xe0] sm:$0xff] %vm256_vm0, %v7385_v34  ;;  %v7386_v11 = vmax.f32 %v7354_v4, 0.0 }
 0x61c   : > { %7420 = vst.msk [vmem:[%s13866_s28 + $0xf8] sm:$0xff] %vm256_vm0, %v7388_v22 }
 0x61d   : > { %7418 = vst.msk [vmem:[%s13866_s28 + $0xe8] sm:$0xff] %vm256_vm0, %v7386_v11 }
 0x61e PF: > { %s16_s21 = sadd.s32 1, %s10169_s21  }
 0x61f   : > { %p13_p4 = scmp.ge.s32.totalorder %s16_s21, 4  }
 0x621   :  { %15 = sbr.rel (!%p13_p4) target bundleno = 1 (0x1), region = 98 }

</bundles_post_ra>
